<compile_context>
chip_gen: v5e
topology: v5e:2x2
jax: 0.10.0
libtpu: 0.0.40
codegen_flags: <defaults>
</compile_context>

<pallas_src>
import functools

import numpy as np

import jax
import jax.numpy as jnp
from jax.experimental import pallas as pl
from jax.experimental.pallas import tpu as pltpu


def _conv_bn_relu_kernel(x_ref, w_ref, m_ref, scale_ref, bias_ref, o_ref,
                         xp_ref, *, S, HW, W, K, pad, pad_l):
    """Fused Conv3d(KxKxK, pad) + folded BN + ReLU for one (batch, cout-tile).

    x_ref:     (1, Cin, S)          activations, spatial flattened onto lanes
    w_ref:     (K^3, Ct, Cin)       conv weight, one (Ct, Cin) matrix per tap
    m_ref:     (K^3, 1, S)          per-tap {0,1} validity mask (zero padding)
    scale_ref: (Ct, 1)              folded BN scale = gamma / sqrt(var + eps)
    bias_ref:  (Ct, 1)              folded BN bias  = beta - mean * scale
    o_ref:     (1, Ct, S)           output tile (lane-dense store)
    xp_ref:    (Cin, pad_l+S+pad_l) VMEM staging buffer (lane-padded copy of x)
    """
    f32 = jnp.float32
    ct = o_ref.shape[1]

    # Stage x into a lane-padded VMEM scratch (zeros at both ends) so every
    # conv tap below is an in-bounds, statically-offset lane slice.  This
    # replaces the old jnp.pad/stack HBM glue with a pure VMEM copy.
    xp_ref[...] = jnp.zeros(xp_ref.shape, f32)
    xp_ref[:, pl.ds(pad_l, S)] = x_ref[0]
    xp = xp_ref[...]                                     # (Cin, pad_l+S+pad_l)

    acc = jnp.zeros((ct, S), f32)
    t = 0
    for kd in range(K):
        dd = kd - pad
        for kh in range(K):
            dh = kh - pad
            for kw in range(K):
                dw = kw - pad
                off = dd * HW + dh * W + dw              # flat lane offset
                start = pad_l + off                      # static, in-bounds
                xs = xp[:, start:start + S]              # (Cin, S) shifted view
                xs = xs * m_ref[t]                       # zero out-of-volume taps
                acc = acc + jnp.dot(w_ref[t], xs,        # MXU matmul per tap
                                    preferred_element_type=f32)
                t += 1

    y = acc * scale_ref[...] + bias_ref[...]             # folded BatchNorm3d
    o_ref[0] = jnp.maximum(y, 0.0).astype(o_ref.dtype)   # ReLU, lane-dense store


def _pick_cout_tile(cout: int) -> int:
    """Cout tile: full channel dim for small Cout, else a multiple-of-8 tile."""
    if cout <= 256:
        return cout
    for t in (256, 128, 64, 32, 16, 8):
        if cout % t == 0:
            return t
    return cout


def conv_bn_relu3d_pallas(x, conv_w, gamma, beta, running_mean, running_var,
                          *, eps=1e-5, stride=1, pad=1, dilation=1):
    """Forward of ConvBnReLU3D.  x: (B, Cin, D, H, W); conv_w: (Cout, Cin, K, K, K)."""
    assert stride == 1 and dilation == 1, (
        "only the module defaults stride=1, dilation=1 are implemented")
    B, Cin, D, H, W = x.shape
    Cout, Cin_w, K, K_h, K_w = conv_w.shape
    assert Cin_w == Cin and K_h == K and K_w == K
    f32 = jnp.float32

    S = D * H * W
    HW = H * W
    K3 = K * K * K
    # Largest |flat offset| of any tap; round the staging pad up to a full
    # 128-lane vreg width so the staging store stays lane-aligned.
    max_off = max(pad, K - 1 - pad) * (HW + W + 1)
    pad_l = ((max_off + 127) // 128) * 128

    x_flat = x.reshape(B, Cin, S).astype(f32)
    # (K^3, Cout, Cin): one MXU weight matrix per conv tap, tap-major ordering
    # t = (kd*K + kh)*K + kw (matches the in-kernel loop).
    w_taps = jnp.transpose(conv_w.reshape(Cout, Cin, K3), (2, 0, 1)).astype(f32)

    # Fold BatchNorm3d (eval mode) into a per-channel scale/bias.
    scale = (gamma / jnp.sqrt(running_var + eps)).astype(f32)
    bias = (beta.astype(f32) - running_mean.astype(f32) * scale)
    scale = scale.reshape(Cout, 1)
    bias = bias.reshape(Cout, 1)

    # Precomputed per-tap validity masks for the conv zero padding, so the
    # kernel needs no integer div/mod along the lane axis.
    d_i = np.arange(D)[:, None, None]
    h_i = np.arange(H)[None, :, None]
    w_i = np.arange(W)[None, None, :]
    masks = np.empty((K3, 1, S), np.float32)
    t = 0
    for kd in range(K):
        dd = kd - pad
        for kh in range(K):
            dh = kh - pad
            for kw in range(K):
                dw = kw - pad
                ok = ((d_i + dd >= 0) & (d_i + dd < D) &
                      (h_i + dh >= 0) & (h_i + dh < H) &
                      (w_i + dw >= 0) & (w_i + dw < W))
                masks[t, 0, :] = ok.reshape(-1).astype(np.float32)
                t += 1
    masks = jnp.asarray(masks)

    ct = _pick_cout_tile(Cout)
    grid = (B, Cout // ct)

    kernel = functools.partial(_conv_bn_relu_kernel, S=S, HW=HW, W=W, K=K,
                               pad=pad, pad_l=pad_l)
    out_flat = pl.pallas_call(
        kernel,
        out_shape=jax.ShapeDtypeStruct((B, Cout, S), f32),
        grid=grid,
        in_specs=[
            pl.BlockSpec((1, Cin, S), lambda b, c: (b, 0, 0)),
            pl.BlockSpec((K3, ct, Cin), lambda b, c: (0, c, 0)),
            pl.BlockSpec((K3, 1, S), lambda b, c: (0, 0, 0)),
            pl.BlockSpec((ct, 1), lambda b, c: (c, 0)),
            pl.BlockSpec((ct, 1), lambda b, c: (c, 0)),
        ],
        out_specs=pl.BlockSpec((1, ct, S), lambda b, c: (b, c, 0)),
        scratch_shapes=[pltpu.VMEM((Cin, pad_l + S + pad_l), f32)],
        compiler_params=pltpu.CompilerParams(
            dimension_semantics=("parallel", "parallel")),
    )(x_flat, w_taps, masks, scale, bias)
    return out_flat.reshape(B, Cout, D, H, W)


# ---------------------------- pure-JAX reference ----------------------------

def conv_bn_relu3d_ref(x, conv_w, gamma, beta, running_mean, running_var,
                       *, eps=1e-5, pad=1):
    y = jax.lax.conv_general_dilated(
        x, conv_w, window_strides=(1, 1, 1), padding=[(pad, pad)] * 3,
        dimension_numbers=("NCDHW", "OIDHW", "NCDHW"),
        precision=jax.lax.Precision.HIGHEST)
    scale = gamma / jnp.sqrt(running_var + eps)
    bias = beta - running_mean * scale
    y = y * scale[None, :, None, None, None] + bias[None, :, None, None, None]
    return jnp.maximum(y, 0.0)


# --------------------------------- main --------------------------------------

if __name__ == "__main__":
    B, Cin, Cout, D, H, W = 2, 16, 16, 8, 8, 8     # S = D*H*W = 512 (lane-dense)
    K, pad = 3, 1

    key = jax.random.PRNGKey(0)
    kx, kwt, kg, kb, km, kv = jax.random.split(key, 6)
    x = jax.random.normal(kx, (B, Cin, D, H, W), jnp.float32)
    conv_w = jax.random.normal(kwt, (Cout, Cin, K, K, K), jnp.float32) * 0.1
    gamma = 1.0 + 0.1 * jax.random.normal(kg, (Cout,), jnp.float32)
    beta = 0.1 * jax.random.normal(kb, (Cout,), jnp.float32)
    running_mean = 0.1 * jax.random.normal(km, (Cout,), jnp.float32)
    running_var = 0.5 + jax.random.uniform(kv, (Cout,), jnp.float32)

    out = conv_bn_relu3d_pallas(x, conv_w, gamma, beta, running_mean,
                                running_var, pad=pad)
    out = jax.block_until_ready(out)

    ref = conv_bn_relu3d_ref(x, conv_w, gamma, beta, running_mean, running_var,
                             pad=pad)
    assert out.shape == ref.shape == (B, Cout, D, H, W)
    max_err = float(jnp.max(jnp.abs(out - ref)))
    # Tolerance covers the MXU's default (possibly bf16-pass) f32 matmul
    # precision vs. the HIGHEST-precision XLA reference; real bugs (wrong tap
    # offsets / masks / BN fold) produce errors orders of magnitude larger.
    assert jnp.allclose(out, ref, rtol=2e-2, atol=3e-2), f"max_err={max_err}"
    print("KERNEL_OK")
</pallas_src>

<mosaic_0001>
module attributes {stable_mosaic.version = 11 : i64} {
  func.func @_conv_bn_relu_kernel(%arg0: i32, %arg1: i32, %arg2: memref<1x16x512xf32, #tpu.memory_space<vmem>>, %arg3: memref<27x16x16xf32, #tpu.memory_space<vmem>>, %arg4: memref<27x1x512xf32, #tpu.memory_space<vmem>>, %arg5: memref<16x1xf32, #tpu.memory_space<vmem>>, %arg6: memref<16x1xf32, #tpu.memory_space<vmem>>, %arg7: memref<1x16x512xf32, #tpu.memory_space<vmem>>, %arg8: memref<16x768xf32, #tpu.memory_space<vmem>>) attributes {dimension_semantics = [#tpu.dimension_semantics<parallel>, #tpu.dimension_semantics<parallel>], iteration_bounds = array<i64: 2, 1>, scalar_prefetch = 0 : i64, scratch_operands = 1 : i64, tpu.core_type = #tpu.core_type<tc>, window_params = [{transform_indices = @transform_0, window_bounds = array<i64: 1, 16, 512>}, {transform_indices = @transform_1, window_bounds = array<i64: 27, 16, 16>}, {pipeline_mode = #tpu.pipeline_mode<synchronous>, transform_indices = @transform_2, window_bounds = array<i64: 27, 1, 512>}, {transform_indices = @transform_3, window_bounds = array<i64: 16, 1>}, {transform_indices = @transform_4, window_bounds = array<i64: 16, 1>}, {transform_indices = @transform_5, window_bounds = array<i64: 1, 16, 512>}]} {
    %cst = arith.constant 0.000000e+00 : f32
    %0 = vector.broadcast %cst : f32 to vector<16x768xf32>
    %c0 = arith.constant 0 : index
    %c0_0 = arith.constant 0 : index
    %1 = vector.load %arg8[%c0, %c0_0] : memref<16x768xf32, #tpu.memory_space<vmem>>, vector<16x768xf32>
    tpu.vector_store %arg8[%c0, %c0_0], %0 {strides = array<i32>} : memref<16x768xf32, #tpu.memory_space<vmem>>, vector<16x768xf32>,
    %c0_1 = arith.constant 0 : index
    %c0_2 = arith.constant 0 : index
    %c0_3 = arith.constant 0 : index
    %2 = vector.load %arg2[%c0_1, %c0_2, %c0_3] : memref<1x16x512xf32, #tpu.memory_space<vmem>>, vector<1x16x512xf32>
    %3 = vector.shape_cast %2 : vector<1x16x512xf32> to vector<16x512xf32>
    %c0_4 = arith.constant 0 : index
    %c128 = arith.constant 128 : index
    %4 = vector.load %arg8[%c0_4, %c128] : memref<16x768xf32, #tpu.memory_space<vmem>>, vector<16x512xf32>
    tpu.vector_store %arg8[%c0_4, %c128], %3 {strides = array<i32>} : memref<16x768xf32, #tpu.memory_space<vmem>>, vector<16x512xf32>,
    %c0_5 = arith.constant 0 : index
    %c0_6 = arith.constant 0 : index
    %5 = vector.load %arg8[%c0_5, %c0_6] : memref<16x768xf32, #tpu.memory_space<vmem>>, vector<16x768xf32>
    %cst_7 = arith.constant 0.000000e+00 : f32
    %6 = vector.broadcast %cst_7 : f32 to vector<16x512xf32>
    %7 = vector.extract_strided_slice %5 {offsets = [0, 55], sizes = [16, 512], strides = [1, 1]} : vector<16x768xf32> to vector<16x512xf32>
    %c0_8 = arith.constant 0 : index
    %c0_9 = arith.constant 0 : index
    %c0_10 = arith.constant 0 : index
    %8 = vector.load %arg4[%c0_8, %c0_9, %c0_10] : memref<27x1x512xf32, #tpu.memory_space<vmem>>, vector<1x1x512xf32>
    %9 = vector.shape_cast %8 : vector<1x1x512xf32> to vector<1x512xf32>
    %10 = vector.broadcast %9 : vector<1x512xf32> to vector<16x512xf32>
    %11 = arith.mulf %7, %10 : vector<16x512xf32>
    %c0_11 = arith.constant 0 : index
    %c0_12 = arith.constant 0 : index
    %c0_13 = arith.constant 0 : index
    %12 = vector.load %arg3[%c0_11, %c0_12, %c0_13] : memref<27x16x16xf32, #tpu.memory_space<vmem>>, vector<1x16x16xf32>
    %13 = vector.shape_cast %12 : vector<1x16x16xf32> to vector<16x16xf32>
    %cst_14 = arith.constant dense<0.000000e+00> : vector<16x512xf32>
    %14 = tpu.matmul %13, %11, %cst_14 {dimension_numbers = #tpu.dot_dimension_numbers<[1], [0], [0], [1], [0, 0, 1, 1], [], []>} : vector<16x16xf32>, vector<16x512xf32>, vector<16x512xf32> -> vector<16x512xf32>
    %15 = arith.addf %6, %14 : vector<16x512xf32>
    %16 = vector.extract_strided_slice %5 {offsets = [0, 56], sizes = [16, 512], strides = [1, 1]} : vector<16x768xf32> to vector<16x512xf32>
    %c1 = arith.constant 1 : index
    %c0_15 = arith.constant 0 : index
    %c0_16 = arith.constant 0 : index
    %17 = vector.load %arg4[%c1, %c0_15, %c0_16] : memref<27x1x512xf32, #tpu.memory_space<vmem>>, vector<1x1x512xf32>
    %18 = vector.shape_cast %17 : vector<1x1x512xf32> to vector<1x512xf32>
    %19 = vector.broadcast %18 : vector<1x512xf32> to vector<16x512xf32>
    %20 = arith.mulf %16, %19 : vector<16x512xf32>
    %c1_17 = arith.constant 1 : index
    %c0_18 = arith.constant 0 : index
    %c0_19 = arith.constant 0 : index
    %21 = vector.load %arg3[%c1_17, %c0_18, %c0_19] : memref<27x16x16xf32, #tpu.memory_space<vmem>>, vector<1x16x16xf32>
    %22 = vector.shape_cast %21 : vector<1x16x16xf32> to vector<16x16xf32>
    %cst_20 = arith.constant dense<0.000000e+00> : vector<16x512xf32>
    %23 = tpu.matmul %22, %20, %cst_20 {dimension_numbers = #tpu.dot_dimension_numbers<[1], [0], [0], [1], [0, 0, 1, 1], [], []>} : vector<16x16xf32>, vector<16x512xf32>, vector<16x512xf32> -> vector<16x512xf32>
    %24 = arith.addf %15, %23 : vector<16x512xf32>
    %25 = vector.extract_strided_slice %5 {offsets = [0, 57], sizes = [16, 512], strides = [1, 1]} : vector<16x768xf32> to vector<16x512xf32>
    %c2 = arith.constant 2 : index
    %c0_21 = arith.constant 0 : index
    %c0_22 = arith.constant 0 : index
    %26 = vector.load %arg4[%c2, %c0_21, %c0_22] : memref<27x1x512xf32, #tpu.memory_space<vmem>>, vector<1x1x512xf32>
    %27 = vector.shape_cast %26 : vector<1x1x512xf32> to vector<1x512xf32>
    %28 = vector.broadcast %27 : vector<1x512xf32> to vector<16x512xf32>
    %29 = arith.mulf %25, %28 : vector<16x512xf32>
    %c2_23 = arith.constant 2 : index
    %c0_24 = arith.constant 0 : index
    %c0_25 = arith.constant 0 : index
    %30 = vector.load %arg3[%c2_23, %c0_24, %c0_25] : memref<27x16x16xf32, #tpu.memory_space<vmem>>, vector<1x16x16xf32>
    %31 = vector.shape_cast %30 : vector<1x16x16xf32> to vector<16x16xf32>
    %cst_26 = arith.constant dense<0.000000e+00> : vector<16x512xf32>
    %32 = tpu.matmul %31, %29, %cst_26 {dimension_numbers = #tpu.dot_dimension_numbers<[1], [0], [0], [1], [0, 0, 1, 1], [], []>} : vector<16x16xf32>, vector<16x512xf32>, vector<16x512xf32> -> vector<16x512xf32>
    %33 = arith.addf %24, %32 : vector<16x512xf32>
    %34 = vector.extract_strided_slice %5 {offsets = [0, 63], sizes = [16, 512], strides = [1, 1]} : vector<16x768xf32> to vector<16x512xf32>
    %c3 = arith.constant 3 : index
    %c0_27 = arith.constant 0 : index
    %c0_28 = arith.constant 0 : index
    %35 = vector.load %arg4[%c3, %c0_27, %c0_28] : memref<27x1x512xf32, #tpu.memory_space<vmem>>, vector<1x1x512xf32>
    %36 = vector.shape_cast %35 : vector<1x1x512xf32> to vector<1x512xf32>
    %37 = vector.broadcast %36 : vector<1x512xf32> to vector<16x512xf32>
    %38 = arith.mulf %34, %37 : vector<16x512xf32>
    %c3_29 = arith.constant 3 : index
    %c0_30 = arith.constant 0 : index
    %c0_31 = arith.constant 0 : index
    %39 = vector.load %arg3[%c3_29, %c0_30, %c0_31] : memref<27x16x16xf32, #tpu.memory_space<vmem>>, vector<1x16x16xf32>
    %40 = vector.shape_cast %39 : vector<1x16x16xf32> to vector<16x16xf32>
    %cst_32 = arith.constant dense<0.000000e+00> : vector<16x512xf32>
    %41 = tpu.matmul %40, %38, %cst_32 {dimension_numbers = #tpu.dot_dimension_numbers<[1], [0], [0], [1], [0, 0, 1, 1], [], []>} : vector<16x16xf32>, vector<16x512xf32>, vector<16x512xf32> -> vector<16x512xf32>
    %42 = arith.addf %33, %41 : vector<16x512xf32>
    %43 = vector.extract_strided_slice %5 {offsets = [0, 64], sizes = [16, 512], strides = [1, 1]} : vector<16x768xf32> to vector<16x512xf32>
    %c4 = arith.constant 4 : index
    %c0_33 = arith.constant 0 : index
    %c0_34 = arith.constant 0 : index
    %44 = vector.load %arg4[%c4, %c0_33, %c0_34] : memref<27x1x512xf32, #tpu.memory_space<vmem>>, vector<1x1x512xf32>
    %45 = vector.shape_cast %44 : vector<1x1x512xf32> to vector<1x512xf32>
    %46 = vector.broadcast %45 : vector<1x512xf32> to vector<16x512xf32>
    %47 = arith.mulf %43, %46 : vector<16x512xf32>
    %c4_35 = arith.constant 4 : index
    %c0_36 = arith.constant 0 : index
    %c0_37 = arith.constant 0 : index
    %48 = vector.load %arg3[%c4_35, %c0_36, %c0_37] : memref<27x16x16xf32, #tpu.memory_space<vmem>>, vector<1x16x16xf32>
    %49 = vector.shape_cast %48 : vector<1x16x16xf32> to vector<16x16xf32>
    %cst_38 = arith.constant dense<0.000000e+00> : vector<16x512xf32>
    %50 = tpu.matmul %49, %47, %cst_38 {dimension_numbers = #tpu.dot_dimension_numbers<[1], [0], [0], [1], [0, 0, 1, 1], [], []>} : vector<16x16xf32>, vector<16x512xf32>, vector<16x512xf32> -> vector<16x512xf32>
    %51 = arith.addf %42, %50 : vector<16x512xf32>
    %52 = vector.extract_strided_slice %5 {offsets = [0, 65], sizes = [16, 512], strides = [1, 1]} : vector<16x768xf32> to vector<16x512xf32>
    %c5 = arith.constant 5 : index
    %c0_39 = arith.constant 0 : index
    %c0_40 = arith.constant 0 : index
    %53 = vector.load %arg4[%c5, %c0_39, %c0_40] : memref<27x1x512xf32, #tpu.memory_space<vmem>>, vector<1x1x512xf32>
    %54 = vector.shape_cast %53 : vector<1x1x512xf32> to vector<1x512xf32>
    %55 = vector.broadcast %54 : vector<1x512xf32> to vector<16x512xf32>
    %56 = arith.mulf %52, %55 : vector<16x512xf32>
    %c5_41 = arith.constant 5 : index
    %c0_42 = arith.constant 0 : index
    %c0_43 = arith.constant 0 : index
    %57 = vector.load %arg3[%c5_41, %c0_42, %c0_43] : memref<27x16x16xf32, #tpu.memory_space<vmem>>, vector<1x16x16xf32>
    %58 = vector.shape_cast %57 : vector<1x16x16xf32> to vector<16x16xf32>
    %cst_44 = arith.constant dense<0.000000e+00> : vector<16x512xf32>
    %59 = tpu.matmul %58, %56, %cst_44 {dimension_numbers = #tpu.dot_dimension_numbers<[1], [0], [0], [1], [0, 0, 1, 1], [], []>} : vector<16x16xf32>, vector<16x512xf32>, vector<16x512xf32> -> vector<16x512xf32>
    %60 = arith.addf %51, %59 : vector<16x512xf32>
    %61 = vector.extract_strided_slice %5 {offsets = [0, 71], sizes = [16, 512], strides = [1, 1]} : vector<16x768xf32> to vector<16x512xf32>
    %c6 = arith.constant 6 : index
    %c0_45 = arith.constant 0 : index
    %c0_46 = arith.constant 0 : index
    %62 = vector.load %arg4[%c6, %c0_45, %c0_46] : memref<27x1x512xf32, #tpu.memory_space<vmem>>, vector<1x1x512xf32>
    %63 = vector.shape_cast %62 : vector<1x1x512xf32> to vector<1x512xf32>
    %64 = vector.broadcast %63 : vector<1x512xf32> to vector<16x512xf32>
    %65 = arith.mulf %61, %64 : vector<16x512xf32>
    %c6_47 = arith.constant 6 : index
    %c0_48 = arith.constant 0 : index
    %c0_49 = arith.constant 0 : index
    %66 = vector.load %arg3[%c6_47, %c0_48, %c0_49] : memref<27x16x16xf32, #tpu.memory_space<vmem>>, vector<1x16x16xf32>
    %67 = vector.shape_cast %66 : vector<1x16x16xf32> to vector<16x16xf32>
    %cst_50 = arith.constant dense<0.000000e+00> : vector<16x512xf32>
    %68 = tpu.matmul %67, %65, %cst_50 {dimension_numbers = #tpu.dot_dimension_numbers<[1], [0], [0], [1], [0, 0, 1, 1], [], []>} : vector<16x16xf32>, vector<16x512xf32>, vector<16x512xf32> -> vector<16x512xf32>
    %69 = arith.addf %60, %68 : vector<16x512xf32>
    %70 = vector.extract_strided_slice %5 {offsets = [0, 72], sizes = [16, 512], strides = [1, 1]} : vector<16x768xf32> to vector<16x512xf32>
    %c7 = arith.constant 7 : index
    %c0_51 = arith.constant 0 : index
    %c0_52 = arith.constant 0 : index
    %71 = vector.load %arg4[%c7, %c0_51, %c0_52] : memref<27x1x512xf32, #tpu.memory_space<vmem>>, vector<1x1x512xf32>
    %72 = vector.shape_cast %71 : vector<1x1x512xf32> to vector<1x512xf32>
    %73 = vector.broadcast %72 : vector<1x512xf32> to vector<16x512xf32>
    %74 = arith.mulf %70, %73 : vector<16x512xf32>
    %c7_53 = arith.constant 7 : index
    %c0_54 = arith.constant 0 : index
    %c0_55 = arith.constant 0 : index
    %75 = vector.load %arg3[%c7_53, %c0_54, %c0_55] : memref<27x16x16xf32, #tpu.memory_space<vmem>>, vector<1x16x16xf32>
    %76 = vector.shape_cast %75 : vector<1x16x16xf32> to vector<16x16xf32>
    %cst_56 = arith.constant dense<0.000000e+00> : vector<16x512xf32>
    %77 = tpu.matmul %76, %74, %cst_56 {dimension_numbers = #tpu.dot_dimension_numbers<[1], [0], [0], [1], [0, 0, 1, 1], [], []>} : vector<16x16xf32>, vector<16x512xf32>, vector<16x512xf32> -> vector<16x512xf32>
    %78 = arith.addf %69, %77 : vector<16x512xf32>
    %79 = vector.extract_strided_slice %5 {offsets = [0, 73], sizes = [16, 512], strides = [1, 1]} : vector<16x768xf32> to vector<16x512xf32>
    %c8 = arith.constant 8 : index
    %c0_57 = arith.constant 0 : index
    %c0_58 = arith.constant 0 : index
    %80 = vector.load %arg4[%c8, %c0_57, %c0_58] : memref<27x1x512xf32, #tpu.memory_space<vmem>>, vector<1x1x512xf32>
    %81 = vector.shape_cast %80 : vector<1x1x512xf32> to vector<1x512xf32>
    %82 = vector.broadcast %81 : vector<1x512xf32> to vector<16x512xf32>
    %83 = arith.mulf %79, %82 : vector<16x512xf32>
    %c8_59 = arith.constant 8 : index
    %c0_60 = arith.constant 0 : index
    %c0_61 = arith.constant 0 : index
    %84 = vector.load %arg3[%c8_59, %c0_60, %c0_61] : memref<27x16x16xf32, #tpu.memory_space<vmem>>, vector<1x16x16xf32>
    %85 = vector.shape_cast %84 : vector<1x16x16xf32> to vector<16x16xf32>
    %cst_62 = arith.constant dense<0.000000e+00> : vector<16x512xf32>
    %86 = tpu.matmul %85, %83, %cst_62 {dimension_numbers = #tpu.dot_dimension_numbers<[1], [0], [0], [1], [0, 0, 1, 1], [], []>} : vector<16x16xf32>, vector<16x512xf32>, vector<16x512xf32> -> vector<16x512xf32>
    %87 = arith.addf %78, %86 : vector<16x512xf32>
    %88 = vector.extract_strided_slice %5 {offsets = [0, 119], sizes = [16, 512], strides = [1, 1]} : vector<16x768xf32> to vector<16x512xf32>
    %c9 = arith.constant 9 : index
    %c0_63 = arith.constant 0 : index
    %c0_64 = arith.constant 0 : index
    %89 = vector.load %arg4[%c9, %c0_63, %c0_64] : memref<27x1x512xf32, #tpu.memory_space<vmem>>, vector<1x1x512xf32>
    %90 = vector.shape_cast %89 : vector<1x1x512xf32> to vector<1x512xf32>
    %91 = vector.broadcast %90 : vector<1x512xf32> to vector<16x512xf32>
    %92 = arith.mulf %88, %91 : vector<16x512xf32>
    %c9_65 = arith.constant 9 : index
    %c0_66 = arith.constant 0 : index
    %c0_67 = arith.constant 0 : index
    %93 = vector.load %arg3[%c9_65, %c0_66, %c0_67] : memref<27x16x16xf32, #tpu.memory_space<vmem>>, vector<1x16x16xf32>
    %94 = vector.shape_cast %93 : vector<1x16x16xf32> to vector<16x16xf32>
    %cst_68 = arith.constant dense<0.000000e+00> : vector<16x512xf32>
    %95 = tpu.matmul %94, %92, %cst_68 {dimension_numbers = #tpu.dot_dimension_numbers<[1], [0], [0], [1], [0, 0, 1, 1], [], []>} : vector<16x16xf32>, vector<16x512xf32>, vector<16x512xf32> -> vector<16x512xf32>
    %96 = arith.addf %87, %95 : vector<16x512xf32>
    %97 = vector.extract_strided_slice %5 {offsets = [0, 120], sizes = [16, 512], strides = [1, 1]} : vector<16x768xf32> to vector<16x512xf32>
    %c10 = arith.constant 10 : index
    %c0_69 = arith.constant 0 : index
    %c0_70 = arith.constant 0 : index
    %98 = vector.load %arg4[%c10, %c0_69, %c0_70] : memref<27x1x512xf32, #tpu.memory_space<vmem>>, vector<1x1x512xf32>
    %99 = vector.shape_cast %98 : vector<1x1x512xf32> to vector<1x512xf32>
    %100 = vector.broadcast %99 : vector<1x512xf32> to vector<16x512xf32>
    %101 = arith.mulf %97, %100 : vector<16x512xf32>
    %c10_71 = arith.constant 10 : index
    %c0_72 = arith.constant 0 : index
    %c0_73 = arith.constant 0 : index
    %102 = vector.load %arg3[%c10_71, %c0_72, %c0_73] : memref<27x16x16xf32, #tpu.memory_space<vmem>>, vector<1x16x16xf32>
    %103 = vector.shape_cast %102 : vector<1x16x16xf32> to vector<16x16xf32>
    %cst_74 = arith.constant dense<0.000000e+00> : vector<16x512xf32>
    %104 = tpu.matmul %103, %101, %cst_74 {dimension_numbers = #tpu.dot_dimension_numbers<[1], [0], [0], [1], [0, 0, 1, 1], [], []>} : vector<16x16xf32>, vector<16x512xf32>, vector<16x512xf32> -> vector<16x512xf32>
    %105 = arith.addf %96, %104 : vector<16x512xf32>
    %106 = vector.extract_strided_slice %5 {offsets = [0, 121], sizes = [16, 512], strides = [1, 1]} : vector<16x768xf32> to vector<16x512xf32>
    %c11 = arith.constant 11 : index
    %c0_75 = arith.constant 0 : index
    %c0_76 = arith.constant 0 : index
    %107 = vector.load %arg4[%c11, %c0_75, %c0_76] : memref<27x1x512xf32, #tpu.memory_space<vmem>>, vector<1x1x512xf32>
    %108 = vector.shape_cast %107 : vector<1x1x512xf32> to vector<1x512xf32>
    %109 = vector.broadcast %108 : vector<1x512xf32> to vector<16x512xf32>
    %110 = arith.mulf %106, %109 : vector<16x512xf32>
    %c11_77 = arith.constant 11 : index
    %c0_78 = arith.constant 0 : index
    %c0_79 = arith.constant 0 : index
    %111 = vector.load %arg3[%c11_77, %c0_78, %c0_79] : memref<27x16x16xf32, #tpu.memory_space<vmem>>, vector<1x16x16xf32>
    %112 = vector.shape_cast %111 : vector<1x16x16xf32> to vector<16x16xf32>
    %cst_80 = arith.constant dense<0.000000e+00> : vector<16x512xf32>
    %113 = tpu.matmul %112, %110, %cst_80 {dimension_numbers = #tpu.dot_dimension_numbers<[1], [0], [0], [1], [0, 0, 1, 1], [], []>} : vector<16x16xf32>, vector<16x512xf32>, vector<16x512xf32> -> vector<16x512xf32>
    %114 = arith.addf %105, %113 : vector<16x512xf32>
    %115 = vector.extract_strided_slice %5 {offsets = [0, 127], sizes = [16, 512], strides = [1, 1]} : vector<16x768xf32> to vector<16x512xf32>
    %c12 = arith.constant 12 : index
    %c0_81 = arith.constant 0 : index
    %c0_82 = arith.constant 0 : index
    %116 = vector.load %arg4[%c12, %c0_81, %c0_82] : memref<27x1x512xf32, #tpu.memory_space<vmem>>, vector<1x1x512xf32>
    %117 = vector.shape_cast %116 : vector<1x1x512xf32> to vector<1x512xf32>
    %118 = vector.broadcast %117 : vector<1x512xf32> to vector<16x512xf32>
    %119 = arith.mulf %115, %118 : vector<16x512xf32>
    %c12_83 = arith.constant 12 : index
    %c0_84 = arith.constant 0 : index
    %c0_85 = arith.constant 0 : index
    %120 = vector.load %arg3[%c12_83, %c0_84, %c0_85] : memref<27x16x16xf32, #tpu.memory_space<vmem>>, vector<1x16x16xf32>
    %121 = vector.shape_cast %120 : vector<1x16x16xf32> to vector<16x16xf32>
    %cst_86 = arith.constant dense<0.000000e+00> : vector<16x512xf32>
    %122 = tpu.matmul %121, %119, %cst_86 {dimension_numbers = #tpu.dot_dimension_numbers<[1], [0], [0], [1], [0, 0, 1, 1], [], []>} : vector<16x16xf32>, vector<16x512xf32>, vector<16x512xf32> -> vector<16x512xf32>
    %123 = arith.addf %114, %122 : vector<16x512xf32>
    %124 = vector.extract_strided_slice %5 {offsets = [0, 128], sizes = [16, 512], strides = [1, 1]} : vector<16x768xf32> to vector<16x512xf32>
    %c13 = arith.constant 13 : index
    %c0_87 = arith.constant 0 : index
    %c0_88 = arith.constant 0 : index
    %125 = vector.load %arg4[%c13, %c0_87, %c0_88] : memref<27x1x512xf32, #tpu.memory_space<vmem>>, vector<1x1x512xf32>
    %126 = vector.shape_cast %125 : vector<1x1x512xf32> to vector<1x512xf32>
    %127 = vector.broadcast %126 : vector<1x512xf32> to vector<16x512xf32>
    %128 = arith.mulf %124, %127 : vector<16x512xf32>
    %c13_89 = arith.constant 13 : index
    %c0_90 = arith.constant 0 : index
    %c0_91 = arith.constant 0 : index
    %129 = vector.load %arg3[%c13_89, %c0_90, %c0_91] : memref<27x16x16xf32, #tpu.memory_space<vmem>>, vector<1x16x16xf32>
    %130 = vector.shape_cast %129 : vector<1x16x16xf32> to vector<16x16xf32>
    %cst_92 = arith.constant dense<0.000000e+00> : vector<16x512xf32>
    %131 = tpu.matmul %130, %128, %cst_92 {dimension_numbers = #tpu.dot_dimension_numbers<[1], [0], [0], [1], [0, 0, 1, 1], [], []>} : vector<16x16xf32>, vector<16x512xf32>, vector<16x512xf32> -> vector<16x512xf32>
    %132 = arith.addf %123, %131 : vector<16x512xf32>
    %133 = vector.extract_strided_slice %5 {offsets = [0, 129], sizes = [16, 512], strides = [1, 1]} : vector<16x768xf32> to vector<16x512xf32>
    %c14 = arith.constant 14 : index
    %c0_93 = arith.constant 0 : index
    %c0_94 = arith.constant 0 : index
    %134 = vector.load %arg4[%c14, %c0_93, %c0_94] : memref<27x1x512xf32, #tpu.memory_space<vmem>>, vector<1x1x512xf32>
    %135 = vector.shape_cast %134 : vector<1x1x512xf32> to vector<1x512xf32>
    %136 = vector.broadcast %135 : vector<1x512xf32> to vector<16x512xf32>
    %137 = arith.mulf %133, %136 : vector<16x512xf32>
    %c14_95 = arith.constant 14 : index
    %c0_96 = arith.constant 0 : index
    %c0_97 = arith.constant 0 : index
    %138 = vector.load %arg3[%c14_95, %c0_96, %c0_97] : memref<27x16x16xf32, #tpu.memory_space<vmem>>, vector<1x16x16xf32>
    %139 = vector.shape_cast %138 : vector<1x16x16xf32> to vector<16x16xf32>
    %cst_98 = arith.constant dense<0.000000e+00> : vector<16x512xf32>
    %140 = tpu.matmul %139, %137, %cst_98 {dimension_numbers = #tpu.dot_dimension_numbers<[1], [0], [0], [1], [0, 0, 1, 1], [], []>} : vector<16x16xf32>, vector<16x512xf32>, vector<16x512xf32> -> vector<16x512xf32>
    %141 = arith.addf %132, %140 : vector<16x512xf32>
    %142 = vector.extract_strided_slice %5 {offsets = [0, 135], sizes = [16, 512], strides = [1, 1]} : vector<16x768xf32> to vector<16x512xf32>
    %c15 = arith.constant 15 : index
    %c0_99 = arith.constant 0 : index
    %c0_100 = arith.constant 0 : index
    %143 = vector.load %arg4[%c15, %c0_99, %c0_100] : memref<27x1x512xf32, #tpu.memory_space<vmem>>, vector<1x1x512xf32>
    %144 = vector.shape_cast %143 : vector<1x1x512xf32> to vector<1x512xf32>
    %145 = vector.broadcast %144 : vector<1x512xf32> to vector<16x512xf32>
    %146 = arith.mulf %142, %145 : vector<16x512xf32>
    %c15_101 = arith.constant 15 : index
    %c0_102 = arith.constant 0 : index
    %c0_103 = arith.constant 0 : index
    %147 = vector.load %arg3[%c15_101, %c0_102, %c0_103] : memref<27x16x16xf32, #tpu.memory_space<vmem>>, vector<1x16x16xf32>
    %148 = vector.shape_cast %147 : vector<1x16x16xf32> to vector<16x16xf32>
    %cst_104 = arith.constant dense<0.000000e+00> : vector<16x512xf32>
    %149 = tpu.matmul %148, %146, %cst_104 {dimension_numbers = #tpu.dot_dimension_numbers<[1], [0], [0], [1], [0, 0, 1, 1], [], []>} : vector<16x16xf32>, vector<16x512xf32>, vector<16x512xf32> -> vector<16x512xf32>
    %150 = arith.addf %141, %149 : vector<16x512xf32>
    %151 = vector.extract_strided_slice %5 {offsets = [0, 136], sizes = [16, 512], strides = [1, 1]} : vector<16x768xf32> to vector<16x512xf32>
    %c16 = arith.constant 16 : index
    %c0_105 = arith.constant 0 : index
    %c0_106 = arith.constant 0 : index
    %152 = vector.load %arg4[%c16, %c0_105, %c0_106] : memref<27x1x512xf32, #tpu.memory_space<vmem>>, vector<1x1x512xf32>
    %153 = vector.shape_cast %152 : vector<1x1x512xf32> to vector<1x512xf32>
    %154 = vector.broadcast %153 : vector<1x512xf32> to vector<16x512xf32>
    %155 = arith.mulf %151, %154 : vector<16x512xf32>
    %c16_107 = arith.constant 16 : index
    %c0_108 = arith.constant 0 : index
    %c0_109 = arith.constant 0 : index
    %156 = vector.load %arg3[%c16_107, %c0_108, %c0_109] : memref<27x16x16xf32, #tpu.memory_space<vmem>>, vector<1x16x16xf32>
    %157 = vector.shape_cast %156 : vector<1x16x16xf32> to vector<16x16xf32>
    %cst_110 = arith.constant dense<0.000000e+00> : vector<16x512xf32>
    %158 = tpu.matmul %157, %155, %cst_110 {dimension_numbers = #tpu.dot_dimension_numbers<[1], [0], [0], [1], [0, 0, 1, 1], [], []>} : vector<16x16xf32>, vector<16x512xf32>, vector<16x512xf32> -> vector<16x512xf32>
    %159 = arith.addf %150, %158 : vector<16x512xf32>
    %160 = vector.extract_strided_slice %5 {offsets = [0, 137], sizes = [16, 512], strides = [1, 1]} : vector<16x768xf32> to vector<16x512xf32>
    %c17 = arith.constant 17 : index
    %c0_111 = arith.constant 0 : index
    %c0_112 = arith.constant 0 : index
    %161 = vector.load %arg4[%c17, %c0_111, %c0_112] : memref<27x1x512xf32, #tpu.memory_space<vmem>>, vector<1x1x512xf32>
    %162 = vector.shape_cast %161 : vector<1x1x512xf32> to vector<1x512xf32>
    %163 = vector.broadcast %162 : vector<1x512xf32> to vector<16x512xf32>
    %164 = arith.mulf %160, %163 : vector<16x512xf32>
    %c17_113 = arith.constant 17 : index
    %c0_114 = arith.constant 0 : index
    %c0_115 = arith.constant 0 : index
    %165 = vector.load %arg3[%c17_113, %c0_114, %c0_115] : memref<27x16x16xf32, #tpu.memory_space<vmem>>, vector<1x16x16xf32>
    %166 = vector.shape_cast %165 : vector<1x16x16xf32> to vector<16x16xf32>
    %cst_116 = arith.constant dense<0.000000e+00> : vector<16x512xf32>
    %167 = tpu.matmul %166, %164, %cst_116 {dimension_numbers = #tpu.dot_dimension_numbers<[1], [0], [0], [1], [0, 0, 1, 1], [], []>} : vector<16x16xf32>, vector<16x512xf32>, vector<16x512xf32> -> vector<16x512xf32>
    %168 = arith.addf %159, %167 : vector<16x512xf32>
    %169 = vector.extract_strided_slice %5 {offsets = [0, 183], sizes = [16, 512], strides = [1, 1]} : vector<16x768xf32> to vector<16x512xf32>
    %c18 = arith.constant 18 : index
    %c0_117 = arith.constant 0 : index
    %c0_118 = arith.constant 0 : index
    %170 = vector.load %arg4[%c18, %c0_117, %c0_118] : memref<27x1x512xf32, #tpu.memory_space<vmem>>, vector<1x1x512xf32>
    %171 = vector.shape_cast %170 : vector<1x1x512xf32> to vector<1x512xf32>
    %172 = vector.broadcast %171 : vector<1x512xf32> to vector<16x512xf32>
    %173 = arith.mulf %169, %172 : vector<16x512xf32>
    %c18_119 = arith.constant 18 : index
    %c0_120 = arith.constant 0 : index
    %c0_121 = arith.constant 0 : index
    %174 = vector.load %arg3[%c18_119, %c0_120, %c0_121] : memref<27x16x16xf32, #tpu.memory_space<vmem>>, vector<1x16x16xf32>
    %175 = vector.shape_cast %174 : vector<1x16x16xf32> to vector<16x16xf32>
    %cst_122 = arith.constant dense<0.000000e+00> : vector<16x512xf32>
    %176 = tpu.matmul %175, %173, %cst_122 {dimension_numbers = #tpu.dot_dimension_numbers<[1], [0], [0], [1], [0, 0, 1, 1], [], []>} : vector<16x16xf32>, vector<16x512xf32>, vector<16x512xf32> -> vector<16x512xf32>
    %177 = arith.addf %168, %176 : vector<16x512xf32>
    %178 = vector.extract_strided_slice %5 {offsets = [0, 184], sizes = [16, 512], strides = [1, 1]} : vector<16x768xf32> to vector<16x512xf32>
    %c19 = arith.constant 19 : index
    %c0_123 = arith.constant 0 : index
    %c0_124 = arith.constant 0 : index
    %179 = vector.load %arg4[%c19, %c0_123, %c0_124] : memref<27x1x512xf32, #tpu.memory_space<vmem>>, vector<1x1x512xf32>
    %180 = vector.shape_cast %179 : vector<1x1x512xf32> to vector<1x512xf32>
    %181 = vector.broadcast %180 : vector<1x512xf32> to vector<16x512xf32>
    %182 = arith.mulf %178, %181 : vector<16x512xf32>
    %c19_125 = arith.constant 19 : index
    %c0_126 = arith.constant 0 : index
    %c0_127 = arith.constant 0 : index
    %183 = vector.load %arg3[%c19_125, %c0_126, %c0_127] : memref<27x16x16xf32, #tpu.memory_space<vmem>>, vector<1x16x16xf32>
    %184 = vector.shape_cast %183 : vector<1x16x16xf32> to vector<16x16xf32>
    %cst_128 = arith.constant dense<0.000000e+00> : vector<16x512xf32>
    %185 = tpu.matmul %184, %182, %cst_128 {dimension_numbers = #tpu.dot_dimension_numbers<[1], [0], [0], [1], [0, 0, 1, 1], [], []>} : vector<16x16xf32>, vector<16x512xf32>, vector<16x512xf32> -> vector<16x512xf32>
    %186 = arith.addf %177, %185 : vector<16x512xf32>
    %187 = vector.extract_strided_slice %5 {offsets = [0, 185], sizes = [16, 512], strides = [1, 1]} : vector<16x768xf32> to vector<16x512xf32>
    %c20 = arith.constant 20 : index
    %c0_129 = arith.constant 0 : index
    %c0_130 = arith.constant 0 : index
    %188 = vector.load %arg4[%c20, %c0_129, %c0_130] : memref<27x1x512xf32, #tpu.memory_space<vmem>>, vector<1x1x512xf32>
    %189 = vector.shape_cast %188 : vector<1x1x512xf32> to vector<1x512xf32>
    %190 = vector.broadcast %189 : vector<1x512xf32> to vector<16x512xf32>
    %191 = arith.mulf %187, %190 : vector<16x512xf32>
    %c20_131 = arith.constant 20 : index
    %c0_132 = arith.constant 0 : index
    %c0_133 = arith.constant 0 : index
    %192 = vector.load %arg3[%c20_131, %c0_132, %c0_133] : memref<27x16x16xf32, #tpu.memory_space<vmem>>, vector<1x16x16xf32>
    %193 = vector.shape_cast %192 : vector<1x16x16xf32> to vector<16x16xf32>
    %cst_134 = arith.constant dense<0.000000e+00> : vector<16x512xf32>
    %194 = tpu.matmul %193, %191, %cst_134 {dimension_numbers = #tpu.dot_dimension_numbers<[1], [0], [0], [1], [0, 0, 1, 1], [], []>} : vector<16x16xf32>, vector<16x512xf32>, vector<16x512xf32> -> vector<16x512xf32>
    %195 = arith.addf %186, %194 : vector<16x512xf32>
    %196 = vector.extract_strided_slice %5 {offsets = [0, 191], sizes = [16, 512], strides = [1, 1]} : vector<16x768xf32> to vector<16x512xf32>
    %c21 = arith.constant 21 : index
    %c0_135 = arith.constant 0 : index
    %c0_136 = arith.constant 0 : index
    %197 = vector.load %arg4[%c21, %c0_135, %c0_136] : memref<27x1x512xf32, #tpu.memory_space<vmem>>, vector<1x1x512xf32>
    %198 = vector.shape_cast %197 : vector<1x1x512xf32> to vector<1x512xf32>
    %199 = vector.broadcast %198 : vector<1x512xf32> to vector<16x512xf32>
    %200 = arith.mulf %196, %199 : vector<16x512xf32>
    %c21_137 = arith.constant 21 : index
    %c0_138 = arith.constant 0 : index
    %c0_139 = arith.constant 0 : index
    %201 = vector.load %arg3[%c21_137, %c0_138, %c0_139] : memref<27x16x16xf32, #tpu.memory_space<vmem>>, vector<1x16x16xf32>
    %202 = vector.shape_cast %201 : vector<1x16x16xf32> to vector<16x16xf32>
    %cst_140 = arith.constant dense<0.000000e+00> : vector<16x512xf32>
    %203 = tpu.matmul %202, %200, %cst_140 {dimension_numbers = #tpu.dot_dimension_numbers<[1], [0], [0], [1], [0, 0, 1, 1], [], []>} : vector<16x16xf32>, vector<16x512xf32>, vector<16x512xf32> -> vector<16x512xf32>
    %204 = arith.addf %195, %203 : vector<16x512xf32>
    %205 = vector.extract_strided_slice %5 {offsets = [0, 192], sizes = [16, 512], strides = [1, 1]} : vector<16x768xf32> to vector<16x512xf32>
    %c22 = arith.constant 22 : index
    %c0_141 = arith.constant 0 : index
    %c0_142 = arith.constant 0 : index
    %206 = vector.load %arg4[%c22, %c0_141, %c0_142] : memref<27x1x512xf32, #tpu.memory_space<vmem>>, vector<1x1x512xf32>
    %207 = vector.shape_cast %206 : vector<1x1x512xf32> to vector<1x512xf32>
    %208 = vector.broadcast %207 : vector<1x512xf32> to vector<16x512xf32>
    %209 = arith.mulf %205, %208 : vector<16x512xf32>
    %c22_143 = arith.constant 22 : index
    %c0_144 = arith.constant 0 : index
    %c0_145 = arith.constant 0 : index
    %210 = vector.load %arg3[%c22_143, %c0_144, %c0_145] : memref<27x16x16xf32, #tpu.memory_space<vmem>>, vector<1x16x16xf32>
    %211 = vector.shape_cast %210 : vector<1x16x16xf32> to vector<16x16xf32>
    %cst_146 = arith.constant dense<0.000000e+00> : vector<16x512xf32>
    %212 = tpu.matmul %211, %209, %cst_146 {dimension_numbers = #tpu.dot_dimension_numbers<[1], [0], [0], [1], [0, 0, 1, 1], [], []>} : vector<16x16xf32>, vector<16x512xf32>, vector<16x512xf32> -> vector<16x512xf32>
    %213 = arith.addf %204, %212 : vector<16x512xf32>
    %214 = vector.extract_strided_slice %5 {offsets = [0, 193], sizes = [16, 512], strides = [1, 1]} : vector<16x768xf32> to vector<16x512xf32>
    %c23 = arith.constant 23 : index
    %c0_147 = arith.constant 0 : index
    %c0_148 = arith.constant 0 : index
    %215 = vector.load %arg4[%c23, %c0_147, %c0_148] : memref<27x1x512xf32, #tpu.memory_space<vmem>>, vector<1x1x512xf32>
    %216 = vector.shape_cast %215 : vector<1x1x512xf32> to vector<1x512xf32>
    %217 = vector.broadcast %216 : vector<1x512xf32> to vector<16x512xf32>
    %218 = arith.mulf %214, %217 : vector<16x512xf32>
    %c23_149 = arith.constant 23 : index
    %c0_150 = arith.constant 0 : index
    %c0_151 = arith.constant 0 : index
    %219 = vector.load %arg3[%c23_149, %c0_150, %c0_151] : memref<27x16x16xf32, #tpu.memory_space<vmem>>, vector<1x16x16xf32>
    %220 = vector.shape_cast %219 : vector<1x16x16xf32> to vector<16x16xf32>
    %cst_152 = arith.constant dense<0.000000e+00> : vector<16x512xf32>
    %221 = tpu.matmul %220, %218, %cst_152 {dimension_numbers = #tpu.dot_dimension_numbers<[1], [0], [0], [1], [0, 0, 1, 1], [], []>} : vector<16x16xf32>, vector<16x512xf32>, vector<16x512xf32> -> vector<16x512xf32>
    %222 = arith.addf %213, %221 : vector<16x512xf32>
    %223 = vector.extract_strided_slice %5 {offsets = [0, 199], sizes = [16, 512], strides = [1, 1]} : vector<16x768xf32> to vector<16x512xf32>
    %c24 = arith.constant 24 : index
    %c0_153 = arith.constant 0 : index
    %c0_154 = arith.constant 0 : index
    %224 = vector.load %arg4[%c24, %c0_153, %c0_154] : memref<27x1x512xf32, #tpu.memory_space<vmem>>, vector<1x1x512xf32>
    %225 = vector.shape_cast %224 : vector<1x1x512xf32> to vector<1x512xf32>
    %226 = vector.broadcast %225 : vector<1x512xf32> to vector<16x512xf32>
    %227 = arith.mulf %223, %226 : vector<16x512xf32>
    %c24_155 = arith.constant 24 : index
    %c0_156 = arith.constant 0 : index
    %c0_157 = arith.constant 0 : index
    %228 = vector.load %arg3[%c24_155, %c0_156, %c0_157] : memref<27x16x16xf32, #tpu.memory_space<vmem>>, vector<1x16x16xf32>
    %229 = vector.shape_cast %228 : vector<1x16x16xf32> to vector<16x16xf32>
    %cst_158 = arith.constant dense<0.000000e+00> : vector<16x512xf32>
    %230 = tpu.matmul %229, %227, %cst_158 {dimension_numbers = #tpu.dot_dimension_numbers<[1], [0], [0], [1], [0, 0, 1, 1], [], []>} : vector<16x16xf32>, vector<16x512xf32>, vector<16x512xf32> -> vector<16x512xf32>
    %231 = arith.addf %222, %230 : vector<16x512xf32>
    %232 = vector.extract_strided_slice %5 {offsets = [0, 200], sizes = [16, 512], strides = [1, 1]} : vector<16x768xf32> to vector<16x512xf32>
    %c25 = arith.constant 25 : index
    %c0_159 = arith.constant 0 : index
    %c0_160 = arith.constant 0 : index
    %233 = vector.load %arg4[%c25, %c0_159, %c0_160] : memref<27x1x512xf32, #tpu.memory_space<vmem>>, vector<1x1x512xf32>
    %234 = vector.shape_cast %233 : vector<1x1x512xf32> to vector<1x512xf32>
    %235 = vector.broadcast %234 : vector<1x512xf32> to vector<16x512xf32>
    %236 = arith.mulf %232, %235 : vector<16x512xf32>
    %c25_161 = arith.constant 25 : index
    %c0_162 = arith.constant 0 : index
    %c0_163 = arith.constant 0 : index
    %237 = vector.load %arg3[%c25_161, %c0_162, %c0_163] : memref<27x16x16xf32, #tpu.memory_space<vmem>>, vector<1x16x16xf32>
    %238 = vector.shape_cast %237 : vector<1x16x16xf32> to vector<16x16xf32>
    %cst_164 = arith.constant dense<0.000000e+00> : vector<16x512xf32>
    %239 = tpu.matmul %238, %236, %cst_164 {dimension_numbers = #tpu.dot_dimension_numbers<[1], [0], [0], [1], [0, 0, 1, 1], [], []>} : vector<16x16xf32>, vector<16x512xf32>, vector<16x512xf32> -> vector<16x512xf32>
    %240 = arith.addf %231, %239 : vector<16x512xf32>
    %241 = vector.extract_strided_slice %5 {offsets = [0, 201], sizes = [16, 512], strides = [1, 1]} : vector<16x768xf32> to vector<16x512xf32>
    %c26 = arith.constant 26 : index
    %c0_165 = arith.constant 0 : index
    %c0_166 = arith.constant 0 : index
    %242 = vector.load %arg4[%c26, %c0_165, %c0_166] : memref<27x1x512xf32, #tpu.memory_space<vmem>>, vector<1x1x512xf32>
    %243 = vector.shape_cast %242 : vector<1x1x512xf32> to vector<1x512xf32>
    %244 = vector.broadcast %243 : vector<1x512xf32> to vector<16x512xf32>
    %245 = arith.mulf %241, %244 : vector<16x512xf32>
    %c26_167 = arith.constant 26 : index
    %c0_168 = arith.constant 0 : index
    %c0_169 = arith.constant 0 : index
    %246 = vector.load %arg3[%c26_167, %c0_168, %c0_169] : memref<27x16x16xf32, #tpu.memory_space<vmem>>, vector<1x16x16xf32>
    %247 = vector.shape_cast %246 : vector<1x16x16xf32> to vector<16x16xf32>
    %cst_170 = arith.constant dense<0.000000e+00> : vector<16x512xf32>
    %248 = tpu.matmul %247, %245, %cst_170 {dimension_numbers = #tpu.dot_dimension_numbers<[1], [0], [0], [1], [0, 0, 1, 1], [], []>} : vector<16x16xf32>, vector<16x512xf32>, vector<16x512xf32> -> vector<16x512xf32>
    %249 = arith.addf %240, %248 : vector<16x512xf32>
    %c0_171 = arith.constant 0 : index
    %c0_172 = arith.constant 0 : index
    %250 = vector.load %arg5[%c0_171, %c0_172] : memref<16x1xf32, #tpu.memory_space<vmem>>, vector<16x1xf32>
    %251 = vector.broadcast %250 : vector<16x1xf32> to vector<16x512xf32>
    %252 = arith.mulf %249, %251 : vector<16x512xf32>
    %c0_173 = arith.constant 0 : index
    %c0_174 = arith.constant 0 : index
    %253 = vector.load %arg6[%c0_173, %c0_174] : memref<16x1xf32, #tpu.memory_space<vmem>>, vector<16x1xf32>
    %254 = vector.broadcast %253 : vector<16x1xf32> to vector<16x512xf32>
    %255 = arith.addf %252, %254 : vector<16x512xf32>
    %cst_175 = arith.constant 0.000000e+00 : f32
    %256 = vector.broadcast %cst_175 : f32 to vector<16x512xf32>
    %257 = arith.maximumf %255, %256 : vector<16x512xf32>
    %c0_176 = arith.constant 0 : index
    %c0_177 = arith.constant 0 : index
    %c0_178 = arith.constant 0 : index
    %258 = vector.load %arg7[%c0_176, %c0_177, %c0_178] : memref<1x16x512xf32, #tpu.memory_space<vmem>>, vector<1x16x512xf32>
    %259 = vector.shape_cast %258 : vector<1x16x512xf32> to vector<16x512xf32>
    %260 = vector.shape_cast %257 : vector<16x512xf32> to vector<1x16x512xf32>
    tpu.vector_store %arg7[%c0_176, %c0_177, %c0_178], %260 {strides = array<i32>} : memref<1x16x512xf32, #tpu.memory_space<vmem>>, vector<1x16x512xf32>,
    return
  }
  func.func @transform_0(%arg0: i32, %arg1: i32) -> (i32, i32, i32) {
    %c0_i32 = arith.constant 0 : i32
    %c0_i32_0 = arith.constant 0 : i32
    %c0_i32_1 = arith.constant 0 : i32
    return %arg0, %c0_i32, %c0_i32_0 : i32, i32, i32
  }
  func.func @transform_1(%arg0: i32, %arg1: i32) -> (i32, i32, i32) {
    %c0_i32 = arith.constant 0 : i32
    %c0_i32_0 = arith.constant 0 : i32
    %c0_i32_1 = arith.constant 0 : i32
    return %c0_i32, %arg1, %c0_i32_0 : i32, i32, i32
  }
  func.func @transform_2(%arg0: i32, %arg1: i32) -> (i32, i32, i32) {
    %c0_i32 = arith.constant 0 : i32
    %c0_i32_0 = arith.constant 0 : i32
    %c0_i32_1 = arith.constant 0 : i32
    %c0_i32_2 = arith.constant 0 : i32
    return %c0_i32, %c0_i32_0, %c0_i32_1 : i32, i32, i32
  }
  func.func @transform_3(%arg0: i32, %arg1: i32) -> (i32, i32) {
    %c0_i32 = arith.constant 0 : i32
    %c0_i32_0 = arith.constant 0 : i32
    return %arg1, %c0_i32 : i32, i32
  }
  func.func @transform_4(%arg0: i32, %arg1: i32) -> (i32, i32) {
    %c0_i32 = arith.constant 0 : i32
    %c0_i32_0 = arith.constant 0 : i32
    return %arg1, %c0_i32 : i32, i32
  }
  func.func @transform_5(%arg0: i32, %arg1: i32) -> (i32, i32, i32) {
    %c0_i32 = arith.constant 0 : i32
    %c0_i32_0 = arith.constant 0 : i32
    return %arg0, %arg1, %c0_i32 : i32, i32, i32
  }
}

</mosaic_0001>

<bundles_post_ra>
// kernel: tpu_custom_call.1
= control target key start
LH: loop header
LB: loop body
LE: loop exit
PB: predicated region body
PF: predicated region fallthrough
CT: control target
= control target key end

     0   :  { %10 = vsyncpa [#allocation4], 0  ;;  %s8781_s0 = inlined_call_operand.vmem [shape: f32[2,16,512], index: 0, kind: input, shape index: {}]   ;;  %s8782_s1 = inlined_call_operand.vmem [shape: f32[27,16,16], index: 1, kind: input, shape index: {}]   ;;  %s8783_s2 = inlined_call_operand.vmem [shape: f32[27,1,512], index: 2, kind: input, shape index: {}]   ;;  %s8784_s3 = inlined_call_operand.vmem [shape: f32[16,1], index: 3, kind: input, shape index: {}]   ;;  %s8785_s4 = inlined_call_operand.vmem [shape: f32[16,1], index: 4, kind: input, shape index: {}]   ;;  %s8786_s5 = inlined_call_operand.hbm [shape: f32[2,16,512], index: 5, kind: output, shape index: {}]  }
   0x1   :  { %12 = vsyncpa [#allocation4 + $0x1], 0  ;;  %s6748_s18 = smov 0   ;;  %s6750_s19 = smov 0  }
   0x2   :  { %s6752_s20 = smov 0   ;;  %s6754_s21 = smov 0  }
   0x3   :  { %s6756_s22 = smov 0   ;;  %s6758_s23 = smov 0  }
   0x4 LB: > { %s5553_s24 = sadd.s32 4294967295, %s6696_s23   ;;  %s5554_s25 = sadd.s32 4294967294, %s6696_s23   ;;  %s6696_s23 = sphi %s6758_s23, %s18_s23   ;;  %s6692_s22 = sphi %s6756_s22, %s8894_s22   ;;  %s6688_s21 = sphi %s6754_s21, %s8893_s21   ;;  %s6684_s20 = sphi %s6752_s20, %s8892_s20   ;;  %s6680_s19 = sphi %s6750_s19, %s8891_s19   ;;  %s6676_s18 = sphi %s6748_s18, %s8890_s18  }
   0x5   : > { %s30_s26 = sadd.s32 1, %s6692_s22  ;;  %s164_s27 = sadd.s32 1, %s6684_s20 }
   0x6   : > { %p32_p0 = scmp.ge.s32.totalorder %s30_s26, 2  ;;  %p174_p1 = scmp.ne.s32.totalorder %s6684_s20, %s6680_s19 }
   0x7   : > { %p175_p2 = scmp.eq.s32.totalorder %s5553_s24, 1  ;;  %p180_p3 = scmp.ne.s32.totalorder %s6680_s19, %s6676_s18 }
   0x8   : > { %s8896_s26 = smov (%p32_p0, %s30_s26), 0  ;;  %p181_p5 = scmp.eq.s32.totalorder %s5554_s25, 1 }
   0x9   : > { %p6788_p4 = por %p175_p2, %p174_p1  ;;  %s159_s29 = ssub.s32 %s6692_s22, %s8896_s26 }
   0xa   : > { %p5560_p6 = scmp.ge.s32.totalorder %s6696_s23, 1  ;;  %p162_p7 = scmp.eq.s32.totalorder %s159_s29, 0 }
   0xb   : > { %p6795_p8 = por %p181_p5, %p180_p3  ;;  %p237_p9 = scmp.lt.s32.totalorder %s6696_s23, 3 }
   0xc   : > { %s6801_s6 = scalar_select %p162_p7, %s6684_s20, %s164_s27  }
   0xd   : > { %p238_p10 = pnand %p5560_p6, %p237_p9 }
   0xf   : > { %241 = sbr.rel (%p238_p10) target bundleno = 2788 (0xae4), region = 40 }
  0x14   : > { %v344_v0 = vld [vmem:[%s8783_s2] sm:$0xf]  ;;  %v5564_v3 = vld [vmem:[%s8783_s2 + $0x4] sm:$0xf]  ;;  %s6698_s11 = smov 55   ;;  %s8800_s12 = smov 56  }
  0x15   : > { %v348_v1 = vperm.slane %v344_v0, 2  ;;  %v346_v2 = vperm.slane %v344_v0, 0  ;;  %v382_v4 = vperm.slane %v5564_v3, 0  ;;  %v349_v5 = vperm.slane %v344_v0, 3  ;;  %v5583_v10 = vld [vmem:[%s8783_s2 + $0x8] sm:$0xf] }
  0x16   : > { %v347_v6 = vperm.slane %v344_v0, 1  ;;  %v383_v7 = vperm.slane %v5564_v3, 1  ;;  %v385_v8 = vperm.slane %v5564_v3, 3  ;;  %v384_v9 = vperm.slane %v5564_v3, 2  ;;  %s8795_s15 = smov 57   ;;  %s8793_s24 = smov 63  }
  0x17   : > { %354 = vrot.lane.b32.xlu1 %v348_v1, %s6698_s11  ;;  %350 = vrot.lane.b32.xlu0 %v346_v2, %s6698_s11  ;;  %v712_v11 = vperm.slane %v5583_v10, 2  ;;  %v711_v12 = vperm.slane %v5583_v10, 1  ;;  %v710_v13 = vperm.slane %v5583_v10, 0  ;;  %v5594_v14 = vld [vmem:[%s8783_s2 + $0xc] sm:$0xf]  ;;  %v713_v16 = vperm.slane %v5583_v10, 3 }
  0x18   : > { %386 = vrot.lane.b32.xlu2 %v382_v4, %s8800_s12  ;;  %v902_v15 = vperm.slane %v5594_v14, 2  ;;  %v901_v17 = vperm.slane %v5594_v14, 1  ;;  %v5605_v18 = vld [vmem:[%s8783_s2 + $0x10] sm:$0xf]  ;;  %s8791_s29 = smov 64   ;;  %v900_v20 = vperm.slane %v5594_v14, 0 }
  0x19   : > { %v1092_v19 = vperm.slane %v5605_v18, 2  ;;  %v1091_v21 = vperm.slane %v5605_v18, 1  ;;  %v903_v22 = vperm.slane %v5594_v14, 3  ;;  %v1090_v23 = vperm.slane %v5605_v18, 0  ;;  %v6841_v25 = vld [vmem:[%s8783_s2 + $0x14] sm:$0xf] }
  0x1a   : > { %v1093_v24 = vperm.slane %v5605_v18, 3  ;;  %v1279_v26 = vperm.slane %v6841_v25, 0  ;;  %v1281_v27 = vperm.slane %v6841_v25, 2  ;;  %p280_p11 = scmp.lt.s32.totalorder %s6688_s21, 1  ;;  %s8787_s9 = smov 65   ;;  %v1280_v29 = vperm.slane %v6841_v25, 1 }
  0x1b   : > { %vm394_vm0 = vcmask 457728   ;;  %s8797_s25 = smov 72   ;;  %s6705_s27 = smov 73   ;;  %vm358_vm1 = vcmask 449536   ;;  %vm722_vm2 = vcmask 465920   ;;  %vm912_vm3 = vcmask 515072  }
  0x1c   : > { %s281_s10 = scalar_select %p280_p11, %s6688_s21, 1  ;;  %vm1102_vm4 = vcmask 523264   ;;  %vm8799_vm5 = vcmask 531456   ;;  %vm446_vm6 = vcmask 588800   ;;  %vm463_vm7 = vcmask 130048  }
  0x1d   : > { %s8789_s7 = smov 71   ;;  %vm592_vm8 = vcmask 596992   ;;  %vm8802_vm9 = vcmask 580608   ;;  %s6707_s8 = smov 119   ;;  %vm2043_vm10 = vcmask 973824   ;;  %vm2095_vm11 = vcmask 72704  }
  0x1e   : > { %s5863_s13 = sshll.u32 %s281_s10, 6  ;;  %s6708_s10 = smov 9   ;;  %vm2233_vm12 = vcmask 982016   ;;  %vm2285_vm13 = vcmask 64512   ;;  %vm2423_vm14 = vcmask 990208   ;;  %vm2475_vm15 = vcmask 56320  }
  0x1f   : > { %356 = vrot.lane.b32.xlu1 %v349_v5, %s6698_s11  ;;  %352 = vrot.lane.b32.xlu0 %v347_v6, %s6698_s11  ;;  %s6853_s17 = scalar_lea.vmem %s8781_s0, %s5863_s13  ;;  %s6709_s16 = smov 120  }
  0x20   : > { %388 = vrot.lane.b32.xlu2 %v383_v7, %s8800_s12  ;;  %v6857_v30 = vld [vmem:[%s6853_s17] sm:$0xff]  ;;  %v6863_v38 = vld [vmem:[%s6853_s17 + $0x18] sm:$0xff]  ;;  %v6876_v48 = vld [vmem:[%s6853_s17 + $0x28] sm:$0xff]  ;;  %s6711_s14 = smov 121   ;;  %s6713_s13 = smov 127  }
  0x21   : > { %v6868_v44 = vld [vmem:[%s6853_s17 + $0x20] sm:$0xff]  ;;  %v6889_v56 = vld [vmem:[%s6853_s17 + $0x8] sm:$0xff]  ;;  %v6893_v58 = vld [vmem:[%s6853_s17 + $0x10] sm:$0xff] }
  0x22   : > { %v6901_v1 = vld [vmem:[%s6853_s17 + $0x38] sm:$0xff]  ;;  %v6904_v2 = vld [vmem:[%s6853_s17 + $0x30] sm:$0xff] }
  0x27   : > { %392 = vrot.lane.b32.xlu1 %v385_v8, %s8800_s12  ;;  %390 = vrot.lane.b32.xlu0 %v384_v9, %s8800_s12 }
  0x28   : > { %718 = vrot.lane.b32.xlu2 %v712_v11, %s8795_s15 }
  0x2f   : > { %716 = vrot.lane.b32.xlu1 %v711_v12, %s8795_s15  ;;  %714 = vrot.lane.b32.xlu0 %v710_v13, %s8795_s15 }
  0x30   : > { %908 = vrot.lane.b32.xlu2 %v902_v15, %s8793_s24 }
  0x37   : > { %720 = vrot.lane.b32.xlu0 %v713_v16, %s8795_s15  ;;  %906 = vrot.lane.b32.xlu1 %v901_v17, %s8793_s24 }
  0x38   : > { %1098 = vrot.lane.b32.xlu2 %v1092_v19, %s8791_s29 }
  0x3f   : > { %904 = vrot.lane.b32.xlu0 %v900_v20, %s8793_s24  ;;  %1096 = vrot.lane.b32.xlu1 %v1091_v21, %s8791_s29 }
  0x40   : > { %1287 = vrot.lane.b32.xlu2 %v1281_v27, %s8787_s9 }
  0x47   : > { %910 = vrot.lane.b32.xlu0 %v903_v22, %s8793_s24  ;;  %1285 = vrot.lane.b32.xlu1 %v1280_v29, %s8787_s9 }
  0x4f   : > { %1094 = vrot.lane.b32.xlu0 %v1090_v23, %s8791_s29 }
  0x57   : > { %1100 = vrot.lane.b32.xlu0 %v1093_v24, %s8791_s29 }
  0x5f   : > { %1283 = vrot.lane.b32.xlu0 %v1279_v26, %s8787_s9 }
  0x72   : > { %v387_v28 = vpop.permute.xlu2 %386 }
  0x73   : > { %v403_v31 = vmul.f32 0.0, %v387_v28 }
  0x7a   : > { %v389_v32 = vpop.permute.xlu2 %388 }
  0x7b   : > { %v395_v33 = vsel %vm394_vm0, %v387_v28, %v389_v32 }
  0x7c   : > { %v404_v34 = vmul.f32 %v395_v33, %v6857_v30  ;;  %v409_v45 = vmul.f32 %v395_v33, %v6868_v44 }
  0x7e   : > { %v5965_v35 = vpack.i.bf16 %v404_v34, %v403_v31 }
  0x80   : > { %5966 = vrot.lane.b32.xlu2 %v5965_v35, %s8797_s25 }
  0x82   : > { %v719_v14 = vpop.permute.xlu2 %718 }
  0x89   : > { %v355_v36 = vpop.permute.xlu1 %354  ;;  %v351_v37 = vpop.permute.xlu0 %350 }
  0x8a   : > { %v367_v41 = vmul.f32 0.0, %v351_v37 }
  0x91   : > { %v357_v39 = vpop.permute.xlu1 %356  ;;  %v353_v40 = vpop.permute.xlu0 %352 }
  0x92   : > { %v371_v42 = vmul.f32 %v357_v39, %v6863_v38  ;;  %v359_v53 = vsel %vm358_vm1, %v351_v37, %v353_v40  ;;  %v361_v55 = vsel %vm358_vm1, %v355_v36, %v357_v39  ;;  %v360_v57 = vsel %vm358_vm1, %v353_v40, %v355_v36  ;;  %v909_v36 = vpop.permute.xlu2 %908 }
  0x93   : > { %v368_v59 = vmul.f32 %v359_v53, %v6857_v30  ;;  %v369_v60 = vmul.f32 %v360_v57, %v6889_v56  ;;  %v370_v62 = vmul.f32 %v361_v55, %v6893_v58  ;;  %v376_v3 = vmul.f32 %v357_v39, %v6901_v1 }
  0x94   : > { %v5945_v43 = vpack.i.bf16 %v367_v41, %v371_v42  ;;  %v375_v4 = vmul.f32 %v361_v55, %v6904_v2  ;;  %v373_v5 = vmul.f32 %v359_v53, %v6868_v44  ;;  %v374_v6 = vmul.f32 %v360_v57, %v6876_v48 }
  0x95   : > { %v5985_v63 = vpack.i.bf16 %v368_v59, %v367_v41  ;;  %v5990_v0 = vpack.i.bf16 %v370_v62, %v369_v60 }
  0x96   : > { %5946 = vrot.lane.b32.xlu0 %v5945_v43, %s6705_s27  ;;  %v6000_v11 = vpack.i.bf16 %v376_v3, %v375_v4  ;;  %v5995_v13 = vpack.i.bf16 %v374_v6, %v373_v5 }
  0x99   : > { %v6871_v46 = vpop.permute.xlu1 %392  ;;  %v6873_v47 = vpop.permute.xlu0 %390 }
  0x9a   : > { %v407_v49 = vmul.f32 %v6871_v46, %v6863_v38  ;;  %v6882_v50 = vsel %vm394_vm0, %v389_v32, %v6873_v47  ;;  %v397_v3 = vsel %vm394_vm0, %v6873_v47, %v6871_v46  ;;  %v1099_v4 = vpop.permute.xlu2 %1098 }
  0x9b   : > { %v410_v51 = vmul.f32 %v6882_v50, %v6876_v48 }
  0x9c   : > { %v5940_v52 = vpack.i.bf16 %v403_v31, %v407_v49 }
  0x9d   : > { %v5975_v54 = vpack.i.bf16 %v410_v51, %v409_v45 }
  0x9e   : > { %5941 = vrot.lane.b32.xlu1 %v5940_v52, %s8797_s25 }
  0x9f   : > { %5976 = vrot.lane.b32.xlu2 %v5975_v54, %s8797_s25 }
  0xa1   : > { %v715_v61 = vpop.permute.xlu0 %714  ;;  %v717_v8 = vpop.permute.xlu1 %716 }
  0xa2   : > { %v731_v9 = vmul.f32 0.0, %v715_v61  ;;  %v723_v15 = vsel %vm722_vm2, %v715_v61, %v717_v8  ;;  %v724_v17 = vsel %vm722_vm2, %v717_v8, %v719_v14  ;;  %v405_v8 = vmul.f32 %v6882_v50, %v6889_v56 }
  0xa3   : > { %v732_v18 = vmul.f32 %v723_v15, %v6857_v30  ;;  %v733_v19 = vmul.f32 %v724_v17, %v6889_v56  ;;  %v738_v24 = vmul.f32 %v724_v17, %v6876_v48  ;;  %v737_v26 = vmul.f32 %v723_v15, %v6868_v44 }
  0xa4   : > { %v412_v50 = vmul.f32 %v6871_v46, %v6901_v1  ;;  %v1282_v46 = vperm.slane %v6841_v25, 3 }
  0xa5   : > { %v6005_v22 = vpack.i.bf16 %v732_v18, %v731_v9  ;;  %v6015_v35 = vpack.i.bf16 %v738_v24, %v737_v26  ;;  %v6974_v24 = vpop.permute.xlu2 %1287 }
  0xa6   : > { %5986 = vrot.lane.b32.xlu1 %v5985_v63, %s6705_s27 }
  0xa7   : > { %5991 = vrot.lane.b32.xlu2 %v5990_v0, %s6705_s27 }
  0xa9   : > { %v721_v7 = vpop.permute.xlu0 %720  ;;  %v907_v31 = vpop.permute.xlu1 %906 }
  0xaa   : > { %v735_v10 = vmul.f32 %v721_v7, %v6863_v38  ;;  %v725_v16 = vsel %vm722_vm2, %v719_v14, %v721_v7  ;;  %v740_v27 = vmul.f32 %v721_v7, %v6901_v1  ;;  %v914_v41 = vsel %vm912_vm3, %v907_v31, %v909_v36 }
  0xab   : > { %v734_v21 = vmul.f32 %v725_v16, %v6893_v58  ;;  %v739_v29 = vmul.f32 %v725_v16, %v6904_v2  ;;  %v923_v43 = vmul.f32 %v914_v41, %v6889_v56  ;;  %v928_v53 = vmul.f32 %v914_v41, %v6876_v48 }
  0xac   : > { %v5950_v12 = vpack.i.bf16 %v731_v9, %v735_v10  ;;  %v406_v9 = vmul.f32 %v397_v3, %v6893_v58  ;;  %v411_v16 = vmul.f32 %v397_v3, %v6904_v2  ;;  %v7037_v3 = vld [vmem:[%s8782_s1] sm:$0xff] }
  0xad   : > { %v6010_v23 = vpack.i.bf16 %v734_v21, %v733_v19  ;;  %v6020_v39 = vpack.i.bf16 %v740_v27, %v739_v29 }
  0xae   : > { %5951 = vrot.lane.b32.xlu0 %v5950_v12, %s8789_s7  ;;  %5996 = vrot.lane.b32.xlu1 %v5995_v13, %s6705_s27  ;;  %v5970_v13 = vpack.i.bf16 %v406_v9, %v405_v8  ;;  %v5980_v21 = vpack.i.bf16 %v412_v50, %v411_v16 }
  0xaf   : > { %6001 = vrot.lane.b32.xlu2 %v6000_v11, %s6705_s27 }
  0xb1   : > { %v905_v20 = vpop.permute.xlu0 %904  ;;  %v1097_v60 = vpop.permute.xlu1 %1096 }
  0xb2   : > { %v921_v32 = vmul.f32 0.0, %v905_v20  ;;  %v913_v37 = vsel %vm912_vm3, %v905_v20, %v907_v31  ;;  %v1104_v10 = vsel %vm1102_vm4, %v1097_v60, %v1099_v4 }
  0xb3   : > { %v922_v42 = vmul.f32 %v913_v37, %v6857_v30  ;;  %v927_v54 = vmul.f32 %v913_v37, %v6868_v44  ;;  %v1113_v11 = vmul.f32 %v1104_v10, %v6889_v56  ;;  %v1118_v17 = vmul.f32 %v1104_v10, %v6876_v48 }
  0xb5   : > { %v6025_v51 = vpack.i.bf16 %v922_v42, %v921_v32  ;;  %v6035_v0 = vpack.i.bf16 %v928_v53, %v927_v54  ;;  %v7012_v53 = vld [vmem:[%s8782_s1 + $0x10] sm:$0xff] }
  0xb6   : > { %6006 = vrot.lane.b32.xlu1 %v6005_v22, %s8789_s7 }
  0xb7   : > { %6011 = vrot.lane.b32.xlu2 %v6010_v23, %s8789_s7 }
  0xb9   : > { %v911_v28 = vpop.permute.xlu0 %910 }
  0xba   : > { %v925_v33 = vmul.f32 %v911_v28, %v6863_v38  ;;  %v915_v40 = vsel %vm912_vm3, %v909_v36, %v911_v28  ;;  %v930_v55 = vmul.f32 %v911_v28, %v6901_v1  ;;  %v1286_v28 = vpop.permute.xlu1 %1285 }
  0xbb   : > { %v924_v49 = vmul.f32 %v915_v40, %v6893_v58  ;;  %v929_v59 = vmul.f32 %v915_v40, %v6904_v2  ;;  %v6994_v37 = vsel %vm8799_vm5, %v1286_v28, %v6974_v24 }
  0xbc   : > { %v5955_v34 = vpack.i.bf16 %v921_v32, %v925_v33  ;;  %v1306_v40 = vmul.f32 %v6994_v37, %v6876_v48 }
  0xbd   : > { %v6030_v52 = vpack.i.bf16 %v924_v49, %v923_v43  ;;  %v6040_v6 = vpack.i.bf16 %v930_v55, %v929_v59  ;;  %v7021_v55 = vld [vmem:[%s8782_s1 + $0x18] sm:$0xff] }
  0xbe   : > { %5956 = vrot.lane.b32.xlu0 %v5955_v34, %s8787_s9  ;;  %6016 = vrot.lane.b32.xlu1 %v6015_v35, %s8789_s7 }
  0xbf   : > { %6021 = vrot.lane.b32.xlu2 %v6020_v39, %s8789_s7 }
  0xc1   : > { %v1095_v45 = vpop.permute.xlu0 %1094 }
  0xc2   : > { %v1111_v61 = vmul.f32 0.0, %v1095_v45  ;;  %v1103_v5 = vsel %vm1102_vm4, %v1095_v45, %v1097_v60 }
  0xc3   : > { %v1112_v47 = vmul.f32 %v1103_v5, %v6857_v30  ;;  %v1117_v18 = vmul.f32 %v1103_v5, %v6868_v44 }
  0xc5   : > { %v6045_v14 = vpack.i.bf16 %v1112_v47, %v1111_v61  ;;  %v6055_v22 = vpack.i.bf16 %v1118_v17, %v1117_v18 }
  0xc6   : > { %6026 = vrot.lane.b32.xlu1 %v6025_v51, %s8787_s9 }
  0xc7   : > { %6031 = vrot.lane.b32.xlu2 %v6030_v52, %s8787_s9 }
  0xc9   : > { %v1101_v57 = vpop.permute.xlu0 %1100 }
  0xca   : > { %v1115_v62 = vmul.f32 %v1101_v57, %v6863_v38  ;;  %v1105_v7 = vsel %vm1102_vm4, %v1099_v4, %v1101_v57  ;;  %v1120_v19 = vmul.f32 %v1101_v57, %v6901_v1 }
  0xcb   : > { %v1114_v12 = vmul.f32 %v1105_v7, %v6893_v58  ;;  %v1119_v20 = vmul.f32 %v1105_v7, %v6904_v2  ;;  %v7047_v7 = vld [vmem:[%s8782_s1 + $0x8] sm:$0xff] }
  0xcc   : > { %v5960_v63 = vpack.i.bf16 %v1111_v61, %v1115_v62 }
  0xcd   : > { %v6050_v15 = vpack.i.bf16 %v1114_v12, %v1113_v11  ;;  %v6060_v23 = vpack.i.bf16 %v1120_v19, %v1119_v20 }
  0xce   : > { %5961 = vrot.lane.b32.xlu0 %v5960_v63, %s8791_s29  ;;  %6036 = vrot.lane.b32.xlu1 %v6035_v0, %s8787_s9 }
  0xcf   : > { %6041 = vrot.lane.b32.xlu2 %v6040_v6, %s8787_s9 }
  0xd1   : > { %v1284_v27 = vpop.permute.xlu0 %1283 }
  0xd2   : > { %v1291_v29 = vsel %vm8799_vm5, %v1284_v27, %v1286_v28  ;;  %v6980_v31 = vmul.f32 0.0, %v1284_v27  ;;  %v7085_v27 = vld [vmem:[%s8783_s2 + $0x18] sm:$0xf] }
  0xd3   : > { %v1300_v32 = vmul.f32 %v1291_v29, %v6857_v30  ;;  %v1305_v39 = vmul.f32 %v1291_v29, %v6868_v44 }
  0xd5   : > { %v6065_v35 = vpack.i.bf16 %v1300_v32, %v6980_v31  ;;  %v6080_v41 = vpack.i.bf16 %v1306_v40, %v1305_v39  ;;  %v1468_v32 = vperm.slane %v7085_v27, 1 }
  0xd6   : > { %5971 = vrot.lane.b32.xlu0 %v5970_v13, %s8797_s25  ;;  %6046 = vrot.lane.b32.xlu1 %v6045_v14, %s8791_s29  ;;  %v7061_v14 = vld [vmem:[%s8782_s1 + $0x20] sm:$0xff] }
  0xd7   : > { %6051 = vrot.lane.b32.xlu2 %v6050_v15, %s8791_s29 }
  0xda   : > { %v6977_v26 = vpop.permute.xlu2 %5966 }
  0xdb   : > { %v5969_v42 = vunpack.i.h.bf16 %v6977_v26  ;;  %v5968_v43 = vunpack.i.l.bf16 %v6977_v26 }
  0xdd   : > { %v447_v52 = vsel %vm446_vm6, %v5968_v43, %v5969_v42 }
  0xde   : > { %5981 = vrot.lane.b32.xlu0 %v5980_v21, %s8797_s25  ;;  %6056 = vrot.lane.b32.xlu1 %v6055_v22, %s8791_s29 }
  0xdf   : > { %6061 = vrot.lane.b32.xlu2 %v6060_v23, %s8791_s29  ;;  %s8807_s29 = smov 56  }
  0xe6   : > { %1289 = vrot.lane.b32.xlu0 %v1282_v46, %s8787_s9  ;;  %6066 = vrot.lane.b32.xlu1 %v6065_v35, %s8793_s24  ;;  %s6710_s9 = smov 8  }
  0xee   : > { %6081 = vrot.lane.b32.xlu1 %v6080_v41, %s8793_s24 }
  0xf6   : > { %1473 = vrot.lane.b32.xlu1 %v1468_v32, %s8789_s7  ;;  %v1301_v32 = vmul.f32 %v6994_v37, %v6889_v56 }
  0xf9   : > { %v6983_v33 = vpop.permute.xlu2 %5976 }
  0xfa   : > { %v5979_v25 = vunpack.i.h.bf16 %v6983_v33  ;;  %v5978_v34 = vunpack.i.l.bf16 %v6983_v33 }
  0xfc   : > { %v452_v36 = vsel %vm446_vm6, %v5978_v34, %v5979_v25 }
  0xfd   : > { %507 = vmatpush.msra.mxu1 %v452_v36 }
 0x101   : > { %v7042_v6 = vpop.permute.xlu2 %5991 }
 0x108   : > { %v7023_v57 = vpop.permute.xlu0 %5946 }
 0x109   : > { %v5949_v60 = vunpack.i.h.bf16 %v7023_v57  ;;  %v7063_v15 = vpop.permute.xlu2 %6001 }
 0x110   : > { %v7002_v45 = vpop.permute.xlu1 %5941 }
 0x111   : > { %v5944_v49 = vunpack.i.h.bf16 %v7002_v45  ;;  %v7072_v18 = vpop.permute.xlu2 %6011 }
 0x113   : > { %v451_v51 = vsel %vm446_vm6, %v5944_v49, %v5978_v34  ;;  %v5993_v49 = vunpack.i.l.bf16 %v7042_v6 }
 0x114   : > { %484 = vmatpush.msra.mxu0 %v451_v51 }
 0x116   : > { %485 = vmatpush.msra.mxu0 %v447_v52 }
 0x117   : > { %5567 = vmatmul.msk.f32.vlgmr.msra.gmra.mxu0 %vm463_vm7, %v7012_v53 }
 0x118   : > { %v7016_v54 = vpop.permute.xlu1 %5986 }
 0x119   : > { %v5989_v61 = vunpack.i.h.bf16 %v7016_v54  ;;  %v5988_v62 = vunpack.i.l.bf16 %v7016_v54  ;;  %v7097_v36 = vpop.permute.xlu2 %6021  ;;  %v6013_v54 = vunpack.i.l.bf16 %v7072_v18 }
 0x11b   : > { %v593_v4 = vsel %vm592_vm8, %v5988_v62, %v5989_v61  ;;  %v594_v52 = vsel %vm592_vm8, %v5989_v61, %v5993_v49 }
 0x11f   : > { %5568 = vmatmul.msk.f32.gmra.mxu0 %vm463_vm7, %v7021_v55 }
 0x120   : > { %v7027_v59 = vpop.permute.xlu1 %5996  ;;  %v7049_v8 = vpop.permute.xlu0 %5951 }
 0x121   : > { %v5998_v63 = vunpack.i.l.bf16 %v7027_v59  ;;  %v5954_v10 = vunpack.i.h.bf16 %v7049_v8  ;;  %v5999_v39 = vunpack.i.h.bf16 %v7027_v59 }
 0x123   : > { %v597_v0 = vsel %vm592_vm8, %v5949_v60, %v5998_v63  ;;  %v598_v51 = vsel %vm592_vm8, %v5998_v63, %v5999_v39 }
 0x124   : > { %629 = vmatpush.msrb.mxu0 %v597_v0 }
 0x126   : > { %630 = vmatpush.msrb.mxu0 %v593_v4 }
 0x127   : > { %5575 = vmatmul.msk.f32.vlgmr.msrb.gmra.mxu0 %vm463_vm7, %v7037_v3 }
 0x128   : > { %v6007_v5 = vpop.permute.xlu1 %6006 }
 0x129   : > { %v6009_v47 = vunpack.i.h.bf16 %v6007_v5  ;;  %v6008_v11 = vunpack.i.l.bf16 %v6007_v5 }
 0x12b   : > { %v775_v50 = vsel %vm8802_vm9, %v6008_v11, %v6009_v47  ;;  %v7119_v11 = vpop.permute.xlu2 %6031 }
 0x12f   : > { %5576 = vmatmul.msk.f32.gmra.mxu0 %vm463_vm7, %v7047_v7 }
 0x130   : > { %v7053_v9 = vpop.permute.xlu1 %6016  ;;  %v7068_v16 = vpop.permute.xlu0 %5956 }
 0x131   : > { %v6018_v12 = vunpack.i.l.bf16 %v7053_v9  ;;  %v5959_v21 = vunpack.i.h.bf16 %v7068_v16  ;;  %v6019_v43 = vunpack.i.h.bf16 %v7053_v9  ;;  %v776_v9 = vsel %vm8802_vm9, %v6009_v47, %v6013_v54 }
 0x132   : > { %v5948_v47 = vunpack.i.l.bf16 %v7023_v57  ;;  %v6014_v57 = vunpack.i.h.bf16 %v7072_v18 }
 0x133   : > { %v779_v13 = vsel %vm8802_vm9, %v5954_v10, %v6018_v12  ;;  %v780_v60 = vsel %vm8802_vm9, %v6018_v12, %v6019_v43  ;;  %v5943_v10 = vunpack.i.l.bf16 %v7002_v45  ;;  %v5994_v45 = vunpack.i.h.bf16 %v7042_v6 }
 0x134   : > { %811 = vmatpush.msra.mxu0 %v779_v13  ;;  %v6023_v6 = vunpack.i.l.bf16 %v7097_v36 }
 0x135   : > { %v596_v18 = vsel %vm592_vm8, %v5994_v45, %v5948_v47 }
 0x136   : > { %812 = vmatpush.msra.mxu0 %v775_v50 }
 0x137   : > { %5586 = vmatmul.msk.f32.vlgmr.msra.gmra.mxu0 %vm463_vm7, %v7061_v14 }
 0x138   : > { %v7070_v17 = vpop.permute.xlu1 %6026 }
 0x139   : > { %v6029_v22 = vunpack.i.h.bf16 %v7070_v17  ;;  %v6028_v23 = vunpack.i.l.bf16 %v7070_v17  ;;  %v6034_v17 = vunpack.i.h.bf16 %v7119_v11 }
 0x13b   : > { %v965_v29 = vsel %vm8799_vm5, %v6028_v23, %v6029_v22  ;;  %v6003_v23 = vunpack.i.l.bf16 %v7063_v15 }
 0x140   : > { %v7074_v19 = vpop.permute.xlu0 %5961  ;;  %v7076_v20 = vpop.permute.xlu1 %6036 }
 0x141   : > { %v6038_v46 = vunpack.i.l.bf16 %v7076_v20  ;;  %v5964_v59 = vunpack.i.h.bf16 %v7074_v19  ;;  %v6039_v37 = vunpack.i.h.bf16 %v7076_v20  ;;  %v1467_v20 = vperm.slane %v7085_v27, 0 }
 0x143   : > { %v969_v28 = vsel %vm8799_vm5, %v5959_v21, %v6038_v46  ;;  %v6004_v21 = vunpack.i.h.bf16 %v7063_v15 }
 0x144   : > { %1001 = vmatpush.msrb.mxu0 %v969_v28  ;;  %v6024_v28 = vunpack.i.h.bf16 %v7097_v36  ;;  %v5953_v36 = vunpack.i.l.bf16 %v7049_v8 }
 0x146   : > { %1002 = vmatpush.msrb.mxu0 %v965_v29  ;;  %v599_v29 = vsel %vm592_vm8, %v5999_v39, %v6003_v23  ;;  %v782_v8 = vsel %vm8802_vm9, %v6023_v6, %v6024_v28 }
 0x148   : > { %v5972_v34 = vpop.permute.xlu0 %5971  ;;  %v7095_v35 = vpop.permute.xlu1 %6046 }
 0x149   : > { %v5973_v40 = vunpack.i.l.bf16 %v5972_v34  ;;  %v5974_v62 = vunpack.i.h.bf16 %v5972_v34  ;;  %v6049_v63 = vunpack.i.h.bf16 %v7095_v35  ;;  %v6048_v61 = vunpack.i.l.bf16 %v7095_v35 }
 0x14a   : > { %v600_v34 = vsel %vm592_vm8, %v6003_v23, %v6004_v21  ;;  %v1469_v23 = vperm.slane %v7085_v27, 2 }
 0x14b   : > { %v448_v41 = vsel %vm446_vm6, %v5969_v42, %v5973_v40  ;;  %v449_v33 = vsel %vm446_vm6, %v5973_v40, %v5974_v62  ;;  %v1154_v15 = vsel %vm1102_vm4, %v6048_v61, %v6049_v63 }
 0x14c   : > { %508 = vmatpush.msra.mxu1 %v448_v41 }
 0x14d   : > { %5569 = vmatmul.msk.f32.vlgmr.msra.gmra.mxu1 %vm463_vm7, %v7012_v53 }
 0x14e   : > { %652 = vmatpush.msrb.mxu1 %v598_v51  ;;  %v595_v51 = vsel %vm592_vm8, %v5993_v49, %v5994_v45  ;;  %v777_v49 = vsel %vm8802_vm9, %v6013_v54, %v6014_v57  ;;  %v970_v54 = vsel %vm8799_vm5, %v6038_v46, %v6039_v37 }
 0x150   : > { %653 = vmatpush.msrb.mxu1 %v594_v52  ;;  %v5982_v26 = vpop.permute.xlu0 %5981  ;;  %v7111_v42 = vpop.permute.xlu1 %6056 }
 0x151   : > { %v5984_v0 = vunpack.i.h.bf16 %v5982_v26  ;;  %v5983_v4 = vunpack.i.l.bf16 %v5982_v26  ;;  %v6058_v5 = vunpack.i.l.bf16 %v7111_v42 }
 0x152   : > { %834 = vmatpush.msra.mxu1 %v780_v60  ;;  %v778_v60 = vsel %vm8802_vm9, %v6014_v57, %v5953_v36 }
 0x153   : > { %v453_v12 = vsel %vm446_vm6, %v5979_v25, %v5983_v4  ;;  %v454_v13 = vsel %vm446_vm6, %v5983_v4, %v5984_v0  ;;  %v1158_v50 = vsel %vm1102_vm4, %v5964_v59, %v6058_v5  ;;  %v450_v25 = vsel %vm446_vm6, %v5974_v62, %v5943_v10  ;;  %v5595_v4 = vld [vmem:[%s8782_s1 + $0x30] sm:$0xff] }
 0x154   : > { %835 = vmatpush.msra.mxu1 %v776_v9  ;;  %530 = vmatpush.msra.mxu2 %v453_v12 }
 0x155   : > { %553 = vmatpush.msra.mxu3 %v454_v13  ;;  %1190 = vmatpush.msra.mxu0 %v1158_v50 }
 0x156   : > { %5570 = vmatmul.msk.f32.gmra.mxu1 %vm463_vm7, %v7021_v55  ;;  %531 = vmatpush.msra.mxu2 %v449_v33 }
 0x157   : > { %554 = vmatpush.msra.mxu3 %v450_v25  ;;  %1191 = vmatpush.msra.mxu0 %v1154_v15 }
 0x158   : > { %5571 = vmatmul.msk.f32.vlgmr.msra.gmra.mxu2 %vm463_vm7, %v7012_v53  ;;  %5573 = vmatmul.msk.f32.vlgmr.msra.gmra.mxu3 %vm463_vm7, %v7012_v53  ;;  %v1290_v40 = vpop.permute.xlu0 %1289  ;;  %v781_v53 = vsel %vm8802_vm9, %v6019_v43, %v6023_v6  ;;  %v6042_v43 = vpop.permute.xlu2 %6041 }
 0x159   : > { %675 = vmatpush.msrb.mxu2 %v599_v29  ;;  %698 = vmatpush.msrb.mxu3 %v600_v34  ;;  %v1293_v41 = vsel %vm8799_vm5, %v6974_v24, %v1290_v40  ;;  %v1303_v39 = vmul.f32 %v1290_v40, %v6863_v38  ;;  %v7164_v24 = vld [vmem:[%s8782_s1 + $0x28] sm:$0xff]  ;;  %v1308_v0 = vmul.f32 %v1290_v40, %v6901_v1  ;;  %v6044_v61 = vunpack.i.h.bf16 %v6042_v43  ;;  %v6067_v33 = vpop.permute.xlu1 %6066 }
 0x15a   : > { %v1302_v52 = vmul.f32 %v1293_v41, %v6893_v58  ;;  %5587 = vmatmul.msk.f32.gmra.mxu0 %vm463_vm7, %v7164_v24  ;;  %v1307_v46 = vmul.f32 %v1293_v41, %v6904_v2  ;;  %v6043_v9 = vunpack.i.l.bf16 %v6042_v43  ;;  %v6069_v57 = vunpack.i.h.bf16 %v6067_v33 }
 0x15b   : > { %676 = vmatpush.msrb.mxu2 %v595_v51  ;;  %699 = vmatpush.msrb.mxu3 %v596_v18  ;;  %v6075_v59 = vpack.i.bf16 %v6980_v31, %v1303_v39  ;;  %v6033_v31 = vunpack.i.l.bf16 %v7119_v11  ;;  %v6059_v11 = vunpack.i.h.bf16 %v7111_v42 }
 0x15c   : > { %v6070_v26 = vpack.i.bf16 %v1302_v52, %v1301_v32  ;;  %v971_v12 = vsel %vm8799_vm5, %v6039_v37, %v6043_v9  ;;  %v972_v13 = vsel %vm8799_vm5, %v6043_v9, %v6044_v61 }
 0x15d   : > { %857 = vmatpush.msra.mxu2 %v781_v53  ;;  %880 = vmatpush.msra.mxu3 %v782_v8  ;;  %v966_v62 = vsel %vm8799_vm5, %v6029_v22, %v6033_v31  ;;  %v5958_v22 = vunpack.i.l.bf16 %v7068_v16  ;;  %v1470_v16 = vperm.slane %v7085_v27, 3  ;;  %v967_v50 = vsel %vm8799_vm5, %v6033_v31, %v6034_v17 }
 0x15e   : > { %6076 = vrot.lane.b32.xlu0 %v6075_v59, %s8793_s24  ;;  %5577 = vmatmul.msk.f32.vlgmr.msrb.gmra.mxu1 %vm463_vm7, %v7037_v3  ;;  %v1159_v45 = vsel %vm1102_vm4, %v6058_v5, %v6059_v11  ;;  %v5963_v5 = vunpack.i.l.bf16 %v7074_v19  ;;  %v6068_v8 = vunpack.i.l.bf16 %v6067_v33 }
 0x15f   : > { %858 = vmatpush.msra.mxu2 %v777_v49  ;;  %881 = vmatpush.msra.mxu3 %v778_v60  ;;  %v968_v21 = vsel %vm8799_vm5, %v6034_v17, %v5958_v22  ;;  %vm2613_vm5 = vcmask 1039360  }
 0x160   : > { %1024 = vmatpush.msrb.mxu1 %v970_v54  ;;  %6071 = vrot.lane.b32.xlu2 %v6070_v26, %s8793_s24  ;;  %v6052_v10 = vpop.permute.xlu2 %6051  ;;  %v1342_v43 = vsel %vm912_vm3, %v6068_v8, %v6069_v57 }
 0x161   : > { %5572 = vmatmul.msk.f32.gmra.mxu2 %vm463_vm7, %v7021_v55  ;;  %5574 = vmatmul.msk.f32.gmra.mxu3 %vm463_vm7, %v7021_v55  ;;  %v6085_v55 = vpack.i.bf16 %v1308_v0, %v1307_v46  ;;  %v6054_v15 = vunpack.i.h.bf16 %v6052_v10 }
 0x162   : > { %1025 = vmatpush.msrb.mxu1 %v966_v62  ;;  %5597 = vmatmul.msk.f32.vlgmr.msrb.gmra.mxu0 %vm463_vm7, %v5595_v4 }
 0x163   : > { %v1157_v29 = vsel %vm1102_vm4, %v6054_v15, %v5963_v5 }
 0x166   : > { %1471 = vrot.lane.b32.xlu0 %v1467_v20, %s8789_s7  ;;  %5578 = vmatmul.msk.f32.gmra.mxu1 %vm463_vm7, %v7047_v7 }
 0x168   : > { %6086 = vrot.lane.b32.xlu2 %v6085_v55, %s8793_s24  ;;  %v6062_v25 = vpop.permute.xlu2 %6061  ;;  %s6712_s24 = smov 7  }
 0x169   : > { %5579 = vmatmul.msk.f32.vlgmr.msrb.gmra.mxu2 %vm463_vm7, %v7037_v3  ;;  %5581 = vmatmul.msk.f32.vlgmr.msrb.gmra.mxu3 %vm463_vm7, %v7037_v3  ;;  %v6053_v3 = vunpack.i.l.bf16 %v6052_v10  ;;  %v6064_v47 = vunpack.i.h.bf16 %v6062_v25  ;;  %v6063_v42 = vunpack.i.l.bf16 %v6062_v25 }
 0x16a   : > { %1047 = vmatpush.msrb.mxu2 %v971_v12  ;;  %1070 = vmatpush.msrb.mxu3 %v972_v13 }
 0x16b   : > { %v1155_v27 = vsel %vm1102_vm4, %v6049_v63, %v6053_v3  ;;  %v1161_v35 = vsel %vm1102_vm4, %v6063_v42, %v6064_v47  ;;  %v6082_v63 = vpop.permute.xlu1 %6081  ;;  %v1156_v19 = vsel %vm1102_vm4, %v6053_v3, %v6054_v15  ;;  %v5596_v47 = vld [vmem:[%s8782_s1 + $0x38] sm:$0xff] }
 0x16c   : > { %1048 = vmatpush.msrb.mxu2 %v967_v50  ;;  %1071 = vmatpush.msrb.mxu3 %v968_v21  ;;  %v6084_v28 = vunpack.i.h.bf16 %v6082_v63  ;;  %v6083_v6 = vunpack.i.l.bf16 %v6082_v63  ;;  %v5638_v50 = vld [vmem:[%s8783_s2 + $0x1c] sm:$0xf] }
 0x16d   : > { %v1655_v3 = vperm.slane %v5638_v50, 0  ;;  %v1657_v25 = vperm.slane %v5638_v50, 2  ;;  %5598 = vmatmul.msk.f32.gmra.mxu0 %vm463_vm7, %v5596_v47 }
 0x16e   : > { %1477 = vrot.lane.b32.xlu0 %v1470_v16, %s8789_s7  ;;  %5588 = vmatmul.msk.f32.vlgmr.msra.gmra.mxu1 %vm463_vm7, %v7061_v14  ;;  %v1347_v32 = vsel %vm912_vm3, %v6083_v6, %v6084_v28 }
 0x16f   : > { %1213 = vmatpush.msra.mxu1 %v1159_v45  ;;  %v1656_v45 = vperm.slane %v5638_v50, 1 }
 0x170   : > { %1475 = vrot.lane.b32.xlu2 %v1469_v23, %s8789_s7  ;;  %s8808_s7 = smov 72  }
 0x171   : > { %5580 = vmatmul.msk.f32.gmra.mxu2 %vm463_vm7, %v7047_v7  ;;  %5582 = vmatmul.msk.f32.gmra.mxu3 %vm463_vm7, %v7047_v7  ;;  %v1160_v7 = vsel %vm1102_vm4, %v6059_v11, %v6063_v42  ;;  %v5606_v42 = vld [vmem:[%s8782_s1 + $0x40] sm:$0xff] }
 0x172   : > { %1214 = vmatpush.msra.mxu1 %v1155_v27  ;;  %v1658_v27 = vperm.slane %v5638_v50, 3 }
 0x173   : > { %v1474_v60 = vpop.permute.xlu1 %1473 }
 0x175   : > { %5608 = vmatmul.msk.f32.vlgmr.msra.gmra.mxu0 %vm463_vm7, %v5606_v42 }
 0x176   : > { %5589 = vmatmul.msk.f32.gmra.mxu1 %vm463_vm7, %v7164_v24 }
 0x179   : > { %5590 = vmatmul.msk.f32.vlgmr.msra.gmra.mxu2 %vm463_vm7, %v7061_v14  ;;  %5592 = vmatmul.msk.f32.vlgmr.msra.gmra.mxu3 %vm463_vm7, %v7061_v14 }
 0x17a   : > { %1236 = vmatpush.msra.mxu2 %v1160_v7  ;;  %1259 = vmatpush.msra.mxu3 %v1161_v35 }
 0x17c   : > { %1237 = vmatpush.msra.mxu2 %v1156_v19  ;;  %1260 = vmatpush.msra.mxu3 %v1157_v29 }
 0x17e   : > { %5599 = vmatmul.msk.f32.vlgmr.msrb.gmra.mxu1 %vm463_vm7, %v5595_v4 }
 0x17f   : > { %1401 = vmatpush.msrb.mxu1 %v1347_v32 }
 0x181   : > { %5591 = vmatmul.msk.f32.gmra.mxu2 %vm463_vm7, %v7164_v24  ;;  %5593 = vmatmul.msk.f32.gmra.mxu3 %vm463_vm7, %v7164_v24 }
 0x186   : > { %5600 = vmatmul.msk.f32.gmra.mxu1 %vm463_vm7, %v5596_v47 }
 0x189   : > { %5601 = vmatmul.msk.f32.vlgmr.msrb.gmra.mxu2 %vm463_vm7, %v5595_v4  ;;  %5603 = vmatmul.msk.f32.vlgmr.msrb.gmra.mxu3 %vm463_vm7, %v5595_v4 }
 0x18e   : > { %5610 = vmatmul.msk.f32.vlgmr.msra.gmra.mxu1 %vm463_vm7, %v5606_v42 }
 0x191   : > { %5604 = vmatmul.msk.f32.gmra.mxu3 %vm463_vm7, %v5596_v47  ;;  %5602 = vmatmul.msk.f32.gmra.mxu2 %vm463_vm7, %v5596_v47 }
 0x199   : > { %5614 = vmatmul.msk.f32.vlgmr.msra.gmra.mxu3 %vm463_vm7, %v5606_v42  ;;  %5612 = vmatmul.msk.f32.vlgmr.msra.gmra.mxu2 %vm463_vm7, %v5606_v42 }
 0x1ba   : > { %v6072_v14 = vpop.permute.xlu2 %6071 }
 0x1bb   : > { %v6073_v34 = vunpack.i.l.bf16 %v6072_v14  ;;  %v6074_v41 = vunpack.i.h.bf16 %v6072_v14 }
 0x1bd   : > { %v1343_v40 = vsel %vm912_vm3, %v6069_v57, %v6073_v34  ;;  %v1344_v53 = vsel %vm912_vm3, %v6073_v34, %v6074_v41 }
 0x1be   : > { %1402 = vmatpush.msrb.mxu1 %v1343_v40 }
 0x1c2   : > { %v6087_v36 = vpop.permute.xlu2 %6086 }
 0x1c3   : > { %v6089_v39 = vunpack.i.h.bf16 %v6087_v36  ;;  %v6088_v51 = vunpack.i.l.bf16 %v6087_v36 }
 0x1c5   : > { %v1348_v37 = vsel %vm912_vm3, %v6084_v28, %v6088_v51  ;;  %v1349_v18 = vsel %vm912_vm3, %v6088_v51, %v6089_v39 }
 0x1c6   : > { %1424 = vmatpush.msrb.mxu2 %v1348_v37  ;;  %1447 = vmatpush.msrb.mxu3 %v1349_v18 }
 0x1c8   : > { %1425 = vmatpush.msrb.mxu2 %v1344_v53 }
 0x1ca   : > { %v1476_v0 = vpop.permute.xlu2 %1475 }
 0x1cb   : > { %v1480_v4 = vsel %vm8802_vm9, %v1474_v60, %v1476_v0 }
 0x1cc   : > { %v1494_v9 = vmul.f32 %v1480_v4, %v6876_v48  ;;  %v1489_v10 = vmul.f32 %v1480_v4, %v6889_v56 }
 0x1d0   : > { %v6077_v52 = vpop.permute.xlu0 %6076 }
 0x1d1   : > { %v6079_v59 = vunpack.i.h.bf16 %v6077_v52  ;;  %v6078_v24 = vunpack.i.l.bf16 %v6077_v52 }
 0x1d3   : > { %v1346_v49 = vsel %vm912_vm3, %v6079_v59, %v6083_v6  ;;  %v1345_v26 = vsel %vm912_vm3, %v6074_v41, %v6078_v24 }
 0x1d4   : > { %1378 = vmatpush.msrb.mxu0 %v1346_v49  ;;  %1448 = vmatpush.msrb.mxu3 %v1345_v26 }
 0x1d6   : > { %1379 = vmatpush.msrb.mxu0 %v1342_v43 }
 0x1d8   : > { %v1472_v31 = vpop.permute.xlu0 %1471 }
 0x1d9   : > { %v1487_v54 = vmul.f32 0.0, %v1472_v31  ;;  %v1479_v62 = vsel %vm8802_vm9, %v1472_v31, %v1474_v60 }
 0x1da   : > { %v1488_v20 = vmul.f32 %v1479_v62, %v6857_v30  ;;  %v1493_v61 = vmul.f32 %v1479_v62, %v6868_v44 }
 0x1dc   : > { %v6090_v46 = vpack.i.bf16 %v1488_v20, %v1487_v54  ;;  %v6105_v11 = vpack.i.bf16 %v1494_v9, %v1493_v61 }
 0x1de   : > { %6091 = vrot.lane.b32.xlu1 %v6090_v46, %s8795_s15 }
 0x1e0   : > { %v1478_v55 = vpop.permute.xlu0 %1477 }
 0x1e1   : > { %v1481_v17 = vsel %vm8802_vm9, %v1476_v0, %v1478_v55  ;;  %v1491_v22 = vmul.f32 %v1478_v55, %v6863_v38  ;;  %v1496_v21 = vmul.f32 %v1478_v55, %v6901_v1  ;;  %vm2665_vm9 = vcmask 7168  }
 0x1e2   : > { %v1490_v12 = vmul.f32 %v1481_v17, %v6893_v58  ;;  %v1495_v23 = vmul.f32 %v1481_v17, %v6904_v2 }
 0x1e3   : > { %v6100_v13 = vpack.i.bf16 %v1487_v54, %v1491_v22 }
 0x1e4   : > { %v6095_v16 = vpack.i.bf16 %v1490_v12, %v1489_v10  ;;  %v6110_v33 = vpack.i.bf16 %v1496_v21, %v1495_v23 }
 0x1e5   : > { %6101 = vrot.lane.b32.xlu0 %v6100_v13, %s8795_s15 }
 0x1e6   : > { %6096 = vrot.lane.b32.xlu2 %v6095_v16, %s8795_s15  ;;  %6106 = vrot.lane.b32.xlu1 %v6105_v11, %s8795_s15 }
 0x1ed   : > { %1659 = vrot.lane.b32.xlu0 %v1655_v3, %s8797_s25 }
 0x1ee   : > { %6111 = vrot.lane.b32.xlu2 %v6110_v33, %s8795_s15  ;;  %1661 = vrot.lane.b32.xlu1 %v1656_v45, %s8797_s25  ;;  %s6714_s15 = smov 1  }
 0x1f5   : > { %1665 = vrot.lane.b32.xlu0 %v1658_v27, %s8797_s25 }
 0x1f6   : > { %1663 = vrot.lane.b32.xlu2 %v1657_v25, %s8797_s25  ;;  %s8838_s25 = smov 65  }
 0x240   : > { %v6097_v15 = vpop.permute.xlu2 %6096 }
 0x241   : > { %v6099_v19 = vunpack.i.h.bf16 %v6097_v15  ;;  %v6098_v41 = vunpack.i.l.bf16 %v6097_v15 }
 0x243   : > { %v1532_v8 = vsel %vm722_vm2, %v6098_v41, %v6099_v19 }
 0x248   : > { %v6112_v5 = vpop.permute.xlu2 %6111 }
 0x249   : > { %v6114_v7 = vunpack.i.h.bf16 %v6112_v5  ;;  %v6113_v35 = vunpack.i.l.bf16 %v6112_v5 }
 0x24b   : > { %v1537_v63 = vsel %vm722_vm2, %v6113_v35, %v6114_v7 }
 0x24c   : > { %1635 = vmatpush.msra.mxu3 %v1537_v63 }
 0x250   : > { %v6092_v28 = vpop.permute.xlu1 %6091  ;;  %v1664_v43 = vpop.permute.xlu2 %1663 }
 0x251   : > { %v6094_v57 = vunpack.i.h.bf16 %v6092_v28  ;;  %v6093_v34 = vunpack.i.l.bf16 %v6092_v28 }
 0x253   : > { %v1530_v53 = vsel %vm722_vm2, %v6093_v34, %v6094_v57  ;;  %v1531_v52 = vsel %vm722_vm2, %v6094_v57, %v6098_v41  ;;  %v7341_v41 = vld [vmem:[%s6853_s17] sm:$0xff] }
 0x257   : > { %v6102_v6 = vpop.permute.xlu0 %6101 }
 0x258   : > { %v6104_v29 = vunpack.i.h.bf16 %v6102_v6  ;;  %v6103_v32 = vunpack.i.l.bf16 %v6102_v6  ;;  %v6107_v14 = vpop.permute.xlu1 %6106 }
 0x259   : > { %v6109_v40 = vunpack.i.h.bf16 %v6107_v14  ;;  %v6108_v36 = vunpack.i.l.bf16 %v6107_v14 }
 0x25a   : > { %v1533_v39 = vsel %vm722_vm2, %v6099_v19, %v6103_v32 }
 0x25b   : > { %1636 = vmatpush.msra.mxu3 %v1533_v39  ;;  %v1534_v51 = vsel %vm722_vm2, %v6104_v29, %v6108_v36  ;;  %v1535_v37 = vsel %vm722_vm2, %v6108_v36, %v6109_v40  ;;  %v1536_v18 = vsel %vm722_vm2, %v6109_v40, %v6113_v35 }
 0x25c   : > { %1566 = vmatpush.msra.mxu0 %v1534_v51  ;;  %1589 = vmatpush.msra.mxu1 %v1535_v37 }
 0x25d   : > { %1612 = vmatpush.msra.mxu2 %v1536_v18 }
 0x25e   : > { %1567 = vmatpush.msra.mxu0 %v1530_v53  ;;  %1590 = vmatpush.msra.mxu1 %v1531_v52  ;;  %v7348_v52 = vld [vmem:[%s6853_s17 + $0x18] sm:$0xff] }
 0x25f   : > { %1613 = vmatpush.msra.mxu2 %v1532_v8  ;;  %v1660_v59 = vpop.permute.xlu0 %1659 }
 0x260   : > { %v1675_v24 = vmul.f32 0.0, %v1660_v59  ;;  %v1662_v49 = vpop.permute.xlu1 %1661 }
 0x261   : > { %v1667_v26 = vsel %vm446_vm6, %v1660_v59, %v1662_v49  ;;  %v1668_v54 = vsel %vm446_vm6, %v1662_v49, %v1664_v43  ;;  %v7352_v59 = vld [vmem:[%s6853_s17 + $0x8] sm:$0xff]  ;;  %v7356_v49 = vld [vmem:[%s6853_s17 + $0x20] sm:$0xff] }
 0x262   : > { %v1676_v60 = vmul.f32 %v1667_v26, %v6857_v30  ;;  %v1681_v0 = vmul.f32 %v1667_v26, %v6868_v44  ;;  %v1682_v20 = vmul.f32 %v1668_v54, %v6876_v48  ;;  %v1677_v61 = vmul.f32 %v1668_v54, %v6889_v56  ;;  %v5649_v44 = vld [vmem:[%s8783_s2 + $0x20] sm:$0xf] }
 0x263   : > { %v1843_v56 = vperm.slane %v5649_v44, 0  ;;  %v1844_v22 = vperm.slane %v5649_v44, 1  ;;  %v1846_v10 = vperm.slane %v5649_v44, 3  ;;  %v1845_v12 = vperm.slane %v5649_v44, 2 }
 0x264   : > { %v6115_v31 = vpack.i.bf16 %v1676_v60, %v1675_v24  ;;  %v6130_v17 = vpack.i.bf16 %v1682_v20, %v1681_v0 }
 0x266   : > { %6116 = vrot.lane.b32.xlu1 %v6115_v31, %s8800_s12  ;;  %v7364_v31 = vld [vmem:[%s6853_s17 + $0x10] sm:$0xff] }
 0x267   : > { %v1666_v62 = vpop.permute.xlu0 %1665 }
 0x268   : > { %v1669_v46 = vsel %vm446_vm6, %v1664_v43, %v1666_v62  ;;  %v1679_v4 = vmul.f32 %v1666_v62, %v6863_v38  ;;  %v1684_v48 = vmul.f32 %v1666_v62, %v6901_v1  ;;  %v5607_v1 = vld [vmem:[%s8782_s1 + $0x48] sm:$0xff] }
 0x269   : > { %v1678_v9 = vmul.f32 %v1669_v46, %v6893_v58  ;;  %v1683_v38 = vmul.f32 %v1669_v46, %v6904_v2  ;;  %5615 = vmatmul.msk.f32.gmra.mxu3 %vm463_vm7, %v5607_v1  ;;  %5609 = vmatmul.msk.f32.gmra.mxu0 %vm463_vm7, %v5607_v1  ;;  %v5617_v2 = vld [vmem:[%s8782_s1 + $0x50] sm:$0xff]  ;;  %v7360_v43 = vld [vmem:[%s6853_s17 + $0x28] sm:$0xff]  ;;  %v5660_v46 = vld [vmem:[%s8783_s2 + $0x24] sm:$0xf] }
 0x26a   : > { %v6125_v55 = vpack.i.bf16 %v1675_v24, %v1679_v4  ;;  %5611 = vmatmul.msk.f32.gmra.mxu1 %vm463_vm7, %v5607_v1  ;;  %5613 = vmatmul.msk.f32.gmra.mxu2 %vm463_vm7, %v5607_v1  ;;  %v7373_v4 = vld [vmem:[%s6853_s17 + $0x38] sm:$0xff]  ;;  %v2032_v44 = vperm.slane %v5660_v46, 1 }
 0x26b   : > { %v6120_v30 = vpack.i.bf16 %v1678_v9, %v1677_v61  ;;  %v6135_v58 = vpack.i.bf16 %v1684_v48, %v1683_v38  ;;  %v7378_v9 = vld [vmem:[%s6853_s17 + $0x30] sm:$0xff]  ;;  %v2034_v48 = vperm.slane %v5660_v46, 3  ;;  %v2033_v38 = vperm.slane %v5660_v46, 2 }
 0x26c   : > { %6126 = vrot.lane.b32.xlu0 %v6125_v55, %s8800_s12 }
 0x26d   : > { %6121 = vrot.lane.b32.xlu2 %v6120_v30, %s8800_s12  ;;  %v2031_v30 = vperm.slane %v5660_v46, 0 }
 0x26e   : > { %6131 = vrot.lane.b32.xlu1 %v6130_v17, %s8800_s12 }
 0x271   : > { %5625 = vmatmul.msk.f32.vlgmr.msrb.gmra.mxu3 %vm463_vm7, %v5617_v2  ;;  %5619 = vmatmul.msk.f32.vlgmr.msrb.gmra.mxu0 %vm463_vm7, %v5617_v2 }
 0x272   : > { %5621 = vmatmul.msk.f32.vlgmr.msrb.gmra.mxu1 %vm463_vm7, %v5617_v2  ;;  %5623 = vmatmul.msk.f32.vlgmr.msrb.gmra.mxu2 %vm463_vm7, %v5617_v2 }
 0x274   : > { %1847 = vrot.lane.b32.xlu0 %v1843_v56, %s6705_s27  ;;  %v5618_v56 = vld [vmem:[%s8782_s1 + $0x58] sm:$0xff] }
 0x275   : > { %6136 = vrot.lane.b32.xlu2 %v6135_v58, %s8800_s12  ;;  %s8833_s12 = smov 71  }
 0x276   : > { %1849 = vrot.lane.b32.xlu1 %v1844_v22, %s6705_s27  ;;  %v5628_v22 = vld [vmem:[%s8782_s1 + $0x60] sm:$0xff] }
 0x279   : > { %5626 = vmatmul.msk.f32.gmra.mxu3 %vm463_vm7, %v5618_v56  ;;  %5620 = vmatmul.msk.f32.gmra.mxu0 %vm463_vm7, %v5618_v56 }
 0x27a   : > { %5622 = vmatmul.msk.f32.gmra.mxu1 %vm463_vm7, %v5618_v56  ;;  %5624 = vmatmul.msk.f32.gmra.mxu2 %vm463_vm7, %v5618_v56 }
 0x27c   : > { %1853 = vrot.lane.b32.xlu0 %v1846_v10, %s6705_s27 }
 0x27d   : > { %1851 = vrot.lane.b32.xlu2 %v1845_v12, %s6705_s27 }
 0x281   : > { %5636 = vmatmul.msk.f32.vlgmr.msra.gmra.mxu3 %vm463_vm7, %v5628_v22  ;;  %5630 = vmatmul.msk.f32.vlgmr.msra.gmra.mxu0 %vm463_vm7, %v5628_v22 }
 0x282   : > { %5632 = vmatmul.msk.f32.vlgmr.msra.gmra.mxu1 %vm463_vm7, %v5628_v22  ;;  %5634 = vmatmul.msk.f32.vlgmr.msra.gmra.mxu2 %vm463_vm7, %v5628_v22 }
 0x2c7   : > { %v6122_v13 = vpop.permute.xlu2 %6121 }
 0x2c8   : > { %v6124_v45 = vunpack.i.h.bf16 %v6122_v13  ;;  %v6123_v35 = vunpack.i.l.bf16 %v6122_v13 }
 0x2ca   : > { %v1720_v14 = vsel %vm394_vm0, %v6123_v35, %v6124_v45 }
 0x2cf   : > { %v6137_v16 = vpop.permute.xlu2 %6136 }
 0x2d0   : > { %v6139_v11 = vunpack.i.h.bf16 %v6137_v16  ;;  %v6138_v50 = vunpack.i.l.bf16 %v6137_v16 }
 0x2d2   : > { %v1725_v21 = vsel %vm394_vm0, %v6138_v50, %v6139_v11 }
 0x2d3   : > { %1823 = vmatpush.msrb.mxu3 %v1725_v21 }
 0x2d7   : > { %v1852_v36 = vpop.permute.xlu2 %1851 }
 0x2d8   : > { %v6117_v23 = vpop.permute.xlu1 %6116 }
 0x2d9   : > { %v6119_v27 = vunpack.i.h.bf16 %v6117_v23  ;;  %v6118_v25 = vunpack.i.l.bf16 %v6117_v23 }
 0x2db   : > { %v1718_v19 = vsel %vm394_vm0, %v6118_v25, %v6119_v27  ;;  %v1719_v29 = vsel %vm394_vm0, %v6119_v27, %v6123_v35 }
 0x2de   : > { %v6127_v3 = vpop.permute.xlu0 %6126 }
 0x2df   : > { %v6128_v33 = vunpack.i.l.bf16 %v6127_v3  ;;  %v6129_v42 = vunpack.i.h.bf16 %v6127_v3 }
 0x2e0   : > { %v6132_v47 = vpop.permute.xlu1 %6131 }
 0x2e1   : > { %v6134_v15 = vunpack.i.h.bf16 %v6132_v47  ;;  %v6133_v5 = vunpack.i.l.bf16 %v6132_v47  ;;  %v1721_v7 = vsel %vm394_vm0, %v6124_v45, %v6128_v33 }
 0x2e2   : > { %1824 = vmatpush.msrb.mxu3 %v1721_v7 }
 0x2e3   : > { %v1722_v63 = vsel %vm394_vm0, %v6129_v42, %v6133_v5  ;;  %v1723_v28 = vsel %vm394_vm0, %v6133_v5, %v6134_v15  ;;  %v1724_v6 = vsel %vm394_vm0, %v6134_v15, %v6138_v50 }
 0x2e4   : > { %1754 = vmatpush.msrb.mxu0 %v1722_v63  ;;  %1777 = vmatpush.msrb.mxu1 %v1723_v28 }
 0x2e5   : > { %1800 = vmatpush.msrb.mxu2 %v1724_v6 }
 0x2e6   : > { %v1848_v32 = vpop.permute.xlu0 %1847  ;;  %1755 = vmatpush.msrb.mxu0 %v1718_v19  ;;  %1778 = vmatpush.msrb.mxu1 %v1719_v29 }
 0x2e7   : > { %1801 = vmatpush.msrb.mxu2 %v1720_v14  ;;  %v1863_v57 = vmul.f32 0.0, %v1848_v32 }
 0x2e8   : > { %v1850_v34 = vpop.permute.xlu1 %1849 }
 0x2e9   : > { %v1855_v40 = vsel %vm592_vm8, %v1848_v32, %v1850_v34  ;;  %v1856_v37 = vsel %vm592_vm8, %v1850_v34, %v1852_v36 }
 0x2ea   : > { %v1864_v39 = vmul.f32 %v7341_v41, %v1855_v40  ;;  %v1865_v24 = vmul.f32 %v7352_v59, %v1856_v37  ;;  %v1869_v26 = vmul.f32 %v7356_v49, %v1855_v40  ;;  %v1870_v60 = vmul.f32 %v7360_v43, %v1856_v37 }
 0x2ec   : > { %v6140_v51 = vpack.i.bf16 %v1864_v39, %v1863_v57  ;;  %v6155_v20 = vpack.i.bf16 %v1870_v60, %v1869_v26  ;;  %v5671_v26 = vld [vmem:[%s8783_s2 + $0x28] sm:$0xf] }
 0x2ed   : > { %v2222_v46 = vperm.slane %v5671_v26, 1 }
 0x2ee   : > { %v1854_v18 = vpop.permute.xlu0 %1853  ;;  %6141 = vrot.lane.b32.xlu1 %v6140_v51, %s6698_s11 }
 0x2ef   : > { %v1857_v53 = vsel %vm592_vm8, %v1852_v36, %v1854_v18  ;;  %v1867_v8 = vmul.f32 %v7348_v52, %v1854_v18  ;;  %v1872_v61 = vmul.f32 %v7373_v4, %v1854_v18 }
 0x2f0   : > { %v1866_v54 = vmul.f32 %v7364_v31, %v1857_v53  ;;  %v1871_v55 = vmul.f32 %v7378_v9, %v1857_v53 }
 0x2f1   : > { %v6150_v62 = vpack.i.bf16 %v1863_v57, %v1867_v8 }
 0x2f2   : > { %v6145_v0 = vpack.i.bf16 %v1866_v54, %v1865_v24  ;;  %v6160_v17 = vpack.i.bf16 %v1872_v61, %v1871_v55  ;;  %v2224_v61 = vperm.slane %v5671_v26, 3  ;;  %v2223_v55 = vperm.slane %v5671_v26, 2 }
 0x2f3   : > { %6151 = vrot.lane.b32.xlu0 %v6150_v62, %s6698_s11 }
 0x2f4   : > { %6146 = vrot.lane.b32.xlu2 %v6145_v0, %s6698_s11  ;;  %v2221_v0 = vperm.slane %v5671_v26, 0 }
 0x2f6   : > { %6156 = vrot.lane.b32.xlu1 %v6155_v20, %s6698_s11 }
 0x2fb   : > { %2035 = vrot.lane.b32.xlu0 %v2031_v30, %s6707_s8  ;;  %v5629_v30 = vld [vmem:[%s8782_s1 + $0x68] sm:$0xff] }
 0x2fc   : > { %6161 = vrot.lane.b32.xlu2 %v6160_v17, %s6698_s11  ;;  %5637 = vmatmul.msk.f32.gmra.mxu3 %vm463_vm7, %v5629_v30  ;;  %v5639_v17 = vld [vmem:[%s8782_s1 + $0x70] sm:$0xff] }
 0x2fd   : > { %5631 = vmatmul.msk.f32.gmra.mxu0 %vm463_vm7, %v5629_v30  ;;  %5633 = vmatmul.msk.f32.gmra.mxu1 %vm463_vm7, %v5629_v30 }
 0x2fe   : > { %2037 = vrot.lane.b32.xlu1 %v2032_v44, %s6707_s8  ;;  %5635 = vmatmul.msk.f32.gmra.mxu2 %vm463_vm7, %v5629_v30 }
 0x303   : > { %2041 = vrot.lane.b32.xlu0 %v2034_v48, %s6707_s8 }
 0x304   : > { %2039 = vrot.lane.b32.xlu2 %v2033_v38, %s6707_s8  ;;  %5647 = vmatmul.msk.f32.vlgmr.msrb.gmra.mxu3 %vm463_vm7, %v5639_v17 }
 0x305   : > { %5641 = vmatmul.msk.f32.vlgmr.msrb.gmra.mxu0 %vm463_vm7, %v5639_v17  ;;  %5643 = vmatmul.msk.f32.vlgmr.msrb.gmra.mxu1 %vm463_vm7, %v5639_v17 }
 0x306   : > { %5645 = vmatmul.msk.f32.vlgmr.msrb.gmra.mxu2 %vm463_vm7, %v5639_v17 }
 0x34e   : > { %v6147_v58 = vpop.permute.xlu2 %6146 }
 0x34f   : > { %v6149_v11 = vunpack.i.h.bf16 %v6147_v58  ;;  %v6148_v47 = vunpack.i.l.bf16 %v6147_v58 }
 0x351   : > { %v1908_v28 = vsel %vm358_vm1, %v6148_v47, %v6149_v11 }
 0x356   : > { %v6162_v10 = vpop.permute.xlu2 %6161 }
 0x357   : > { %v6164_v12 = vunpack.i.h.bf16 %v6162_v10  ;;  %v6163_v1 = vunpack.i.l.bf16 %v6162_v10 }
 0x359   : > { %v1913_v2 = vsel %vm358_vm1, %v6163_v1, %v6164_v12 }
 0x35a   : > { %2011 = vmatpush.msra.mxu3 %v1913_v2 }
 0x35e   : > { %v2040_v29 = vpop.permute.xlu2 %2039 }
 0x360   : > { %v6142_v13 = vpop.permute.xlu1 %6141 }
 0x361   : > { %v6144_v21 = vunpack.i.h.bf16 %v6142_v13  ;;  %v6143_v45 = vunpack.i.l.bf16 %v6142_v13 }
 0x363   : > { %v1906_v35 = vsel %vm358_vm1, %v6143_v45, %v6144_v21  ;;  %v1907_v63 = vsel %vm358_vm1, %v6144_v21, %v6148_v47 }
 0x365   : > { %v6152_v16 = vpop.permute.xlu0 %6151 }
 0x366   : > { %v6153_v50 = vunpack.i.l.bf16 %v6152_v16  ;;  %v6154_v33 = vunpack.i.h.bf16 %v6152_v16 }
 0x368   : > { %v6157_v23 = vpop.permute.xlu1 %6156  ;;  %v1909_v3 = vsel %vm358_vm1, %v6149_v11, %v6153_v50 }
 0x369   : > { %v6159_v27 = vunpack.i.h.bf16 %v6157_v23  ;;  %v6158_v25 = vunpack.i.l.bf16 %v6157_v23  ;;  %2012 = vmatpush.msra.mxu3 %v1909_v3 }
 0x36b   : > { %v1910_v42 = vsel %vm358_vm1, %v6154_v33, %v6158_v25  ;;  %v1911_v15 = vsel %vm358_vm1, %v6158_v25, %v6159_v27  ;;  %v1912_v5 = vsel %vm358_vm1, %v6159_v27, %v6163_v1 }
 0x36c   : > { %1942 = vmatpush.msra.mxu0 %v1910_v42  ;;  %1965 = vmatpush.msra.mxu1 %v1911_v15 }
 0x36d   : > { %1988 = vmatpush.msra.mxu2 %v1912_v5  ;;  %v2036_v7 = vpop.permute.xlu0 %2035 }
 0x36e   : > { %1943 = vmatpush.msra.mxu0 %v1906_v35  ;;  %1966 = vmatpush.msra.mxu1 %v1907_v63  ;;  %v2052_v6 = vmul.f32 0.0, %v2036_v7 }
 0x36f   : > { %1989 = vmatpush.msra.mxu2 %v1908_v28 }
 0x370   : > { %v2038_v19 = vpop.permute.xlu1 %2037 }
 0x371   : > { %v2044_v32 = vsel %vm2043_vm10, %v2036_v7, %v2038_v19  ;;  %v2045_v57 = vsel %vm2043_vm10, %v2038_v19, %v2040_v29 }
 0x372   : > { %v2053_v14 = vmul.f32 %v7341_v41, %v2044_v32  ;;  %v2054_v51 = vmul.f32 %v7352_v59, %v2045_v57  ;;  %v2058_v18 = vmul.f32 %v7356_v49, %v2044_v32  ;;  %v2059_v53 = vmul.f32 %v7360_v43, %v2045_v57 }
 0x374   : > { %v6165_v34 = vpack.i.bf16 %v2053_v14, %v2052_v6  ;;  %v6180_v60 = vpack.i.bf16 %v2059_v53, %v2058_v18 }
 0x375   : > { %v2042_v40 = vpop.permute.xlu0 %2041 }
 0x376   : > { %v2046_v36 = vsel %vm2043_vm10, %v2040_v29, %v2042_v40  ;;  %v2056_v39 = vmul.f32 %v7348_v52, %v2042_v40  ;;  %6166 = vrot.lane.b32.xlu1 %v6165_v34, %s6708_s10  ;;  %v2061_v54 = vmul.f32 %v7373_v4, %v2042_v40 }
 0x377   : > { %v2055_v37 = vmul.f32 %v7364_v31, %v2046_v36  ;;  %v2060_v62 = vmul.f32 %v7378_v9, %v2046_v36 }
 0x378   : > { %v6175_v8 = vpack.i.bf16 %v2052_v6, %v2056_v39 }
 0x379   : > { %v6170_v24 = vpack.i.bf16 %v2055_v37, %v2054_v51  ;;  %v6185_v20 = vpack.i.bf16 %v2061_v54, %v2060_v62  ;;  %v5682_v37 = vld [vmem:[%s8783_s2 + $0x2c] sm:$0xf] }
 0x37a   : > { %6176 = vrot.lane.b32.xlu0 %v6175_v8, %s6708_s10  ;;  %v2414_v54 = vperm.slane %v5682_v37, 3  ;;  %v2413_v62 = vperm.slane %v5682_v37, 2 }
 0x37b   : > { %6171 = vrot.lane.b32.xlu2 %v6170_v24, %s6708_s10  ;;  %v2411_v24 = vperm.slane %v5682_v37, 0 }
 0x37e   : > { %6181 = vrot.lane.b32.xlu1 %v6180_v60, %s6708_s10  ;;  %v2412_v60 = vperm.slane %v5682_v37, 1 }
 0x382   : > { %2225 = vrot.lane.b32.xlu0 %v2221_v0, %s6709_s16  ;;  %v5640_v0 = vld [vmem:[%s8782_s1 + $0x78] sm:$0xff] }
 0x383   : > { %6186 = vrot.lane.b32.xlu2 %v6185_v20, %s6708_s10  ;;  %5648 = vmatmul.msk.f32.gmra.mxu3 %vm463_vm7, %v5640_v0  ;;  %v5650_v20 = vld [vmem:[%s8782_s1 + $0x80] sm:$0xff] }
 0x384   : > { %5642 = vmatmul.msk.f32.gmra.mxu0 %vm463_vm7, %v5640_v0  ;;  %5644 = vmatmul.msk.f32.gmra.mxu1 %vm463_vm7, %v5640_v0 }
 0x385   : > { %5646 = vmatmul.msk.f32.gmra.mxu2 %vm463_vm7, %v5640_v0 }
 0x386   : > { %2227 = vrot.lane.b32.xlu1 %v2222_v46, %s6709_s16 }
 0x38a   : > { %2231 = vrot.lane.b32.xlu0 %v2224_v61, %s6709_s16 }
 0x38b   : > { %2229 = vrot.lane.b32.xlu2 %v2223_v55, %s6709_s16  ;;  %5658 = vmatmul.msk.f32.vlgmr.msra.gmra.mxu3 %vm463_vm7, %v5650_v20 }
 0x38c   : > { %5652 = vmatmul.msk.f32.vlgmr.msra.gmra.mxu0 %vm463_vm7, %v5650_v20  ;;  %5654 = vmatmul.msk.f32.vlgmr.msra.gmra.mxu1 %vm463_vm7, %v5650_v20 }
 0x38d   : > { %5656 = vmatmul.msk.f32.vlgmr.msra.gmra.mxu2 %vm463_vm7, %v5650_v20 }
 0x3d5   : > { %v6172_v44 = vpop.permute.xlu2 %6171 }
 0x3d6   : > { %v6174_v12 = vunpack.i.h.bf16 %v6172_v44  ;;  %v6173_v3 = vunpack.i.l.bf16 %v6172_v44 }
 0x3d8   : > { %v2098_v15 = vsel %vm2095_vm11, %v6173_v3, %v6174_v12 }
 0x3dd   : > { %v6187_v48 = vpop.permute.xlu2 %6186 }
 0x3de   : > { %v6189_v38 = vunpack.i.h.bf16 %v6187_v48  ;;  %v6188_v56 = vunpack.i.l.bf16 %v6187_v48 }
 0x3e0   : > { %v2103_v22 = vsel %vm2095_vm11, %v6188_v56, %v6189_v38 }
 0x3e1   : > { %2201 = vmatpush.msrb.mxu3 %v2103_v22 }
 0x3e5   : > { %v2230_v7 = vpop.permute.xlu2 %2229 }
 0x3e8   : > { %v6167_v58 = vpop.permute.xlu1 %6166 }
 0x3e9   : > { %v6169_v13 = vunpack.i.h.bf16 %v6167_v58  ;;  %v6168_v11 = vunpack.i.l.bf16 %v6167_v58 }
 0x3eb   : > { %v2096_v47 = vsel %vm2095_vm11, %v6168_v11, %v6169_v13  ;;  %v2097_v42 = vsel %vm2095_vm11, %v6169_v13, %v6173_v3 }
 0x3ec   : > { %v6177_v10 = vpop.permute.xlu0 %6176 }
 0x3ed   : > { %v6178_v1 = vunpack.i.l.bf16 %v6177_v10  ;;  %v6179_v50 = vunpack.i.h.bf16 %v6177_v10 }
 0x3ef   : > { %v2099_v2 = vsel %vm2095_vm11, %v6174_v12, %v6178_v1 }
 0x3f0   : > { %2202 = vmatpush.msrb.mxu3 %v2099_v2  ;;  %v6182_v16 = vpop.permute.xlu1 %6181 }
 0x3f1   : > { %v6184_v21 = vunpack.i.h.bf16 %v6182_v16  ;;  %v6183_v23 = vunpack.i.l.bf16 %v6182_v16 }
 0x3f3   : > { %v2100_v45 = vsel %vm2095_vm11, %v6179_v50, %v6183_v23  ;;  %v2101_v33 = vsel %vm2095_vm11, %v6183_v23, %v6184_v21  ;;  %v2102_v27 = vsel %vm2095_vm11, %v6184_v21, %v6188_v56 }
 0x3f4   : > { %v2226_v25 = vpop.permute.xlu0 %2225  ;;  %2132 = vmatpush.msrb.mxu0 %v2100_v45  ;;  %2155 = vmatpush.msrb.mxu1 %v2101_v33 }
 0x3f5   : > { %2178 = vmatpush.msrb.mxu2 %v2102_v27  ;;  %v2242_v5 = vmul.f32 0.0, %v2226_v25 }
 0x3f6   : > { %2133 = vmatpush.msrb.mxu0 %v2096_v47  ;;  %2156 = vmatpush.msrb.mxu1 %v2097_v42 }
 0x3f7   : > { %2179 = vmatpush.msrb.mxu2 %v2098_v15 }
 0x3f8   : > { %v2228_v35 = vpop.permute.xlu1 %2227 }
 0x3f9   : > { %v2234_v63 = vsel %vm2233_vm12, %v2226_v25, %v2228_v35  ;;  %v2235_v6 = vsel %vm2233_vm12, %v2228_v35, %v2230_v7 }
 0x3fa   : > { %v2243_v28 = vmul.f32 %v7341_v41, %v2234_v63  ;;  %v2244_v57 = vmul.f32 %v7352_v59, %v2235_v6  ;;  %v2248_v36 = vmul.f32 %v7356_v49, %v2234_v63  ;;  %v2249_v39 = vmul.f32 %v7360_v43, %v2235_v6 }
 0x3fc   : > { %v2232_v19 = vpop.permute.xlu0 %2231  ;;  %v6190_v29 = vpack.i.bf16 %v2243_v28, %v2242_v5  ;;  %v6205_v8 = vpack.i.bf16 %v2249_v39, %v2248_v36 }
 0x3fd   : > { %v2236_v32 = vsel %vm2233_vm12, %v2230_v7, %v2232_v19  ;;  %v2246_v14 = vmul.f32 %v7348_v52, %v2232_v19  ;;  %v2251_v53 = vmul.f32 %v7373_v4, %v2232_v19 }
 0x3fe   : > { %v2245_v34 = vmul.f32 %v7364_v31, %v2236_v32  ;;  %6191 = vrot.lane.b32.xlu1 %v6190_v29, %s6710_s9  ;;  %v2250_v18 = vmul.f32 %v7378_v9, %v2236_v32 }
 0x3ff   : > { %v6200_v40 = vpack.i.bf16 %v2242_v5, %v2246_v14 }
 0x400   : > { %v6195_v51 = vpack.i.bf16 %v2245_v34, %v2244_v57  ;;  %v6210_v26 = vpack.i.bf16 %v2251_v53, %v2250_v18  ;;  %v5693_v34 = vld [vmem:[%s8783_s2 + $0x30] sm:$0xf] }
 0x401   : > { %6201 = vrot.lane.b32.xlu0 %v6200_v40, %s6710_s9  ;;  %v2602_v18 = vperm.slane %v5693_v34, 1  ;;  %v2604_v53 = vperm.slane %v5693_v34, 3 }
 0x402   : > { %6196 = vrot.lane.b32.xlu2 %v6195_v51, %s6710_s9  ;;  %v2601_v51 = vperm.slane %v5693_v34, 0 }
 0x406   : > { %6206 = vrot.lane.b32.xlu1 %v6205_v8, %s6710_s9  ;;  %v2603_v8 = vperm.slane %v5693_v34, 2 }
 0x409   : > { %2415 = vrot.lane.b32.xlu0 %v2411_v24, %s6711_s14  ;;  %v5651_v24 = vld [vmem:[%s8782_s1 + $0x88] sm:$0xff] }
 0x40a   : > { %6211 = vrot.lane.b32.xlu2 %v6210_v26, %s6710_s9  ;;  %5659 = vmatmul.msk.f32.gmra.mxu3 %vm463_vm7, %v5651_v24  ;;  %v5661_v26 = vld [vmem:[%s8782_s1 + $0x90] sm:$0xff] }
 0x40b   : > { %5653 = vmatmul.msk.f32.gmra.mxu0 %vm463_vm7, %v5651_v24  ;;  %5655 = vmatmul.msk.f32.gmra.mxu1 %vm463_vm7, %v5651_v24 }
 0x40c   : > { %5657 = vmatmul.msk.f32.gmra.mxu2 %vm463_vm7, %v5651_v24 }
 0x40e   : > { %2417 = vrot.lane.b32.xlu1 %v2412_v60, %s6711_s14 }
 0x411   : > { %2421 = vrot.lane.b32.xlu0 %v2414_v54, %s6711_s14 }
 0x412   : > { %2419 = vrot.lane.b32.xlu2 %v2413_v62, %s6711_s14  ;;  %5669 = vmatmul.msk.f32.vlgmr.msrb.gmra.mxu3 %vm463_vm7, %v5661_v26 }
 0x413   : > { %5663 = vmatmul.msk.f32.vlgmr.msrb.gmra.mxu0 %vm463_vm7, %v5661_v26  ;;  %5665 = vmatmul.msk.f32.vlgmr.msrb.gmra.mxu1 %vm463_vm7, %v5661_v26 }
 0x414   : > { %5667 = vmatmul.msk.f32.vlgmr.msrb.gmra.mxu2 %vm463_vm7, %v5661_v26 }
 0x45c   : > { %v6197_v46 = vpop.permute.xlu2 %6196 }
 0x45d   : > { %v6199_v38 = vunpack.i.h.bf16 %v6197_v46  ;;  %v6198_v16 = vunpack.i.l.bf16 %v6197_v46 }
 0x45f   : > { %v2288_v33 = vsel %vm2285_vm13, %v6198_v16, %v6199_v38 }
 0x464   : > { %v6212_v61 = vpop.permute.xlu2 %6211 }
 0x465   : > { %v6214_v55 = vunpack.i.h.bf16 %v6212_v61  ;;  %v6213_v30 = vunpack.i.l.bf16 %v6212_v61 }
 0x467   : > { %v2293_v17 = vsel %vm2285_vm13, %v6213_v30, %v6214_v55 }
 0x468   : > { %2391 = vmatpush.msra.mxu3 %v2293_v17 }
 0x46c   : > { %v2420_v27 = vpop.permute.xlu2 %2419 }
 0x470   : > { %v6192_v44 = vpop.permute.xlu1 %6191 }
 0x471   : > { %v6194_v58 = vunpack.i.h.bf16 %v6192_v44  ;;  %v6193_v12 = vunpack.i.l.bf16 %v6192_v44 }
 0x473   : > { %v6202_v48 = vpop.permute.xlu0 %6201  ;;  %v2286_v3 = vsel %vm2285_vm13, %v6193_v12, %v6194_v58  ;;  %v2287_v45 = vsel %vm2285_vm13, %v6194_v58, %v6198_v16 }
 0x474   : > { %v6203_v56 = vunpack.i.l.bf16 %v6202_v48  ;;  %v6204_v1 = vunpack.i.h.bf16 %v6202_v48 }
 0x476   : > { %v2289_v22 = vsel %vm2285_vm13, %v6199_v38, %v6203_v56 }
 0x477   : > { %2392 = vmatpush.msra.mxu3 %v2289_v22 }
 0x478   : > { %v6207_v10 = vpop.permute.xlu1 %6206 }
 0x479   : > { %v6209_v2 = vunpack.i.h.bf16 %v6207_v10  ;;  %v6208_v13 = vunpack.i.l.bf16 %v6207_v10 }
 0x47b   : > { %v2416_v11 = vpop.permute.xlu0 %2415  ;;  %v2290_v50 = vsel %vm2285_vm13, %v6204_v1, %v6208_v13  ;;  %v2291_v21 = vsel %vm2285_vm13, %v6208_v13, %v6209_v2  ;;  %v2292_v23 = vsel %vm2285_vm13, %v6209_v2, %v6213_v30 }
 0x47c   : > { %2322 = vmatpush.msra.mxu0 %v2290_v50  ;;  %2345 = vmatpush.msra.mxu1 %v2291_v21  ;;  %v2432_v25 = vmul.f32 0.0, %v2416_v11 }
 0x47d   : > { %2368 = vmatpush.msra.mxu2 %v2292_v23 }
 0x47e   : > { %2323 = vmatpush.msra.mxu0 %v2286_v3  ;;  %2346 = vmatpush.msra.mxu1 %v2287_v45 }
 0x47f   : > { %2369 = vmatpush.msra.mxu2 %v2288_v33 }
 0x480   : > { %v2418_v47 = vpop.permute.xlu1 %2417 }
 0x481   : > { %v2424_v42 = vsel %vm2423_vm14, %v2416_v11, %v2418_v47  ;;  %v2425_v15 = vsel %vm2423_vm14, %v2418_v47, %v2420_v27 }
 0x482   : > { %v2433_v5 = vmul.f32 %v7341_v41, %v2424_v42  ;;  %v2434_v6 = vmul.f32 %v7352_v59, %v2425_v15  ;;  %v2438_v14 = vmul.f32 %v7356_v49, %v2424_v42  ;;  %v2439_v57 = vmul.f32 %v7360_v43, %v2425_v15 }
 0x483   : > { %v2422_v7 = vpop.permute.xlu0 %2421 }
 0x484   : > { %v2426_v35 = vsel %vm2423_vm14, %v2420_v27, %v2422_v7  ;;  %v2436_v63 = vmul.f32 %v7348_v52, %v2422_v7  ;;  %v6215_v28 = vpack.i.bf16 %v2433_v5, %v2432_v25  ;;  %v2441_v36 = vmul.f32 %v7373_v4, %v2422_v7 }
 0x485   : > { %v2435_v19 = vmul.f32 %v7364_v31, %v2426_v35  ;;  %v2440_v40 = vmul.f32 %v7378_v9, %v2426_v35  ;;  %v6230_v39 = vpack.i.bf16 %v2439_v57, %v2438_v14 }
 0x486   : > { %6216 = vrot.lane.b32.xlu1 %v6215_v28, %s6712_s24  ;;  %v6225_v29 = vpack.i.bf16 %v2432_v25, %v2436_v63 }
 0x487   : > { %v6220_v32 = vpack.i.bf16 %v2435_v19, %v2434_v6  ;;  %v6235_v37 = vpack.i.bf16 %v2441_v36, %v2440_v40  ;;  %v5715_v19 = vld [vmem:[%s8783_s2 + $0x38] sm:$0xf] }
 0x488   : > { %6226 = vrot.lane.b32.xlu0 %v6225_v29, %s6712_s24  ;;  %v2919_v14 = vperm.slane %v5715_v19, 0  ;;  %v2920_v40 = vperm.slane %v5715_v19, 1  ;;  %v2922_v36 = vperm.slane %v5715_v19, 3 }
 0x489   : > { %6221 = vrot.lane.b32.xlu2 %v6220_v32, %s6712_s24 }
 0x48e   : > { %6231 = vrot.lane.b32.xlu1 %v6230_v39, %s6712_s24  ;;  %v2921_v39 = vperm.slane %v5715_v19, 2 }
 0x490   : > { %2605 = vrot.lane.b32.xlu0 %v2601_v51, %s6713_s13  ;;  %v5662_v51 = vld [vmem:[%s8782_s1 + $0x98] sm:$0xff] }
 0x491   : > { %6236 = vrot.lane.b32.xlu2 %v6235_v37, %s6712_s24  ;;  %5670 = vmatmul.msk.f32.gmra.mxu3 %vm463_vm7, %v5662_v51  ;;  %v5672_v37 = vld [vmem:[%s8782_s1 + $0xa0] sm:$0xff] }
 0x492   : > { %5664 = vmatmul.msk.f32.gmra.mxu0 %vm463_vm7, %v5662_v51  ;;  %5666 = vmatmul.msk.f32.gmra.mxu1 %vm463_vm7, %v5662_v51 }
 0x493   : > { %5668 = vmatmul.msk.f32.gmra.mxu2 %vm463_vm7, %v5662_v51 }
 0x496   : > { %2607 = vrot.lane.b32.xlu1 %v2602_v18, %s6713_s13 }
 0x498   : > { %2611 = vrot.lane.b32.xlu0 %v2604_v53, %s6713_s13 }
 0x499   : > { %2609 = vrot.lane.b32.xlu2 %v2603_v8, %s6713_s13  ;;  %5680 = vmatmul.msk.f32.vlgmr.msra.gmra.mxu3 %vm463_vm7, %v5672_v37 }
 0x49a   : > { %5674 = vmatmul.msk.f32.vlgmr.msra.gmra.mxu0 %vm463_vm7, %v5672_v37  ;;  %5676 = vmatmul.msk.f32.vlgmr.msra.gmra.mxu1 %vm463_vm7, %v5672_v37 }
 0x49b   : > { %5678 = vmatmul.msk.f32.vlgmr.msra.gmra.mxu2 %vm463_vm7, %v5672_v37 }
 0x4e3   : > { %v6222_v60 = vpop.permute.xlu2 %6221 }
 0x4e4   : > { %v6224_v55 = vunpack.i.h.bf16 %v6222_v60  ;;  %v6223_v10 = vunpack.i.l.bf16 %v6222_v60 }
 0x4e6   : > { %v2478_v50 = vsel %vm2475_vm15, %v6223_v10, %v6224_v55 }
 0x4eb   : > { %v6237_v54 = vpop.permute.xlu2 %6236 }
 0x4ec   : > { %v6239_v62 = vunpack.i.h.bf16 %v6237_v54  ;;  %v6238_v0 = vunpack.i.l.bf16 %v6237_v54 }
 0x4ee   : > { %v2483_v20 = vsel %vm2475_vm15, %v6238_v0, %v6239_v62 }
 0x4ef   : > { %2581 = vmatpush.msrb.mxu3 %v2483_v20 }
 0x4f3   : > { %v2610_v21 = vpop.permute.xlu2 %2609 }
 0x4f8   : > { %v6217_v46 = vpop.permute.xlu1 %6216 }
 0x4f9   : > { %v6219_v44 = vunpack.i.h.bf16 %v6217_v46  ;;  %v6218_v38 = vunpack.i.l.bf16 %v6217_v46 }
 0x4fa   : > { %v6227_v61 = vpop.permute.xlu0 %6226 }
 0x4fb   : > { %v6228_v30 = vunpack.i.l.bf16 %v6227_v61  ;;  %v6229_v56 = vunpack.i.h.bf16 %v6227_v61  ;;  %v2476_v16 = vsel %vm2475_vm15, %v6218_v38, %v6219_v44  ;;  %v2477_v11 = vsel %vm2475_vm15, %v6219_v44, %v6223_v10 }
 0x4fd   : > { %v2479_v17 = vsel %vm2475_vm15, %v6224_v55, %v6228_v30  ;;  %v5673_v55 = vld [vmem:[%s8782_s1 + $0xa8] sm:$0xff] }
 0x4fe   : > { %2582 = vmatpush.msrb.mxu3 %v2479_v17  ;;  %5675 = vmatmul.msk.f32.gmra.mxu0 %vm463_vm7, %v5673_v55 }
 0x4ff   : > { %5681 = vmatmul.msk.f32.gmra.mxu3 %vm463_vm7, %v5673_v55  ;;  %5677 = vmatmul.msk.f32.gmra.mxu1 %vm463_vm7, %v5673_v55 }
 0x500   : > { %v6232_v48 = vpop.permute.xlu1 %6231  ;;  %5679 = vmatmul.msk.f32.gmra.mxu2 %vm463_vm7, %v5673_v55  ;;  %v7640_v55 = vpop.f32.mrf.mxu0 }
 0x501   : > { %v6234_v22 = vunpack.i.h.bf16 %v6232_v48  ;;  %v6233_v58 = vunpack.i.l.bf16 %v6232_v48 }
 0x502   : > { %v2606_v12 = vpop.permute.xlu0 %2605 }
 0x503   : > { %v2480_v1 = vsel %vm2475_vm15, %v6229_v56, %v6233_v58  ;;  %v2481_v2 = vsel %vm2475_vm15, %v6233_v58, %v6234_v22  ;;  %v2482_v13 = vsel %vm2475_vm15, %v6234_v22, %v6238_v0  ;;  %v2622_v33 = vmul.f32 0.0, %v2606_v12 }
 0x504   : > { %2512 = vmatpush.msrb.mxu0 %v2480_v1  ;;  %2535 = vmatpush.msrb.mxu1 %v2481_v2 }
 0x505   : > { %2558 = vmatpush.msrb.mxu2 %v2482_v13 }
 0x506   : > { %2513 = vmatpush.msrb.mxu0 %v2476_v16  ;;  %2536 = vmatpush.msrb.mxu1 %v2477_v11  ;;  %v5683_v16 = vld [vmem:[%s8782_s1 + $0xb0] sm:$0xff] }
 0x507   : > { %2559 = vmatpush.msrb.mxu2 %v2478_v50  ;;  %5691 = vmatmul.msk.f32.vlgmr.msrb.gmra.mxu3 %vm463_vm7, %v5683_v16 }
 0x508   : > { %v2608_v23 = vpop.permute.xlu1 %2607  ;;  %5685 = vmatmul.msk.f32.vlgmr.msrb.gmra.mxu0 %vm463_vm7, %v5683_v16  ;;  %5687 = vmatmul.msk.f32.vlgmr.msrb.gmra.mxu1 %vm463_vm7, %v5683_v16 }
 0x509   : > { %v2614_v3 = vsel %vm2613_vm5, %v2606_v12, %v2608_v23  ;;  %v2615_v45 = vsel %vm2613_vm5, %v2608_v23, %v2610_v21  ;;  %5689 = vmatmul.msk.f32.vlgmr.msrb.gmra.mxu2 %vm463_vm7, %v5683_v16 }
 0x50a   : > { %v2623_v27 = vmul.f32 %v7341_v41, %v2614_v3  ;;  %v2612_v25 = vpop.permute.xlu0 %2611  ;;  %v2624_v15 = vmul.f32 %v7352_v59, %v2615_v45  ;;  %v2628_v28 = vmul.f32 %v7356_v49, %v2614_v3  ;;  %v2629_v6 = vmul.f32 %v7360_v43, %v2615_v45 }
 0x50b   : > { %v2616_v47 = vsel %vm2613_vm5, %v2610_v21, %v2612_v25  ;;  %v2626_v42 = vmul.f32 %v7348_v52, %v2612_v25  ;;  %v2631_v32 = vmul.f32 %v7373_v4, %v2612_v25 }
 0x50c   : > { %v2625_v5 = vmul.f32 %v7364_v31, %v2616_v47  ;;  %v6240_v7 = vpack.i.bf16 %v2623_v27, %v2622_v33  ;;  %v2630_v29 = vmul.f32 %v7378_v9, %v2616_v47  ;;  %v6255_v57 = vpack.i.bf16 %v2629_v6, %v2628_v28  ;;  %v5726_v28 = vld [vmem:[%s8783_s2 + $0x3c] sm:$0xf] }
 0x50d   : > { %v6250_v35 = vpack.i.bf16 %v2622_v33, %v2626_v42  ;;  %v3107_v19 = vperm.slane %v5726_v28, 0 }
 0x50e   : > { %6241 = vrot.lane.b32.xlu1 %v6240_v7, %s6714_s15  ;;  %v6245_v63 = vpack.i.bf16 %v2625_v5, %v2624_v15  ;;  %v6260_v34 = vpack.i.bf16 %v2631_v32, %v2630_v29 }
 0x50f   : > { %6251 = vrot.lane.b32.xlu0 %v6250_v35, %s6714_s15 }
 0x510   : > { %6246 = vrot.lane.b32.xlu2 %v6245_v63, %s6714_s15 }
 0x516   : > { %6256 = vrot.lane.b32.xlu1 %v6255_v57, %s6714_s15  ;;  %v3110_v57 = vperm.slane %v5726_v28, 3 }
 0x517   : > { %2923 = vrot.lane.b32.xlu0 %v2919_v14, %s6714_s15  ;;  %v3108_v14 = vperm.slane %v5726_v28, 1 }
 0x518   : > { %6261 = vrot.lane.b32.xlu2 %v6260_v34, %s6714_s15  ;;  %v3109_v34 = vperm.slane %v5726_v28, 2 }
 0x51e   : > { %2925 = vrot.lane.b32.xlu1 %v2920_v40, %s6714_s15  ;;  %v5684_v40 = vld [vmem:[%s8782_s1 + $0xb8] sm:$0xff] }
 0x51f   : > { %2929 = vrot.lane.b32.xlu0 %v2922_v36, %s6714_s15  ;;  %5692 = vmatmul.msk.f32.gmra.mxu3 %vm463_vm7, %v5684_v40  ;;  %v5704_v36 = vld [vmem:[%s8783_s2 + $0x34] sm:$0xf] }
 0x520   : > { %2927 = vrot.lane.b32.xlu2 %v2921_v39, %s6714_s15  ;;  %5686 = vmatmul.msk.f32.gmra.mxu0 %vm463_vm7, %v5684_v40  ;;  %v2794_v39 = vperm.slane %v5704_v36, 3  ;;  %s8811_s15 = smov 64  }
 0x521   : > { %5688 = vmatmul.msk.f32.gmra.mxu1 %vm463_vm7, %v5684_v40  ;;  %5690 = vmatmul.msk.f32.gmra.mxu2 %vm463_vm7, %v5684_v40  ;;  %v7672_v40 = vld [vmem:[%s6853_s17 + $0x28] sm:$0xff] }
 0x522   : > { %v2806_v51 = vmul.f32 %v7373_v4, %v2794_v39  ;;  %v2802_v37 = vmul.f32 %v7348_v52, %v2794_v39 }
 0x56a   : > { %v6247_v18 = vpop.permute.xlu2 %6246 }
 0x56b   : > { %v6249_v62 = vunpack.i.h.bf16 %v6247_v18  ;;  %v6248_v56 = vunpack.i.l.bf16 %v6247_v18  ;;  %v7628_v18 = vpop.f32.mrf.mxu3 }
 0x56d   : > { %v2668_v2 = vsel %vm2665_vm9, %v6248_v56, %v6249_v62 }
 0x572   : > { %v6262_v53 = vpop.permute.xlu2 %6261 }
 0x573   : > { %v6264_v8 = vunpack.i.h.bf16 %v6262_v53  ;;  %v6263_v24 = vunpack.i.l.bf16 %v6262_v53  ;;  %v5694_v53 = vld [vmem:[%s8782_s1 + $0xc0] sm:$0xff] }
 0x575   : > { %v2673_v26 = vsel %vm2665_vm9, %v6263_v24, %v6264_v8  ;;  %v2791_v8 = vperm.slane %v5704_v36, 0 }
 0x576   : > { %2771 = vmatpush.msra.mxu3 %v2673_v26  ;;  %v2793_v26 = vperm.slane %v5704_v36, 2 }
 0x57a   : > { %v2928_v13 = vpop.permute.xlu2 %2927 }
 0x580   : > { %v6242_v60 = vpop.permute.xlu1 %6241 }
 0x581   : > { %v6252_v54 = vpop.permute.xlu0 %6251  ;;  %v6244_v46 = vunpack.i.h.bf16 %v6242_v60  ;;  %v6243_v30 = vunpack.i.l.bf16 %v6242_v60  ;;  %v2803_v60 = vmul.f32 %v7356_v49, %v2791_v8 }
 0x582   : > { %v6253_v0 = vunpack.i.l.bf16 %v6252_v54  ;;  %v6254_v17 = vunpack.i.h.bf16 %v6252_v54 }
 0x583   : > { %v2666_v12 = vsel %vm2665_vm9, %v6243_v30, %v6244_v46  ;;  %v2667_v1 = vsel %vm2665_vm9, %v6244_v46, %v6248_v56  ;;  %v7643_v30 = vpop.f32.mrf.mxu1 }
 0x584   : > { %v2669_v20 = vsel %vm2665_vm9, %v6249_v62, %v6253_v0  ;;  %v2805_v62 = vmul.f32 %v7378_v9, %v2793_v26 }
 0x585   : > { %2772 = vmatpush.msra.mxu3 %v2669_v20  ;;  %v2799_v20 = vmul.f32 %v7341_v41, %v2791_v8 }
 0x586   : > { %5702 = vmatmul.msk.f32.vlgmr.msra.gmra.mxu3 %vm463_vm7, %v5694_v53 }
 0x587   : > { %2899 = vmatpush.msrb.mxu3 %v2806_v51 }
 0x588   : > { %v6257_v61 = vpop.permute.xlu1 %6256 }
 0x589   : > { %v6259_v44 = vunpack.i.h.bf16 %v6257_v61  ;;  %v6258_v48 = vunpack.i.l.bf16 %v6257_v61  ;;  %v2924_v38 = vpop.permute.xlu0 %2923  ;;  %2900 = vmatpush.msrb.mxu3 %v2802_v37  ;;  %v2801_v61 = vmul.f32 %v7364_v31, %v2793_v26  ;;  %v5705_v26 = vld [vmem:[%s8782_s1 + $0xd0] sm:$0xff] }
 0x58a   : > { %v2939_v3 = vmul.f32 %v7341_v41, %v2924_v38  ;;  %v2944_v27 = vmul.f32 %v7356_v49, %v2924_v38 }
 0x58b   : > { %v2670_v22 = vsel %vm2665_vm9, %v6254_v17, %v6258_v48  ;;  %v2671_v58 = vsel %vm2665_vm9, %v6258_v48, %v6259_v44  ;;  %v2672_v10 = vsel %vm2665_vm9, %v6259_v44, %v6263_v24  ;;  %v2792_v24 = vperm.slane %v5704_v36, 1 }
 0x58c   : > { %2702 = vmatpush.msra.mxu0 %v2670_v22  ;;  %2725 = vmatpush.msra.mxu1 %v2671_v58 }
 0x58d   : > { %2748 = vmatpush.msra.mxu2 %v2672_v10  ;;  %v2804_v54 = vmul.f32 %v7360_v43, %v2792_v24  ;;  %v2800_v46 = vmul.f32 %v7352_v59, %v2792_v24 }
 0x58e   : > { %2703 = vmatpush.msra.mxu0 %v2666_v12  ;;  %2726 = vmatpush.msra.mxu1 %v2667_v1 }
 0x58f   : > { %2749 = vmatpush.msra.mxu2 %v2668_v2  ;;  %5696 = vmatmul.msk.f32.vlgmr.msra.gmra.mxu0 %vm463_vm7, %v5694_v53 }
 0x590   : > { %v2926_v11 = vpop.permute.xlu1 %2925  ;;  %2830 = vmatpush.msrb.mxu0 %v2803_v60  ;;  %2853 = vmatpush.msrb.mxu1 %v2804_v54  ;;  %v7695_v60 = vpop.f32.mrf.mxu0 }
 0x591   : > { %v2931_v50 = vsel %vm2665_vm9, %v2924_v38, %v2926_v11  ;;  %v2932_v21 = vsel %vm2665_vm9, %v2926_v11, %v2928_v13  ;;  %v2930_v23 = vpop.permute.xlu0 %2929  ;;  %2876 = vmatpush.msrb.mxu2 %v2805_v62  ;;  %5698 = vmatmul.msk.f32.vlgmr.msra.gmra.mxu1 %vm463_vm7, %v5694_v53  ;;  %v7697_v54 = vpop.f32.mrf.mxu1 }
 0x592   : > { %v2940_v45 = vmul.f32 %v7352_v59, %v2931_v50  ;;  %v2941_v33 = vmul.f32 %v7364_v31, %v2932_v21  ;;  %v2943_v25 = vmul.f32 0.0, %v2930_v23  ;;  %v2933_v47 = vsel %vm2665_vm9, %v2928_v13, %v2930_v23  ;;  %2831 = vmatpush.msrb.mxu0 %v2799_v20  ;;  %2854 = vmatpush.msrb.mxu1 %v2800_v46 }
 0x593   : > { %v2942_v42 = vmul.f32 %v7348_v52, %v2933_v47  ;;  %v2945_v35 = vmul.f32 %v7360_v43, %v2931_v50  ;;  %v2946_v63 = vmul.f32 %v7378_v9, %v2932_v21  ;;  %v2947_v6 = vmul.f32 %v7373_v4, %v2933_v47  ;;  %v7646_v43 = vpop.f32.mrf.mxu2  ;;  %2877 = vmatpush.msrb.mxu2 %v2801_v61 }
 0x594   : > { %v6265_v15 = vpack.i.bf16 %v2940_v45, %v2939_v3  ;;  %v6275_v5 = vpack.i.bf16 %v2944_v27, %v2943_v25  ;;  %5700 = vmatmul.msk.f32.vlgmr.msra.gmra.mxu2 %vm463_vm7, %v5694_v53 }
 0x595   : > { %v6270_v7 = vpack.i.bf16 %v2942_v42, %v2941_v33  ;;  %v6280_v29 = vpack.i.bf16 %v2946_v63, %v2945_v35  ;;  %v6285_v32 = vpack.i.bf16 %v2943_v25, %v2947_v6 }
 0x596   : > { %6266 = vrot.lane.b32.xlu1 %v6265_v15, %s6713_s13  ;;  %6276 = vrot.lane.b32.xlu0 %v6275_v5, %s6713_s13 }
 0x597   : > { %6271 = vrot.lane.b32.xlu2 %v6270_v7, %s6713_s13 }
 0x598   : > { %v7704_v20 = vpop.f32.mrf.mxu0 }
 0x599   : > { %v7706_v46 = vpop.f32.mrf.mxu1 }
 0x59b   : > { %v7701_v62 = vpop.f32.mrf.mxu2 }
 0x59e   : > { %6281 = vrot.lane.b32.xlu1 %v6280_v29, %s6713_s13  ;;  %3111 = vrot.lane.b32.xlu0 %v3107_v19, %s6712_s24 }
 0x59f   : > { %6286 = vrot.lane.b32.xlu2 %v6285_v32, %s6713_s13 }
 0x5a3   : > { %v7710_v61 = vpop.f32.mrf.mxu2 }
 0x5a6   : > { %3113 = vrot.lane.b32.xlu1 %v3108_v14, %s6712_s24  ;;  %3117 = vrot.lane.b32.xlu0 %v3110_v57, %s6712_s24 }
 0x5a7   : > { %3115 = vrot.lane.b32.xlu2 %v3109_v34, %s6712_s24  ;;  %s8810_s24 = smov 63  }
 0x5f1   : > { %v6272_v0 = vpop.permute.xlu2 %6271 }
 0x5f2   : > { %v6274_v58 = vunpack.i.h.bf16 %v6272_v0  ;;  %v6273_v23 = vunpack.i.l.bf16 %v6272_v0 }
 0x5f4   : > { %v2984_v47 = vsel %vm2613_vm5, %v6273_v23, %v6274_v58 }
 0x5f9   : > { %v6287_v17 = vpop.permute.xlu2 %6286 }
 0x5fa   : > { %v6289_v44 = vunpack.i.h.bf16 %v6287_v17  ;;  %v6288_v48 = vunpack.i.l.bf16 %v6287_v17 }
 0x5fc   : > { %v2989_v38 = vsel %vm2613_vm5, %v6288_v48, %v6289_v44 }
 0x5fd   : > { %3087 = vmatpush.msra.mxu3 %v2989_v38 }
 0x601   : > { %v3116_v42 = vpop.permute.xlu2 %3115 }
 0x608   : > { %v6267_v56 = vpop.permute.xlu1 %6266  ;;  %v6277_v22 = vpop.permute.xlu0 %6276 }
 0x609   : > { %v6278_v10 = vunpack.i.l.bf16 %v6277_v22  ;;  %v6269_v1 = vunpack.i.h.bf16 %v6267_v56  ;;  %v6279_v13 = vunpack.i.h.bf16 %v6277_v22  ;;  %v6268_v16 = vunpack.i.l.bf16 %v6267_v56 }
 0x60b   : > { %v2985_v12 = vsel %vm2613_vm5, %v6274_v58, %v6278_v10  ;;  %v2982_v27 = vsel %vm2613_vm5, %v6268_v16, %v6269_v1  ;;  %v2983_v25 = vsel %vm2613_vm5, %v6269_v1, %v6273_v23 }
 0x60c   : > { %3088 = vmatpush.msra.mxu3 %v2985_v12 }
 0x610   : > { %v6282_v2 = vpop.permute.xlu1 %6281  ;;  %v3112_v11 = vpop.permute.xlu0 %3111 }
 0x611   : > { %v6284_v50 = vunpack.i.h.bf16 %v6282_v2  ;;  %v6283_v21 = vunpack.i.l.bf16 %v6282_v2  ;;  %v3127_v5 = vmul.f32 %v7341_v41, %v3112_v11  ;;  %v3132_v7 = vmul.f32 %v7356_v49, %v3112_v11  ;;  %v5737_v49 = vld [vmem:[%s8783_s2 + $0x40] sm:$0xf] }
 0x612   : > { %v3295_v36 = vperm.slane %v5737_v49, 0  ;;  %v3298_v37 = vperm.slane %v5737_v49, 3  ;;  %v3296_v53 = vperm.slane %v5737_v49, 1  ;;  %v3297_v8 = vperm.slane %v5737_v49, 2  ;;  %v7741_v49 = vld [vmem:[%s6853_s17 + $0x10] sm:$0xff] }
 0x613   : > { %v2986_v3 = vsel %vm2613_vm5, %v6279_v13, %v6283_v21  ;;  %v2987_v45 = vsel %vm2613_vm5, %v6283_v21, %v6284_v50  ;;  %v2988_v33 = vsel %vm2613_vm5, %v6284_v50, %v6288_v48  ;;  %vm8870_vm5 = vcmask 580608  }
 0x614   : > { %3018 = vmatpush.msra.mxu0 %v2986_v3  ;;  %3041 = vmatpush.msra.mxu1 %v2987_v45  ;;  %vm8871_vm9 = vmmov %vm8870_vm5 }
 0x615   : > { %3064 = vmatpush.msra.mxu2 %v2988_v33 }
 0x616   : > { %3019 = vmatpush.msra.mxu0 %v2982_v27  ;;  %3042 = vmatpush.msra.mxu1 %v2983_v25 }
 0x617   : > { %3065 = vmatpush.msra.mxu2 %v2984_v47 }
 0x618   : > { %v3114_v15 = vpop.permute.xlu1 %3113  ;;  %v3118_v35 = vpop.permute.xlu0 %3117 }
 0x619   : > { %v3119_v63 = vsel %vm2475_vm15, %v3112_v11, %v3114_v15  ;;  %v3120_v28 = vsel %vm2475_vm15, %v3114_v15, %v3116_v42  ;;  %v3131_v6 = vmul.f32 0.0, %v3118_v35  ;;  %v3121_v19 = vsel %vm2475_vm15, %v3116_v42, %v3118_v35  ;;  %v7722_v15 = vld [vmem:[%s6853_s17 + $0x20] sm:$0xff] }
 0x61a   : > { %v3128_v29 = vmul.f32 %v7352_v59, %v3119_v63  ;;  %v3129_v32 = vmul.f32 %v7364_v31, %v3120_v28  ;;  %v3130_v14 = vmul.f32 %v7348_v52, %v3121_v19  ;;  %v3133_v59 = vmul.f32 %v7672_v40, %v3119_v63 }
 0x61b   : > { %v6300_v57 = vpack.i.bf16 %v3132_v7, %v3131_v6  ;;  %v3134_v31 = vmul.f32 %v7378_v9, %v3120_v28  ;;  %v3135_v52 = vmul.f32 %v7373_v4, %v3121_v19  ;;  %v7683_v9 = vpop.f32.mrf.mxu3  ;;  %v5695_v4 = vld [vmem:[%s8782_s1 + $0xc8] sm:$0xff] }
 0x61c   : > { %v6290_v34 = vpack.i.bf16 %v3128_v29, %v3127_v5  ;;  %v6295_v41 = vpack.i.bf16 %v3130_v14, %v3129_v32  ;;  %5703 = vmatmul.msk.f32.gmra.mxu3 %vm463_vm7, %v5695_v4  ;;  %5697 = vmatmul.msk.f32.gmra.mxu0 %vm463_vm7, %v5695_v4  ;;  %v7729_v29 = vld [vmem:[%s6853_s17] sm:$0xff]  ;;  %v7733_v14 = vld [vmem:[%s6853_s17 + $0x18] sm:$0xff] }
 0x61d   : > { %6301 = vrot.lane.b32.xlu0 %v6300_v57, %s6711_s14  ;;  %v6305_v39 = vpack.i.bf16 %v3134_v31, %v3133_v59  ;;  %v6310_v51 = vpack.i.bf16 %v3131_v6, %v3135_v52  ;;  %5699 = vmatmul.msk.f32.gmra.mxu1 %vm463_vm7, %v5695_v4 }
 0x61e   : > { %6291 = vrot.lane.b32.xlu1 %v6290_v34, %s6711_s14  ;;  %6296 = vrot.lane.b32.xlu2 %v6295_v41, %s6711_s14  ;;  %v7737_v34 = vld [vmem:[%s6853_s17 + $0x8] sm:$0xff] }
 0x61f   : > { %5701 = vmatmul.msk.f32.gmra.mxu2 %vm463_vm7, %v5695_v4 }
 0x623   : > { %v7689_v24 = vpop.f32.mrf.mxu3 }
 0x624   : > { %5713 = vmatmul.msk.f32.vlgmr.msrb.gmra.mxu3 %vm463_vm7, %v5705_v26  ;;  %5707 = vmatmul.msk.f32.vlgmr.msrb.gmra.mxu0 %vm463_vm7, %v5705_v26 }
 0x625   : > { %3299 = vrot.lane.b32.xlu0 %v3295_v36, %s6710_s9  ;;  %5709 = vmatmul.msk.f32.vlgmr.msrb.gmra.mxu1 %vm463_vm7, %v5705_v26 }
 0x626   : > { %6306 = vrot.lane.b32.xlu1 %v6305_v39, %s6711_s14  ;;  %6311 = vrot.lane.b32.xlu2 %v6310_v51, %s6711_s14  ;;  %v5748_v39 = vld [vmem:[%s8783_s2 + $0x44] sm:$0xf]  ;;  %v7751_v51 = vld [vmem:[%s6853_s17 + $0x38] sm:$0xff] }
 0x627   : > { %5711 = vmatmul.msk.f32.vlgmr.msrb.gmra.mxu2 %vm463_vm7, %v5705_v26  ;;  %v3483_v26 = vperm.slane %v5748_v39, 0 }
 0x62d   : > { %3305 = vrot.lane.b32.xlu0 %v3298_v37, %s6710_s9 }
 0x62e   : > { %3301 = vrot.lane.b32.xlu1 %v3296_v53, %s6710_s9  ;;  %3303 = vrot.lane.b32.xlu2 %v3297_v8, %s6710_s9  ;;  %v7756_v8 = vld [vmem:[%s6853_s17 + $0x30] sm:$0xff] }
 0x678   : > { %v6297_v0 = vpop.permute.xlu2 %6296 }
 0x679   : > { %v6299_v58 = vunpack.i.h.bf16 %v6297_v0  ;;  %v6298_v23 = vunpack.i.l.bf16 %v6297_v0 }
 0x67b   : > { %v3172_v47 = vsel %vm2423_vm14, %v6298_v23, %v6299_v58 }
 0x680   : > { %v6312_v17 = vpop.permute.xlu2 %6311 }
 0x681   : > { %v6314_v44 = vunpack.i.h.bf16 %v6312_v17  ;;  %v6313_v48 = vunpack.i.l.bf16 %v6312_v17 }
 0x683   : > { %v3177_v38 = vsel %vm2423_vm14, %v6313_v48, %v6314_v44  ;;  %v3486_v44 = vperm.slane %v5748_v39, 3 }
 0x684   : > { %3275 = vmatpush.msrb.mxu3 %v3177_v38  ;;  %v3485_v38 = vperm.slane %v5748_v39, 2 }
 0x688   : > { %v3304_v42 = vpop.permute.xlu2 %3303 }
 0x68f   : > { %v6302_v56 = vpop.permute.xlu0 %6301 }
 0x690   : > { %v6292_v22 = vpop.permute.xlu1 %6291  ;;  %v6303_v10 = vunpack.i.l.bf16 %v6302_v56  ;;  %v6304_v1 = vunpack.i.h.bf16 %v6302_v56  ;;  %v7765_v56 = vpop.f32.mrf.mxu3 }
 0x691   : > { %v6294_v16 = vunpack.i.h.bf16 %v6292_v22  ;;  %v6293_v11 = vunpack.i.l.bf16 %v6292_v22  ;;  %v5706_v22 = vld [vmem:[%s8782_s1 + $0xd8] sm:$0xff] }
 0x692   : > { %v3173_v12 = vsel %vm2423_vm14, %v6299_v58, %v6303_v10  ;;  %5714 = vmatmul.msk.f32.gmra.mxu3 %vm463_vm7, %v5706_v22  ;;  %v5716_v10 = vld [vmem:[%s8782_s1 + $0xe0] sm:$0xff] }
 0x693   : > { %3276 = vmatpush.msrb.mxu3 %v3173_v12  ;;  %v3170_v27 = vsel %vm2423_vm14, %v6293_v11, %v6294_v16  ;;  %v3171_v25 = vsel %vm2423_vm14, %v6294_v16, %v6298_v23  ;;  %v7777_v12 = vpop.f32.mrf.mxu0  ;;  %5708 = vmatmul.msk.f32.gmra.mxu0 %vm463_vm7, %v5706_v22 }
 0x697   : > { %v3300_v2 = vpop.permute.xlu0 %3299 }
 0x698   : > { %v6307_v13 = vpop.permute.xlu1 %6306  ;;  %v3320_v5 = vmul.f32 %v7722_v15, %v3300_v2  ;;  %v3315_v32 = vmul.f32 %v7729_v29, %v3300_v2  ;;  %v7771_v58 = vpop.f32.mrf.mxu3 }
 0x699   : > { %v6309_v50 = vunpack.i.h.bf16 %v6307_v13  ;;  %v6308_v21 = vunpack.i.l.bf16 %v6307_v13 }
 0x69a   : > { %5724 = vmatmul.msk.f32.vlgmr.msra.gmra.mxu3 %vm463_vm7, %v5716_v10 }
 0x69b   : > { %v3174_v3 = vsel %vm2423_vm14, %v6304_v1, %v6308_v21  ;;  %v3175_v45 = vsel %vm2423_vm14, %v6308_v21, %v6309_v50  ;;  %v3176_v33 = vsel %vm2423_vm14, %v6309_v50, %v6313_v48  ;;  %v3484_v48 = vperm.slane %v5748_v39, 1  ;;  %v7779_v1 = vpop.f32.mrf.mxu1  ;;  %5710 = vmatmul.msk.f32.gmra.mxu1 %vm463_vm7, %v5706_v22  ;;  %v7786_v16 = vpop.f32.mrf.mxu0  ;;  %5718 = vmatmul.msk.f32.vlgmr.msra.gmra.mxu0 %vm463_vm7, %v5716_v10 }
 0x69c   : > { %3206 = vmatpush.msrb.mxu0 %v3174_v3  ;;  %3229 = vmatpush.msrb.mxu1 %v3175_v45  ;;  %vm8876_vm14 = vcmask 531456  }
 0x69d   : > { %3252 = vmatpush.msrb.mxu2 %v3176_v33  ;;  %vm8877_vm15 = vmmov %vm8876_vm14 }
 0x69e   : > { %3207 = vmatpush.msrb.mxu0 %v3170_v27  ;;  %3230 = vmatpush.msrb.mxu1 %v3171_v25 }
 0x69f   : > { %3253 = vmatpush.msrb.mxu2 %v3172_v47  ;;  %v3306_v7 = vpop.permute.xlu0 %3305 }
 0x6a0   : > { %v3302_v35 = vpop.permute.xlu1 %3301  ;;  %v3319_v63 = vmul.f32 0.0, %v3306_v7  ;;  %v3309_v28 = vsel %vm2285_vm13, %v3304_v42, %v3306_v7 }
 0x6a1   : > { %v3307_v6 = vsel %vm2285_vm13, %v3300_v2, %v3302_v35  ;;  %v3308_v19 = vsel %vm2285_vm13, %v3302_v35, %v3304_v42  ;;  %v3318_v57 = vmul.f32 %v7733_v14, %v3309_v28  ;;  %v3323_v37 = vmul.f32 %v7751_v51, %v3309_v28  ;;  %v7783_v2 = vpop.f32.mrf.mxu2  ;;  %5712 = vmatmul.msk.f32.gmra.mxu2 %vm463_vm7, %v5706_v22  ;;  %vm8875_vm13 = vmmov %vm8870_vm5 }
 0x6a2   : > { %v3316_v41 = vmul.f32 %v7737_v34, %v3307_v6  ;;  %v3317_v59 = vmul.f32 %v7741_v49, %v3308_v19  ;;  %v6325_v31 = vpack.i.bf16 %v3320_v5, %v3319_v63  ;;  %v3321_v53 = vmul.f32 %v7672_v40, %v3307_v6 }
 0x6a3   : > { %v3322_v4 = vmul.f32 %v7756_v8, %v3308_v19  ;;  %v6335_v0 = vpack.i.bf16 %v3319_v63, %v3323_v37  ;;  %v7788_v11 = vpop.f32.mrf.mxu1  ;;  %5720 = vmatmul.msk.f32.vlgmr.msra.gmra.mxu1 %vm463_vm7, %v5716_v10 }
 0x6a4   : > { %v6320_v52 = vpack.i.bf16 %v3318_v57, %v3317_v59  ;;  %v6315_v36 = vpack.i.bf16 %v3316_v41, %v3315_v32  ;;  %6326 = vrot.lane.b32.xlu0 %v6325_v31, %s6709_s16 }
 0x6a5   : > { %v6330_v17 = vpack.i.bf16 %v3322_v4, %v3321_v53 }
 0x6a6   : > { %6321 = vrot.lane.b32.xlu2 %v6320_v52, %s6709_s16  ;;  %6316 = vrot.lane.b32.xlu1 %v6315_v36, %s6709_s16 }
 0x6a9   : > { %v7792_v50 = vpop.f32.mrf.mxu2  ;;  %5722 = vmatmul.msk.f32.vlgmr.msra.gmra.mxu2 %vm463_vm7, %v5716_v10 }
 0x6ac   : > { %3487 = vrot.lane.b32.xlu0 %v3483_v26, %s6708_s10 }
 0x6ae   : > { %6336 = vrot.lane.b32.xlu2 %v6335_v0, %s6709_s16  ;;  %6331 = vrot.lane.b32.xlu1 %v6330_v17, %s6709_s16  ;;  %s6638_s16 = scalar_lea.hbm %s8786_s5, 128 }
 0x6b4   : > { %3493 = vrot.lane.b32.xlu0 %v3486_v44, %s6708_s10 }
 0x6b6   : > { %3489 = vrot.lane.b32.xlu1 %v3484_v48, %s6708_s10  ;;  %3491 = vrot.lane.b32.xlu2 %v3485_v38, %s6708_s10  ;;  %s277_s10 = sand.u32 1, %s6680_s19  }
 0x6b7   : > { %s5417_s14 = scalar_lea.sflag [#allocation4], %s277_s10 }
 0x700   : > { %v6322_v13 = vpop.permute.xlu2 %6321 }
 0x701   : > { %v6324_v27 = vunpack.i.h.bf16 %v6322_v13  ;;  %v6323_v32 = vunpack.i.l.bf16 %v6322_v13 }
 0x703   : > { %v3360_v39 = vsel %vm2233_vm12, %v6323_v32, %v6324_v27 }
 0x708   : > { %v6337_v21 = vpop.permute.xlu2 %6336 }
 0x709   : > { %v6339_v23 = vunpack.i.h.bf16 %v6337_v21  ;;  %v6338_v3 = vunpack.i.l.bf16 %v6337_v21 }
 0x70b   : > { %v3365_v45 = vsel %vm2233_vm12, %v6338_v3, %v6339_v23 }
 0x70c   : > { %3463 = vmatpush.msra.mxu3 %v3365_v45 }
 0x710   : > { %v3492_v36 = vpop.permute.xlu2 %3491 }
 0x716   : > { %v6327_v33 = vpop.permute.xlu0 %6326 }
 0x717   : > { %v6328_v25 = vunpack.i.l.bf16 %v6327_v33  ;;  %v6329_v7 = vunpack.i.h.bf16 %v6327_v33 }
 0x718   : > { %v6317_v47 = vpop.permute.xlu1 %6316 }
 0x719   : > { %v3361_v42 = vsel %vm2233_vm12, %v6324_v27, %v6328_v25  ;;  %v6319_v63 = vunpack.i.h.bf16 %v6317_v47  ;;  %v6318_v28 = vunpack.i.l.bf16 %v6317_v47 }
 0x71a   : > { %3464 = vmatpush.msra.mxu3 %v3361_v42 }
 0x71b   : > { %v3358_v31 = vsel %vm2233_vm12, %v6318_v28, %v6319_v63  ;;  %v3359_v52 = vsel %vm2233_vm12, %v6319_v63, %v6323_v32  ;;  %v705_v63 = vadd.f32 %v7765_v56, %v7683_v9  ;;  %v886_v28 = vpop.f32.mrf.mxu3  ;;  %v636_v9 = vadd.f32 %v7777_v12, %v7695_v60 }
 0x71c   : > { %v659_v56 = vadd.f32 %v7779_v1, %v7697_v54 }
 0x71e   : > { %v3488_v5 = vpop.permute.xlu0 %3487 }
 0x71f   : > { %v3508_v53 = vmul.f32 %v7722_v15, %v3488_v5  ;;  %v3503_v10 = vmul.f32 %v7729_v29, %v3488_v5 }
 0x720   : > { %v6332_v35 = vpop.permute.xlu1 %6331 }
 0x721   : > { %v6334_v6 = vunpack.i.h.bf16 %v6332_v35  ;;  %v6333_v19 = vunpack.i.l.bf16 %v6332_v35 }
 0x723   : > { %v3362_v57 = vsel %vm2233_vm12, %v6329_v7, %v6333_v19  ;;  %v3363_v41 = vsel %vm2233_vm12, %v6333_v19, %v6334_v6  ;;  %v3364_v59 = vsel %vm2233_vm12, %v6334_v6, %v6338_v3  ;;  %v5759_v3 = vld [vmem:[%s8783_s2 + $0x48] sm:$0xf]  ;;  %v7831_v19 = vadd.f32 %v886_v28, %v705_v63  ;;  %v7834_v32 = vpop.f32.mrf.mxu3  ;;  %vm8874_vm12 = vmmov %vm8870_vm5 }
 0x724   : > { %3394 = vmatpush.msra.mxu0 %v3362_v57  ;;  %3417 = vmatpush.msra.mxu1 %v3363_v41  ;;  %v3671_v33 = vperm.slane %v5759_v3, 0  ;;  %v3673_v7 = vperm.slane %v5759_v3, 2  ;;  %v3672_v35 = vperm.slane %v5759_v3, 1  ;;  %v5717_v6 = vld [vmem:[%s8782_s1 + $0xe8] sm:$0xff]  ;;  %v5727_v57 = vld [vmem:[%s8782_s1 + $0xf0] sm:$0xff]  ;;  %v682_v41 = vadd.f32 %v7783_v2, %v7701_v62 }
 0x725   : > { %3440 = vmatpush.msra.mxu2 %v3364_v59  ;;  %5725 = vmatmul.msk.f32.gmra.mxu3 %vm463_vm7, %v5717_v6  ;;  %v817_v59 = vpop.f32.mrf.mxu0 }
 0x726   : > { %3395 = vmatpush.msra.mxu0 %v3358_v31  ;;  %3418 = vmatpush.msra.mxu1 %v3359_v52  ;;  %v3494_v37 = vpop.permute.xlu0 %3493  ;;  %v840_v31 = vpop.f32.mrf.mxu1  ;;  %v7848_v52 = vadd.f32 %v817_v59, %v636_v9 }
 0x727   : > { %3441 = vmatpush.msra.mxu2 %v3360_v39  ;;  %v3507_v4 = vmul.f32 0.0, %v3494_v37  ;;  %v3497_v26 = vsel %vm2095_vm11, %v3492_v36, %v3494_v37  ;;  %5719 = vmatmul.msk.f32.gmra.mxu0 %vm463_vm7, %v5717_v6  ;;  %v863_v39 = vpop.f32.mrf.mxu2 }
 0x728   : > { %v3490_v0 = vpop.permute.xlu1 %3489  ;;  %v3506_v17 = vmul.f32 %v7733_v14, %v3497_v26  ;;  %v3511_v45 = vmul.f32 %v7751_v51, %v3497_v26  ;;  %5721 = vmatmul.msk.f32.gmra.mxu1 %vm463_vm7, %v5717_v6  ;;  %5723 = vmatmul.msk.f32.gmra.mxu2 %vm463_vm7, %v5717_v6  ;;  %v7853_v60 = vadd.f32 %v863_v39, %v682_v41 }
 0x729   : > { %v3496_v44 = vsel %vm2095_vm11, %v3490_v0, %v3492_v36  ;;  %v3495_v48 = vsel %vm2095_vm11, %v3488_v5, %v3490_v0  ;;  %v6350_v38 = vpack.i.bf16 %v3508_v53, %v3507_v4  ;;  %v3674_v5 = vperm.slane %v5759_v3, 3  ;;  %vm8873_vm11 = vmmov %vm8870_vm5 }
 0x72a   : > { %v3505_v22 = vmul.f32 %v7741_v49, %v3496_v44  ;;  %v3504_v13 = vmul.f32 %v7737_v34, %v3495_v48  ;;  %v3510_v27 = vmul.f32 %v7756_v8, %v3496_v44  ;;  %v3509_v25 = vmul.f32 %v7672_v40, %v3495_v48 }
 0x72b   : > { %6351 = vrot.lane.b32.xlu0 %v6350_v38, %s6707_s8  ;;  %v6360_v47 = vpack.i.bf16 %v3507_v4, %v3511_v45  ;;  %v7850_v36 = vadd.f32 %v840_v31, %v659_v56 }
 0x72c   : > { %v6345_v21 = vpack.i.bf16 %v3506_v17, %v3505_v22  ;;  %v6340_v23 = vpack.i.bf16 %v3504_v13, %v3503_v10  ;;  %v6355_v42 = vpack.i.bf16 %v3510_v27, %v3509_v25 }
 0x72d   : > { %5735 = vmatmul.msk.f32.vlgmr.msrb.gmra.mxu3 %vm463_vm7, %v5727_v57  ;;  %v7855_v54 = vpop.f32.mrf.mxu0 }
 0x72e   : > { %6346 = vrot.lane.b32.xlu2 %v6345_v21, %s6707_s8  ;;  %6341 = vrot.lane.b32.xlu1 %v6340_v23, %s6707_s8  ;;  %v7857_v1 = vpop.f32.mrf.mxu1 }
 0x72f   : > { %5729 = vmatmul.msk.f32.vlgmr.msrb.gmra.mxu0 %vm463_vm7, %v5727_v57  ;;  %v7861_v62 = vpop.f32.mrf.mxu2 }
 0x730   : > { %5731 = vmatmul.msk.f32.vlgmr.msrb.gmra.mxu1 %vm463_vm7, %v5727_v57  ;;  %5733 = vmatmul.msk.f32.vlgmr.msrb.gmra.mxu2 %vm463_vm7, %v5727_v57 }
 0x733   : > { %3675 = vrot.lane.b32.xlu0 %v3671_v33, %s6698_s11 }
 0x736   : > { %6361 = vrot.lane.b32.xlu2 %v6360_v47, %s6707_s8  ;;  %6356 = vrot.lane.b32.xlu1 %v6355_v42, %s6707_s8  ;;  %s8809_s8 = smov 57  }
 0x73b   : > { %3681 = vrot.lane.b32.xlu0 %v3674_v5, %s6698_s11 }
 0x73e   : > { %3679 = vrot.lane.b32.xlu2 %v3673_v7, %s6698_s11  ;;  %3677 = vrot.lane.b32.xlu1 %v3672_v35, %s6698_s11 }
 0x788   : > { %v6347_v12 = vpop.permute.xlu2 %6346 }
 0x789   : > { %v6349_v0 = vunpack.i.h.bf16 %v6347_v12  ;;  %v6348_v45 = vunpack.i.l.bf16 %v6347_v12 }
 0x78b   : > { %v3548_v28 = vsel %vm2043_vm10, %v6348_v45, %v6349_v0 }
 0x790   : > { %v6362_v2 = vpop.permute.xlu2 %6361 }
 0x791   : > { %v6364_v37 = vunpack.i.h.bf16 %v6362_v2  ;;  %v6363_v53 = vunpack.i.l.bf16 %v6362_v2  ;;  %v5770_v2 = vld [vmem:[%s8783_s2 + $0x4c] sm:$0xf] }
 0x793   : > { %v3553_v4 = vsel %vm2043_vm10, %v6363_v53, %v6364_v37 }
 0x794   : > { %3651 = vmatpush.msrb.mxu3 %v3553_v4  ;;  %v3859_v4 = vperm.slane %v5770_v2, 0 }
 0x798   : > { %v3680_v47 = vpop.permute.xlu2 %3679 }
 0x79d   : > { %v6352_v26 = vpop.permute.xlu0 %6351 }
 0x79e   : > { %v6353_v17 = vunpack.i.l.bf16 %v6352_v26  ;;  %v6354_v22 = vunpack.i.h.bf16 %v6352_v26 }
 0x7a0   : > { %v6342_v44 = vpop.permute.xlu1 %6341  ;;  %v3549_v48 = vsel %vm2043_vm10, %v6349_v0, %v6353_v17 }
 0x7a1   : > { %3652 = vmatpush.msrb.mxu3 %v3549_v48  ;;  %v6344_v13 = vunpack.i.h.bf16 %v6342_v44  ;;  %v6343_v21 = vunpack.i.l.bf16 %v6342_v44 }
 0x7a3   : > { %v3546_v5 = vsel %vm2043_vm10, %v6343_v21, %v6344_v13  ;;  %v3547_v7 = vsel %vm2043_vm10, %v6344_v13, %v6348_v45  ;;  %v1076_v13 = vpop.f32.mrf.mxu3  ;;  %v5728_v21 = vld [vmem:[%s8782_s1 + $0xf8] sm:$0xff]  ;;  %v5738_v45 = vld [vmem:[%s8782_s1 + $0x100] sm:$0xff] }
 0x7a4   : > { %5736 = vmatmul.msk.f32.gmra.mxu3 %vm463_vm7, %v5728_v21 }
 0x7a5   : > { %v3676_v38 = vpop.permute.xlu0 %3675 }
 0x7a6   : > { %v3696_v35 = vmul.f32 %v7722_v15, %v3676_v38  ;;  %v3691_v31 = vmul.f32 %v7729_v29, %v3676_v38 }
 0x7a8   : > { %v6357_v10 = vpop.permute.xlu1 %6356 }
 0x7a9   : > { %v6359_v23 = vunpack.i.h.bf16 %v6357_v10  ;;  %v6358_v3 = vunpack.i.l.bf16 %v6357_v10  ;;  %v3861_v10 = vperm.slane %v5770_v2, 2 }
 0x7ab   : > { %v3550_v33 = vsel %vm2043_vm10, %v6354_v22, %v6358_v3  ;;  %v3551_v27 = vsel %vm2043_vm10, %v6358_v3, %v6359_v23  ;;  %v3552_v25 = vsel %vm2043_vm10, %v6359_v23, %v6363_v53  ;;  %v3860_v22 = vperm.slane %v5770_v2, 1  ;;  %v7902_v3 = vpop.f32.mrf.mxu3  ;;  %vm8872_vm10 = vmmov %vm8870_vm5 }
 0x7ac   : > { %3582 = vmatpush.msrb.mxu0 %v3550_v33  ;;  %3605 = vmatpush.msrb.mxu1 %v3551_v27  ;;  %v7899_v23 = vadd.f32 %v1076_v13, %v7831_v19  ;;  %v1007_v33 = vpop.f32.mrf.mxu0  ;;  %v1030_v27 = vpop.f32.mrf.mxu1 }
 0x7ad   : > { %3628 = vmatpush.msrb.mxu2 %v3552_v25  ;;  %v3682_v42 = vpop.permute.xlu0 %3681  ;;  %5746 = vmatmul.msk.f32.vlgmr.msra.gmra.mxu3 %vm463_vm7, %v5738_v45  ;;  %v7911_v25 = vadd.f32 %v1007_v33, %v7848_v52  ;;  %v7914_v19 = vadd.f32 %v1030_v27, %v7850_v36 }
 0x7ae   : > { %v3695_v63 = vmul.f32 0.0, %v3682_v42  ;;  %3583 = vmatpush.msrb.mxu0 %v3546_v5  ;;  %3606 = vmatpush.msrb.mxu1 %v3547_v7  ;;  %v3685_v6 = vsel %vm358_vm1, %v3680_v47, %v3682_v42 }
 0x7af   : > { %3629 = vmatpush.msrb.mxu2 %v3548_v28  ;;  %v3694_v9 = vmul.f32 %v7733_v14, %v3685_v6  ;;  %v3699_v26 = vmul.f32 %v7751_v51, %v3685_v6  ;;  %5730 = vmatmul.msk.f32.gmra.mxu0 %vm463_vm7, %v5728_v21 }
 0x7b0   : > { %v6375_v57 = vpack.i.bf16 %v3696_v35, %v3695_v63  ;;  %v3678_v56 = vpop.permute.xlu1 %3677  ;;  %5732 = vmatmul.msk.f32.gmra.mxu1 %vm463_vm7, %v5728_v21 }
 0x7b1   : > { %v3684_v41 = vsel %vm358_vm1, %v3678_v56, %v3680_v47  ;;  %v3683_v59 = vsel %vm358_vm1, %v3676_v38, %v3678_v56  ;;  %v6385_v44 = vpack.i.bf16 %v3695_v63, %v3699_v26  ;;  %v3862_v38 = vperm.slane %v5770_v2, 3  ;;  %v1053_v47 = vpop.f32.mrf.mxu2  ;;  %5734 = vmatmul.msk.f32.gmra.mxu2 %vm463_vm7, %v5728_v21 }
 0x7b2   : > { %v3693_v39 = vmul.f32 %v7741_v49, %v3684_v41  ;;  %v3692_v12 = vmul.f32 %v7737_v34, %v3683_v59  ;;  %6376 = vrot.lane.b32.xlu0 %v6375_v57, %s6705_s27  ;;  %v3698_v0 = vmul.f32 %v7756_v8, %v3684_v41  ;;  %v3697_v17 = vmul.f32 %v7672_v40, %v3683_v59 }
 0x7b3   : > { %v7918_v42 = vadd.f32 %v1053_v47, %v7853_v60 }
 0x7b4   : > { %v6370_v37 = vpack.i.bf16 %v3694_v9, %v3693_v39  ;;  %v6365_v53 = vpack.i.bf16 %v3692_v12, %v3691_v31  ;;  %v6380_v48 = vpack.i.bf16 %v3698_v0, %v3697_v17  ;;  %v7920_v7 = vpop.f32.mrf.mxu0  ;;  %v7922_v35 = vpop.f32.mrf.mxu1 }
 0x7b6   : > { %6371 = vrot.lane.b32.xlu2 %v6370_v37, %s6705_s27  ;;  %6366 = vrot.lane.b32.xlu1 %v6365_v53, %s6705_s27 }
 0x7b7   : > { %5740 = vmatmul.msk.f32.vlgmr.msra.gmra.mxu0 %vm463_vm7, %v5738_v45 }
 0x7b8   : > { %5742 = vmatmul.msk.f32.vlgmr.msra.gmra.mxu1 %vm463_vm7, %v5738_v45 }
 0x7b9   : > { %v7926_v52 = vpop.f32.mrf.mxu2  ;;  %5744 = vmatmul.msk.f32.vlgmr.msra.gmra.mxu2 %vm463_vm7, %v5738_v45 }
 0x7ba   : > { %3863 = vrot.lane.b32.xlu0 %v3859_v4, %s8807_s29 }
 0x7be   : > { %6386 = vrot.lane.b32.xlu2 %v6385_v44, %s6705_s27  ;;  %6381 = vrot.lane.b32.xlu1 %v6380_v48, %s6705_s27 }
 0x7c2   : > { %3869 = vrot.lane.b32.xlu0 %v3862_v38, %s8807_s29 }
 0x7c6   : > { %3865 = vrot.lane.b32.xlu1 %v3860_v22, %s8807_s29  ;;  %3867 = vrot.lane.b32.xlu2 %v3861_v10, %s8807_s29 }
 0x810   : > { %v6372_v5 = vpop.permute.xlu2 %6371 }
 0x811   : > { %v6374_v57 = vunpack.i.h.bf16 %v6372_v5  ;;  %v6373_v4 = vunpack.i.l.bf16 %v6372_v5 }
 0x813   : > { %v3736_v45 = vsel %vm592_vm8, %v6373_v4, %v6374_v57 }
 0x818   : > { %v6387_v36 = vpop.permute.xlu2 %6386 }
 0x819   : > { %v6389_v63 = vunpack.i.h.bf16 %v6387_v36  ;;  %v6388_v28 = vunpack.i.l.bf16 %v6387_v36 }
 0x81b   : > { %v3741_v6 = vsel %vm592_vm8, %v6388_v28, %v6389_v63 }
 0x81c   : > { %3839 = vmatpush.msra.mxu3 %v3741_v6 }
 0x820   : > { %v3868_v26 = vpop.permute.xlu2 %3867 }
 0x824   : > { %v6377_v60 = vpop.permute.xlu0 %6376 }
 0x825   : > { %v6378_v9 = vunpack.i.l.bf16 %v6377_v60  ;;  %v6379_v2 = vunpack.i.h.bf16 %v6377_v60  ;;  %v5781_v60 = vld [vmem:[%s8783_s2 + $0x50] sm:$0xf] }
 0x827   : > { %v3737_v56 = vsel %vm592_vm8, %v6374_v57, %v6378_v9 }
 0x828   : > { %3840 = vmatpush.msra.mxu3 %v3737_v56  ;;  %v6367_v41 = vpop.permute.xlu1 %6366  ;;  %v4050_v56 = vperm.slane %v5781_v60, 3 }
 0x829   : > { %v6369_v31 = vunpack.i.h.bf16 %v6367_v41  ;;  %v6368_v39 = vunpack.i.l.bf16 %v6367_v41  ;;  %v7954_v41 = vpop.f32.mrf.mxu0 }
 0x82b   : > { %v3734_v38 = vsel %vm592_vm8, %v6368_v39, %v6369_v31  ;;  %v3735_v13 = vsel %vm592_vm8, %v6369_v31, %v6373_v4  ;;  %v7956_v31 = vpop.f32.mrf.mxu1  ;;  %v4048_v39 = vperm.slane %v5781_v60, 1 }
 0x82c   : > { %v3864_v59 = vpop.permute.xlu0 %3863 }
 0x82d   : > { %v3884_v22 = vmul.f32 %v7722_v15, %v3864_v59  ;;  %v3879_v63 = vmul.f32 %v7729_v29, %v3864_v59 }
 0x830   : > { %v6382_v12 = vpop.permute.xlu1 %6381 }
 0x831   : > { %v6384_v37 = vunpack.i.h.bf16 %v6382_v12  ;;  %v6383_v53 = vunpack.i.l.bf16 %v6382_v12  ;;  %v5792_v12 = vld [vmem:[%s8783_s2 + $0x54] sm:$0xf] }
 0x833   : > { %v3738_v0 = vsel %vm592_vm8, %v6379_v2, %v6383_v53  ;;  %v3739_v17 = vsel %vm592_vm8, %v6383_v53, %v6384_v37  ;;  %v3740_v44 = vsel %vm592_vm8, %v6384_v37, %v6388_v28  ;;  %v4236_v2 = vperm.slane %v5792_v12, 1  ;;  %v7964_v37 = vpop.f32.mrf.mxu2  ;;  %v7966_v53 = vpop.f32.mrf.mxu3 }
 0x834   : > { %v3870_v48 = vpop.permute.xlu0 %3869  ;;  %3770 = vmatpush.msra.mxu0 %v3738_v0  ;;  %3793 = vmatpush.msra.mxu1 %v3739_v17  ;;  %v1381_v0 = vpop.f32.mrf.mxu0 }
 0x835   : > { %v7936_v10 = vmul.f32 0.0, %v3870_v48  ;;  %3816 = vmatpush.msra.mxu2 %v3740_v44  ;;  %v3873_v21 = vsel %vm394_vm0, %v3868_v26, %v3870_v48  ;;  %v1404_v17 = vpop.f32.mrf.mxu1  ;;  %v4047_v44 = vperm.slane %v5781_v60, 0 }
 0x836   : > { %3771 = vmatpush.msra.mxu0 %v3734_v38  ;;  %3794 = vmatpush.msra.mxu1 %v3735_v13  ;;  %v3882_v27 = vmul.f32 %v7733_v14, %v3873_v21  ;;  %v4235_v38 = vperm.slane %v5792_v12, 0 }
 0x837   : > { %v6400_v33 = vpack.i.bf16 %v3884_v22, %v7936_v10  ;;  %3817 = vmatpush.msra.mxu2 %v3736_v45  ;;  %v4237_v45 = vperm.slane %v5792_v12, 2 }
 0x838   : > { %v3866_v47 = vpop.permute.xlu1 %3865 }
 0x839   : > { %v3872_v5 = vsel %vm394_vm0, %v3866_v47, %v3868_v26  ;;  %v3871_v36 = vsel %vm394_vm0, %v3864_v59, %v3866_v47  ;;  %6401 = vrot.lane.b32.xlu0 %v6400_v33, %s8808_s7  ;;  %v4049_v59 = vperm.slane %v5781_v60, 2  ;;  %v4238_v33 = vperm.slane %v5792_v12, 3 }
 0x83a   : > { %v3881_v28 = vmul.f32 %v7741_v49, %v3872_v5  ;;  %v3880_v6 = vmul.f32 %v7737_v34, %v3871_v36  ;;  %v3886_v4 = vmul.f32 %v7756_v8, %v3872_v5  ;;  %v3885_v26 = vmul.f32 %v7672_v40, %v3871_v36  ;;  %v5803_v40 = vld [vmem:[%s8783_s2 + $0x58] sm:$0xf] }
 0x83b   : > { %v7974_v22 = vpop.f32.mrf.mxu2  ;;  %v7976_v13 = vpop.f32.mrf.mxu3  ;;  %v4425_v5 = vperm.slane %v5803_v40, 2  ;;  %v3887_v36 = vmul.f32 %v7751_v51, %v3873_v21  ;;  %v656_v21 = vadd.f32 %v7706_v46, %v7643_v30 }
 0x83c   : > { %v6395_v57 = vpack.i.bf16 %v3882_v27, %v3881_v28  ;;  %v6390_v9 = vpack.i.bf16 %v3880_v6, %v3879_v63  ;;  %v6405_v48 = vpack.i.bf16 %v3886_v4, %v3885_v26  ;;  %v1384_v27 = vpop.f32.mrf.mxu0  ;;  %v4424_v63 = vperm.slane %v5803_v40, 1 }
 0x83d   : > { %v1407_v47 = vpop.f32.mrf.mxu1  ;;  %v6410_v60 = vpack.i.bf16 %v7936_v10, %v3887_v36 }
 0x83e   : > { %6396 = vrot.lane.b32.xlu2 %v6395_v57, %s8808_s7  ;;  %6391 = vrot.lane.b32.xlu1 %v6390_v9, %s8808_s7 }
 0x841   : > { %4057 = vrot.lane.b32.xlu0 %v4050_v56, %s8809_s8  ;;  %v633_v56 = vadd.f32 %v7704_v20, %v7640_v55 }
 0x843   : > { %v7985_v28 = vpop.f32.mrf.mxu2  ;;  %v7987_v6 = vpop.f32.mrf.mxu3  ;;  %v889_v12 = vadd.f32 %v7786_v16, %v633_v56 }
 0x844   : > { %v1569_v57 = vpop.f32.mrf.mxu0 }
 0x845   : > { %v1592_v9 = vpop.f32.mrf.mxu1  ;;  %v1079_v55 = vadd.f32 %v7855_v54, %v889_v12  ;;  %v1273_v54 = vadd.f32 %v7956_v31, %v7914_v19 }
 0x846   : > { %4055 = vrot.lane.b32.xlu2 %v4049_v59, %s8809_s8  ;;  %4053 = vrot.lane.b32.xlu1 %v4048_v39, %s8809_s8  ;;  %v4426_v59 = vperm.slane %v5803_v40, 3  ;;  %v4423_v39 = vperm.slane %v5803_v40, 0 }
 0x847   : > { %v1268_v20 = vadd.f32 %v7920_v7, %v1079_v55  ;;  %v1461_v7 = vadd.f32 %v1407_v47, %v1273_v54 }
 0x849   : > { %4241 = vrot.lane.b32.xlu0 %v4236_v2, %s8810_s24  ;;  %v890_v2 = vadd.f32 %v7788_v11, %v656_v21 }
 0x84b   : > { %v7998_v4 = vpop.f32.mrf.mxu2  ;;  %v8000_v10 = vpop.f32.mrf.mxu3  ;;  %v1080_v30 = vadd.f32 %v7857_v1, %v890_v2 }
 0x84c   : > { %8812 = vst [vmem:[#allocation6_spill] sm:$0xff] %v8000_v10  ;;  %v1572_v26 = vpop.f32.mrf.mxu0 }
 0x84d   : > { %v1269_v46 = vadd.f32 %v7922_v35, %v1080_v30 }
 0x84e   : > { %6406 = vrot.lane.b32.xlu2 %v6405_v48, %s8808_s7  ;;  %4051 = vrot.lane.b32.xlu1 %v4047_v44, %s8809_s8  ;;  %v1595_v44 = vpop.f32.mrf.mxu1  ;;  %v1456_v48 = vadd.f32 %v1381_v0, %v1268_v20 }
 0x851   : > { %4239 = vrot.lane.b32.xlu0 %v4235_v38, %s8810_s24  ;;  %v1457_v38 = vadd.f32 %v1404_v17, %v1269_v46 }
 0x853   : > { %v8008_v16 = vpop.f32.mrf.mxu2  ;;  %v8010_v11 = vpop.f32.mrf.mxu3  ;;  %v1645_v1 = vadd.f32 %v1592_v9, %v1457_v38 }
 0x856   : > { %4243 = vrot.lane.b32.xlu1 %v4237_v45, %s8810_s24  ;;  %4245 = vrot.lane.b32.xlu2 %v4238_v33, %s8810_s24  ;;  %v1757_v45 = vpop.f32.mrf.mxu0  ;;  %v1780_v40 = vpop.f32.mrf.mxu1  ;;  %v1272_v33 = vadd.f32 %v7954_v41, %v7911_v25  ;;  %v5739_v25 = vld [vmem:[%s8782_s1 + $0x108] sm:$0xff] }
 0x857   : > { %v8018_v35 = vadd.f32 %v1780_v40, %v1645_v1  ;;  %5743 = vmatmul.msk.f32.gmra.mxu1 %vm463_vm7, %v5739_v25  ;;  %5741 = vmatmul.msk.f32.gmra.mxu0 %vm463_vm7, %v5739_v25 }
 0x858   : > { %v1460_v36 = vadd.f32 %v1384_v27, %v1272_v33  ;;  %5745 = vmatmul.msk.f32.gmra.mxu2 %vm463_vm7, %v5739_v25  ;;  %5747 = vmatmul.msk.f32.gmra.mxu3 %vm463_vm7, %v5739_v25  ;;  %v5750_v33 = vld [vmem:[%s8782_s1 + $0x118] sm:$0xff] }
 0x859   : > { %4431 = vrot.lane.b32.xlu0 %v4425_v5, %s8811_s15  ;;  %v1644_v5 = vadd.f32 %v1569_v57, %v1456_v48 }
 0x85a   : > { %v1648_v21 = vadd.f32 %v1572_v26, %v1460_v36  ;;  %v5749_v26 = vld [vmem:[%s8782_s1 + $0x110] sm:$0xff] }
 0x85b   : > { %v8022_v0 = vpop.f32.mrf.mxu3 }
 0x85c   : > { %8813 = vst [vmem:[#allocation7_spill] sm:$0xff] %v8022_v0 }
 0x85e   : > { %6411 = vrot.lane.b32.xlu1 %v6410_v60, %s8808_s7  ;;  %4429 = vrot.lane.b32.xlu2 %v4424_v63, %s8811_s15  ;;  %v8016_v63 = vadd.f32 %v1757_v45, %v1644_v5  ;;  %v8020_v60 = vpop.f32.mrf.mxu2  ;;  %v1760_v17 = vpop.f32.mrf.mxu0 }
 0x85f   : > { %v1783_v56 = vpop.f32.mrf.mxu1  ;;  %v8027_v19 = vadd.f32 %v1760_v17, %v1648_v21  ;;  %5753 = vmatmul.msk.f32.vlgmr.msrb.gmra.mxu1 %vm463_vm7, %v5749_v26  ;;  %5751 = vmatmul.msk.f32.vlgmr.msrb.gmra.mxu0 %vm463_vm7, %v5749_v26  ;;  %v5760_v17 = vld [vmem:[%s8782_s1 + $0x120] sm:$0xff] }
 0x860   : > { %5755 = vmatmul.msk.f32.vlgmr.msrb.gmra.mxu2 %vm463_vm7, %v5749_v26  ;;  %5757 = vmatmul.msk.f32.vlgmr.msrb.gmra.mxu3 %vm463_vm7, %v5749_v26 }
 0x863   : > { %v8034_v27 = vpop.f32.mrf.mxu3 }
 0x864   : > { %8815 = vst [vmem:[#allocation9_spill] sm:$0xff] %v8034_v27 }
 0x866   : > { %4433 = vrot.lane.b32.xlu1 %v4426_v59, %s8811_s15  ;;  %4427 = vrot.lane.b32.xlu2 %v4423_v39, %s8811_s15  ;;  %v1649_v59 = vadd.f32 %v1595_v44, %v1461_v7  ;;  %v8032_v31 = vpop.f32.mrf.mxu2  ;;  %v8037_v47 = vpop.f32.mrf.mxu0 }
 0x867   : > { %8814 = vst [vmem:[#allocation8_spill] sm:$0xff] %v8032_v31  ;;  %v8039_v57 = vpop.f32.mrf.mxu1  ;;  %5752 = vmatmul.msk.f32.gmra.mxu0 %vm463_vm7, %v5750_v33  ;;  %5754 = vmatmul.msk.f32.gmra.mxu1 %vm463_vm7, %v5750_v33 }
 0x868   : > { %v8029_v41 = vadd.f32 %v1783_v56, %v1649_v59  ;;  %5756 = vmatmul.msk.f32.gmra.mxu2 %vm463_vm7, %v5750_v33  ;;  %5758 = vmatmul.msk.f32.gmra.mxu3 %vm463_vm7, %v5750_v33 }
 0x86b   : > { %v8049_v2 = vpop.f32.mrf.mxu3 }
 0x86c   : > { %8816 = vst [vmem:[#allocation10_spill] sm:$0xff] %v8049_v2 }
 0x86e   : > { %v8043_v9 = vpop.f32.mrf.mxu0  ;;  %v8047_v12 = vpop.f32.mrf.mxu2 }
 0x86f   : > { %v8045_v39 = vpop.f32.mrf.mxu1  ;;  %5762 = vmatmul.msk.f32.vlgmr.msra.gmra.mxu0 %vm463_vm7, %v5760_v17  ;;  %5764 = vmatmul.msk.f32.vlgmr.msra.gmra.mxu1 %vm463_vm7, %v5760_v17 }
 0x870   : > { %5766 = vmatmul.msk.f32.vlgmr.msra.gmra.mxu2 %vm463_vm7, %v5760_v17  ;;  %5768 = vmatmul.msk.f32.vlgmr.msra.gmra.mxu3 %vm463_vm7, %v5760_v17  ;;  %v5761_v17 = vld [vmem:[%s8782_s1 + $0x128] sm:$0xff] }
 0x873   : > { %v8064_v20 = vpop.f32.mrf.mxu3 }
 0x874   : > { %8818 = vst [vmem:[#allocation12_spill] sm:$0xff] %v8064_v20 }
 0x876   : > { %v8058_v44 = vpop.f32.mrf.mxu0  ;;  %v8062_v30 = vpop.f32.mrf.mxu2 }
 0x877   : > { %v8060_v55 = vpop.f32.mrf.mxu1  ;;  %8817 = vst [vmem:[#allocation11_spill] sm:$0xff] %v8062_v30  ;;  %5763 = vmatmul.msk.f32.gmra.mxu0 %vm463_vm7, %v5761_v17  ;;  %5765 = vmatmul.msk.f32.gmra.mxu1 %vm463_vm7, %v5761_v17 }
 0x878   : > { %5767 = vmatmul.msk.f32.gmra.mxu2 %vm463_vm7, %v5761_v17  ;;  %5769 = vmatmul.msk.f32.gmra.mxu3 %vm463_vm7, %v5761_v17 }
 0x87b   : > { %v8072_v45 = vpop.f32.mrf.mxu3 }
 0x87c   : > { %8821 = vst [vmem:[#allocation15_spill] sm:$0xff] %v8072_v45 }
 0x87e   : > { %v8068_v48 = vpop.f32.mrf.mxu0  ;;  %v8074_v40 = vpop.f32.mrf.mxu2 }
 0x87f   : > { %8819 = vst [vmem:[#allocation13_spill] sm:$0xff] %v8068_v48  ;;  %v8070_v38 = vpop.f32.mrf.mxu1 }
 0x880   : > { %8820 = vst [vmem:[#allocation14_spill] sm:$0xff] %v8070_v38 }
 0x881   : > { %8822 = vst [vmem:[#allocation16_spill] sm:$0xff] %v8074_v40 }
 0x883   : > { %v8089_v7 = vpop.f32.mrf.mxu3 }
 0x884   : > { %8824 = vst [vmem:[#allocation18_spill] sm:$0xff] %v8089_v7 }
 0x886   : > { %v8083_v5 = vpop.f32.mrf.mxu0  ;;  %v8087_v36 = vpop.f32.mrf.mxu2 }
 0x887   : > { %v8085_v1 = vpop.f32.mrf.mxu1  ;;  %8823 = vst [vmem:[#allocation17_spill] sm:$0xff] %v8087_v36 }
 0x88b   : > { %v8117_v36 = vpop.f32.mrf.mxu3 }
 0x88c   : > { %8828 = vst [vmem:[#allocation22_spill] sm:$0xff] %v8117_v36 }
 0x88e   : > { %v8102_v25 = vpop.f32.mrf.mxu0  ;;  %v8111_v7 = vpop.f32.mrf.mxu2 }
 0x88f   : > { %8825 = vst [vmem:[#allocation19_spill] sm:$0xff] %v8102_v25  ;;  %v8104_v26 = vpop.f32.mrf.mxu1 }
 0x890   : > { %8826 = vst [vmem:[#allocation20_spill] sm:$0xff] %v8104_v26 }
 0x891   : > { %8827 = vst [vmem:[#allocation21_spill] sm:$0xff] %v8111_v7 }
 0x893   : > { %v8141_v17 = vpop.f32.mrf.mxu3 }
 0x894   : > { %8832 = vst [vmem:[#allocation26_spill] sm:$0xff] %v8141_v17 }
 0x896   : > { %v8125_v26 = vpop.f32.mrf.mxu0 }
 0x897   : > { %8829 = vst [vmem:[#allocation23_spill] sm:$0xff] %v8125_v26 }
 0x898   : > { %v8066_v46 = vpop.permute.xlu2 %6396 }
 0x899   : > { %v8804_v0 = vunpack.i.l.bf16 %v8066_v46 }
 0x89b   : > { %v8167_v26 = vpop.f32.mrf.mxu3 }
 0x89c   : > { %8837 = vst [vmem:[#allocation30_spill] sm:$0xff] %v8167_v26 }
 0x89e   : > { %v8153_v17 = vpop.f32.mrf.mxu0 }
 0x89f   : > { %8834 = vst [vmem:[#allocation27_spill] sm:$0xff] %v8153_v17 }
 0x8a0   : > { %v4056_v54 = vpop.permute.xlu2 %4055 }
 0x8a8   : > { %v8098_v56 = vpop.permute.xlu2 %6406 }
 0x8a9   : > { %v8803_v21 = vunpack.i.h.bf16 %v8098_v56  ;;  %v6408_v59 = vunpack.i.l.bf16 %v8098_v56 }
 0x8ab   : > { %v8106_v33 = vpop.permute.xlu0 %6401  ;;  %v3927_v45 = vsel %vm446_vm6, %v6408_v59, %v8803_v21 }
 0x8ac   : > { %v6404_v2 = vunpack.i.h.bf16 %v8106_v33  ;;  %3981 = vmatpush.msrb.mxu1 %v3927_v45  ;;  %v8127_v45 = vpop.f32.mrf.mxu1 }
 0x8ad   : > { %8830 = vst [vmem:[#allocation24_spill] sm:$0xff] %v8127_v45 }
 0x8ae   : > { %v3926_v20 = vsel %vm446_vm6, %v6404_v2, %v6408_v59  ;;  %v8133_v2 = vpop.f32.mrf.mxu2 }
 0x8af   : > { %3958 = vmatpush.msrb.mxu0 %v3926_v20  ;;  %8831 = vst [vmem:[#allocation25_spill] sm:$0xff] %v8133_v2  ;;  %v8138_v20 = vld [vmem:[%s8782_s1 + $0x130] sm:$0xff] }
 0x8b0   : > { %v6392_v21 = vpop.permute.xlu1 %6391  ;;  %v4246_v31 = vpop.permute.xlu2 %4245 }
 0x8b1   : > { %v6394_v7 = vunpack.i.h.bf16 %v6392_v21  ;;  %v6393_v30 = vunpack.i.l.bf16 %v6392_v21 }
 0x8b3   : > { %v3922_v36 = vsel %vm446_vm6, %v6393_v30, %v6394_v7  ;;  %v3923_v25 = vsel %vm446_vm6, %v6394_v7, %v8804_v0  ;;  %v4058_v27 = vpop.permute.xlu0 %4057 }
 0x8b4   : > { %3959 = vmatpush.msrb.mxu0 %v3922_v36  ;;  %3982 = vmatpush.msrb.mxu1 %v3923_v25  ;;  %v4061_v21 = vsel %vm722_vm2, %v4056_v54, %v4058_v27  ;;  %v4071_v59 = vmul.f32 0.0, %v4058_v27  ;;  %v8155_v10 = vpop.f32.mrf.mxu1 }
 0x8b5   : > { %v4070_v30 = vmul.f32 %v7733_v14, %v4061_v21  ;;  %5773 = vmatmul.msk.f32.vlgmr.msrb.gmra.mxu0 %vm463_vm7, %v8138_v20  ;;  %5775 = vmatmul.msk.f32.vlgmr.msrb.gmra.mxu1 %vm463_vm7, %v8138_v20  ;;  %v4075_v0 = vmul.f32 %v7751_v51, %v4061_v21  ;;  %8835 = vst [vmem:[#allocation28_spill] sm:$0xff] %v8155_v10  ;;  %v8162_v21 = vld [vmem:[%s8782_s1 + $0x138] sm:$0xff]  ;;  %v8182_v10 = vpop.f32.mrf.mxu0 }
 0x8b6   : > { %v8157_v45 = vpop.f32.mrf.mxu2  ;;  %8839 = vst [vmem:[#allocation31_spill] sm:$0xff] %v8182_v10 }
 0x8b7   : > { %v6425_v7 = vpack.i.bf16 %v4071_v59, %v4070_v30  ;;  %8836 = vst [vmem:[#allocation29_spill] sm:$0xff] %v8157_v45 }
 0x8b8   : > { %v4054_v2 = vpop.permute.xlu1 %4053 }
 0x8b9   : > { %v4060_v36 = vsel %vm722_vm2, %v4054_v2, %v4056_v54  ;;  %6426 = vrot.lane.b32.xlu2 %v6425_v7, %s8833_s12  ;;  %v5814_v7 = vld [vmem:[%s8783_s2 + $0x5c] sm:$0xf] }
 0x8ba   : > { %v4074_v27 = vmul.f32 %v7756_v8, %v4060_v36  ;;  %v4069_v25 = vmul.f32 %v7741_v49, %v4060_v36  ;;  %v4613_v36 = vperm.slane %v5814_v7, 2  ;;  %v4612_v26 = vperm.slane %v5814_v7, 1 }
 0x8bc   : > { %v6415_v30 = vpack.i.bf16 %v4075_v0, %v4074_v27  ;;  %v6420_v54 = vpack.i.bf16 %v4069_v25, %v4071_v59  ;;  %v8179_v27 = vld [vmem:[%s6853_s17 + $0x28] sm:$0xff] }
 0x8bd   : > { %5774 = vmatmul.msk.f32.gmra.mxu0 %vm463_vm7, %v8162_v21  ;;  %5776 = vmatmul.msk.f32.gmra.mxu1 %vm463_vm7, %v8162_v21 }
 0x8be   : > { %6416 = vrot.lane.b32.xlu0 %v6415_v30, %s8833_s12  ;;  %6421 = vrot.lane.b32.xlu1 %v6420_v54, %s8833_s12  ;;  %v8184_v30 = vpop.f32.mrf.mxu1  ;;  %v679_v54 = vadd.f32 %v7710_v61, %v7646_v43  ;;  %v8188_v17 = vpop.f32.mrf.mxu2  ;;  %v4614_v61 = vperm.slane %v5814_v7, 3 }
 0x8bf   : > { %8840 = vst [vmem:[#allocation32_spill] sm:$0xff] %v8184_v30 }
 0x8c0   : > { %v4052_v45 = vpop.permute.xlu1 %4051  ;;  %v891_v38 = vadd.f32 %v7792_v50, %v679_v54  ;;  %v4259_v54 = vmul.f32 0.0, %v4246_v31 }
 0x8c1   : > { %v4059_v0 = vsel %vm722_vm2, %v4052_v45, %v4054_v2  ;;  %v4072_v59 = vmul.f32 %v7722_v15, %v4052_v45  ;;  %4619 = vrot.lane.b32.xlu2 %v4613_v36, %s8838_s25  ;;  %v8190_v2 = vpop.f32.mrf.mxu3  ;;  %v4611_v15 = vperm.slane %v5814_v7, 0  ;;  %v4242_v36 = vpop.permute.xlu0 %4241  ;;  %v4067_v10 = vmul.f32 %v7729_v29, %v4052_v45 }
 0x8c2   : > { %v4073_v25 = vmul.f32 %v8179_v27, %v4059_v0  ;;  %v4068_v30 = vmul.f32 %v7737_v34, %v4059_v0 }
 0x8c4   : > { %v6430_v40 = vpack.i.bf16 %v4073_v25, %v4072_v59  ;;  %v8200_v25 = vpop.f32.mrf.mxu0  ;;  %v6435_v34 = vpack.i.bf16 %v4068_v30, %v4067_v10  ;;  %v702_v10 = vadd.f32 %v7689_v24, %v7628_v18 }
 0x8c6   : > { %4617 = vrot.lane.b32.xlu1 %v4612_v26, %s8838_s25  ;;  %6431 = vrot.lane.b32.xlu0 %v6430_v40, %s8833_s12  ;;  %v8202_v26 = vpop.f32.mrf.mxu1  ;;  %v1081_v40 = vadd.f32 %v7861_v62, %v891_v38  ;;  %v8206_v29 = vpop.f32.mrf.mxu2  ;;  %v6399_v38 = vunpack.i.h.bf16 %v8066_v46 }
 0x8c8   : > { %v4244_v48 = vpop.permute.xlu1 %4243  ;;  %v1270_v62 = vadd.f32 %v7926_v52, %v1081_v40 }
 0x8c9   : > { %v4249_v43 = vsel %vm912_vm3, %v4244_v48, %v4246_v31  ;;  %4615 = vrot.lane.b32.xlu2 %v4611_v15, %s8838_s25  ;;  %v4248_v50 = vsel %vm912_vm3, %v4242_v36, %v4244_v48  ;;  %v8208_v45 = vpop.f32.mrf.mxu3  ;;  %v4240_v31 = vpop.permute.xlu0 %4239 }
 0x8ca   : > { %v4258_v59 = vmul.f32 %v7733_v14, %v4249_v43  ;;  %v4257_v14 = vmul.f32 %v7741_v49, %v4248_v50  ;;  %v4262_v7 = vmul.f32 %v7756_v8, %v4248_v50  ;;  %v4263_v15 = vmul.f32 %v7751_v51, %v4249_v43 }
 0x8cb   : > { %v1458_v52 = vadd.f32 %v7974_v22, %v1270_v62  ;;  %v8841_v43 = vunpack.i.h.bf16 %v8098_v56  ;;  %v4247_v40 = vsel %vm912_vm3, %v4240_v31, %v4242_v36  ;;  %v8242_v56 = vld [vmem:[%s8783_s2 + $0x60] sm:$0xf] }
 0x8cc   : > { %v6450_v0 = vpack.i.bf16 %v4259_v54, %v4258_v59  ;;  %v6440_v49 = vpack.i.bf16 %v4263_v15, %v4262_v7  ;;  %v8221_v8 = vpop.f32.mrf.mxu0  ;;  %v1274_v15 = vadd.f32 %v7964_v37, %v7918_v42  ;;  %v1275_v42 = vadd.f32 %v7966_v53, %v7899_v23 }
 0x8cd   : > { %v1646_v62 = vadd.f32 %v7998_v4, %v1458_v52  ;;  %v4800_v4 = vperm.slane %v8242_v56, 1  ;;  %v8288_v52 = vld [vmem:[%s6853_s17 + $0x8] sm:$0xff] }
 0x8ce   : > { %4621 = vrot.lane.b32.xlu0 %v4614_v61, %s8838_s25  ;;  %6436 = vrot.lane.b32.xlu1 %v6435_v34, %s8833_s12  ;;  %v6403_v61 = vunpack.i.l.bf16 %v8106_v33  ;;  %v6445_v34 = vpack.i.bf16 %v4257_v14, %v4259_v54  ;;  %v8223_v51 = vpop.f32.mrf.mxu1  ;;  %v8231_v50 = vpop.f32.mrf.mxu2  ;;  %v892_v54 = vadd.f32 %v7771_v58, %v702_v10  ;;  %v8248_v14 = vld [vmem:[%s6853_s17 + $0x20] sm:$0xff]  ;;  %v4261_v58 = vmul.f32 %v8179_v27, %v4247_v40 }
 0x8cf   : > { %v4260_v7 = vmul.f32 %v8248_v14, %v4240_v31  ;;  %v2021_v10 = vadd.f32 %v8039_v57, %v8018_v35  ;;  %v1834_v57 = vadd.f32 %v8020_v60, %v1646_v62  ;;  %v4256_v60 = vmul.f32 %v8288_v52, %v4247_v40  ;;  %v8847_v62 = vld [vmem:[#allocation23_spill] sm:$0xff] }
 0x8d0   : > { %v6412_v48 = vpop.permute.xlu1 %6411  ;;  %v3925_v36 = vsel %vm446_vm6, %v6399_v38, %v6403_v61 }
 0x8d1   : > { %v6414_v30 = vunpack.i.h.bf16 %v6412_v48  ;;  %v6413_v59 = vunpack.i.l.bf16 %v6412_v48  ;;  %6451 = vrot.lane.b32.xlu2 %v6450_v0, %s8838_s25  ;;  %v8233_v33 = vpop.f32.mrf.mxu3  ;;  %v8842_v0 = vunpack.i.l.bf16 %v8066_v46  ;;  %v4801_v46 = vperm.slane %v8242_v56, 2  ;;  %v4432_v61 = vpop.permute.xlu0 %4431 }
 0x8d2   : > { %v2020_v48 = vadd.f32 %v8037_v47, %v8016_v63  ;;  %v6455_v37 = vpack.i.bf16 %v4261_v58, %v4260_v7  ;;  %v1462_v47 = vadd.f32 %v7985_v28, %v1274_v15  ;;  %v2211_v23 = vadd.f32 %v8060_v55, %v2021_v10  ;;  %v8845_v7 = vld [vmem:[#allocation8_spill] sm:$0xff] }
 0x8d3   : > { %v3928_v18 = vsel %vm446_vm6, %v8841_v43, %v6413_v59  ;;  %v3929_v24 = vsel %vm446_vm6, %v6413_v59, %v6414_v30  ;;  %v3924_v22 = vsel %vm446_vm6, %v8842_v0, %v6399_v38  ;;  %v1082_v38 = vadd.f32 %v7834_v32, %v892_v54  ;;  %v8843_v54 = vld [vmem:[#allocation13_spill] sm:$0xff]  ;;  %v8844_v0 = vld [vmem:[#allocation14_spill] sm:$0xff] }
 0x8d4   : > { %4004 = vmatpush.msrb.mxu2 %v3928_v18  ;;  %4027 = vmatpush.msrb.mxu3 %v3929_v24  ;;  %v8269_v63 = vpop.f32.mrf.mxu0  ;;  %v2210_v32 = vadd.f32 %v8058_v44, %v2020_v48  ;;  %v1463_v59 = vadd.f32 %v7987_v6, %v1275_v42  ;;  %v4430_v44 = vpop.permute.xlu2 %4429  ;;  %v1650_v6 = vadd.f32 %v8008_v16, %v1462_v47  ;;  %v8848_v48 = vld [vmem:[#allocation24_spill] sm:$0xff]  ;;  %v8849_v42 = vld [vmem:[#allocation6_spill] sm:$0xff] }
 0x8d5   : > { %v1271_v30 = vadd.f32 %v7902_v3, %v1082_v38  ;;  %v4799_v3 = vperm.slane %v8242_v56, 0  ;;  %v2022_v55 = vadd.f32 %v8047_v12, %v1834_v57  ;;  %v2024_v43 = vadd.f32 %v8043_v9, %v8027_v19  ;;  %v8310_v19 = vld [vmem:[%s6853_s17 + $0x18] sm:$0xff] }
 0x8d6   : > { %6441 = vrot.lane.b32.xlu0 %v6440_v49, %s8838_s25  ;;  %6446 = vrot.lane.b32.xlu1 %v6445_v34, %s8838_s25  ;;  %v8271_v35 = vpop.f32.mrf.mxu1  ;;  %v8284_v34 = vld [vmem:[%s6853_s17] sm:$0xff]  ;;  %v2400_v18 = vadd.f32 %v8083_v5, %v2210_v32  ;;  %v2401_v24 = vadd.f32 %v8085_v1, %v2211_v23  ;;  %v1651_v40 = vadd.f32 %v8010_v11, %v1463_v59  ;;  %v8331_v32 = vld [vmem:[%s6853_s17 + $0x10] sm:$0xff] }
 0x8d7   : > { %4005 = vmatpush.msrb.mxu2 %v3924_v22  ;;  %4028 = vmatpush.msrb.mxu3 %v3925_v36  ;;  %v4255_v28 = vmul.f32 %v8284_v34, %v4240_v31  ;;  %v2025_v31 = vadd.f32 %v8045_v39, %v8029_v41  ;;  %v1459_v12 = vadd.f32 %v7976_v13, %v1271_v30  ;;  %v4802_v39 = vperm.slane %v8242_v56, 3  ;;  %v8335_v30 = vld [vmem:[%s6853_s17 + $0x30] sm:$0xff] }
 0x8d8   : > { %5777 = vmatmul.msk.f32.vlgmr.msrb.gmra.mxu2 %vm463_vm7, %v8138_v20  ;;  %5779 = vmatmul.msk.f32.vlgmr.msrb.gmra.mxu3 %vm463_vm7, %v8138_v20  ;;  %v8275_v20 = vpop.f32.mrf.mxu2  ;;  %v4434_v49 = vpop.permute.xlu1 %4433  ;;  %v4436_v13 = vsel %vm1102_vm4, %v4430_v44, %v4432_v61  ;;  %v1838_v58 = vadd.f32 %v8845_v7, %v1650_v6  ;;  %v2590_v56 = vadd.f32 %v8847_v62, %v2400_v18 }
 0x8d9   : > { %4807 = vrot.lane.b32.xlu2 %v4801_v46, %s8833_s12  ;;  %v8279_v53 = vpop.f32.mrf.mxu3  ;;  %v4437_v16 = vsel %vm1102_vm4, %v4432_v61, %v4434_v49  ;;  %v6460_v9 = vpack.i.bf16 %v4256_v60, %v4255_v28  ;;  %v2215_v22 = vadd.f32 %v8844_v0, %v2025_v31  ;;  %v4447_v11 = vmul.f32 0.0, %v4434_v49  ;;  %v8846_v46 = vld [vmem:[#allocation16_spill] sm:$0xff]  ;;  %v8339_v61 = vld [vmem:[%s6853_s17 + $0x38] sm:$0xff]  ;;  %v8851_v28 = vld [vmem:[#allocation19_spill] sm:$0xff] }
 0x8da   : > { %v4446_v41 = vmul.f32 %v8310_v19, %v4437_v16  ;;  %v2212_v15 = vadd.f32 %v8846_v46, %v2022_v55  ;;  %v2591_v10 = vadd.f32 %v8848_v48, %v2401_v24  ;;  %v4445_v23 = vmul.f32 %v8331_v32, %v4436_v13  ;;  %v8853_v55 = vld [vmem:[#allocation11_spill] sm:$0xff]  ;;  %v8854_v31 = vld [vmem:[#allocation21_spill] sm:$0xff]  ;;  %v8858_v0 = vld [vmem:[#allocation12_spill] sm:$0xff] }
 0x8db   : > { %v4450_v59 = vmul.f32 %v8335_v30, %v4436_v13  ;;  %v4451_v49 = vmul.f32 %v8339_v61, %v4437_v16  ;;  %v8855_v24 = vld [vmem:[#allocation31_spill] sm:$0xff] }
 0x8dc   : > { %v3021_v5 = vpop.f32.mrf.mxu0  ;;  %v6475_v57 = vpack.i.bf16 %v4447_v11, %v4446_v41  ;;  %v2402_v18 = vadd.f32 %v8854_v31, %v2212_v15  ;;  %v6470_v16 = vpack.i.bf16 %v4445_v23, %v4447_v11  ;;  %v8863_v23 = vld [vmem:[#allocation10_spill] sm:$0xff] }
 0x8dd   : > { %v6465_v7 = vpack.i.bf16 %v4451_v49, %v4450_v59  ;;  %v8864_v49 = vld [vmem:[#allocation18_spill] sm:$0xff] }
 0x8de   : > { %6456 = vrot.lane.b32.xlu0 %v6455_v37, %s8838_s25  ;;  %4805 = vrot.lane.b32.xlu1 %v4800_v4, %s8833_s12  ;;  %v3044_v1 = vpop.f32.mrf.mxu1  ;;  %v1647_v37 = vadd.f32 %v8849_v42, %v1459_v12  ;;  %v8850_v4 = vld [vmem:[#allocation9_spill] sm:$0xff]  ;;  %v2780_v12 = vadd.f32 %v8855_v24, %v2590_v56 }
 0x8df   : > { %v1839_v47 = vadd.f32 %v8850_v4, %v1651_v40  ;;  %v8856_v40 = vld [vmem:[#allocation32_spill] sm:$0xff]  ;;  %v8861_v42 = vld [vmem:[#allocation17_spill] sm:$0xff] }
 0x8e0   : > { %5778 = vmatmul.msk.f32.gmra.mxu2 %vm463_vm7, %v8162_v21  ;;  %5780 = vmatmul.msk.f32.gmra.mxu3 %vm463_vm7, %v8162_v21  ;;  %v2214_v21 = vadd.f32 %v8843_v54, %v2024_v43  ;;  %v8318_v36 = vpop.f32.mrf.mxu2  ;;  %v2026_v43 = vadd.f32 %v8853_v55, %v1838_v58  ;;  %v2781_v41 = vadd.f32 %v8856_v40, %v2591_v10  ;;  %v8860_v58 = vld [vmem:[#allocation28_spill] sm:$0xff]  ;;  %v8862_v4 = vld [vmem:[#allocation29_spill] sm:$0xff] }
 0x8e1   : > { %4803 = vrot.lane.b32.xlu2 %v4799_v3, %s8833_s12  ;;  %v8324_v38 = vpop.f32.mrf.mxu3  ;;  %v8852_v3 = vld [vmem:[#allocation20_spill] sm:$0xff]  ;;  %v2027_v13 = vadd.f32 %v8858_v0, %v1839_v47  ;;  %v2908_v11 = vadd.f32 %v8221_v8, %v2780_v12  ;;  %v8866_v12 = vld [vmem:[#allocation15_spill] sm:$0xff] }
 0x8e2   : > { %v2404_v60 = vadd.f32 %v8851_v28, %v2214_v21  ;;  %v2405_v6 = vadd.f32 %v8852_v3, %v2215_v22  ;;  %v8859_v22 = vld [vmem:[#allocation27_spill] sm:$0xff]  ;;  %v2216_v10 = vadd.f32 %v8861_v42, %v2026_v43  ;;  %v2592_v28 = vadd.f32 %v8862_v4, %v2402_v18 }
 0x8e3   : > { %v2909_v47 = vadd.f32 %v8223_v51, %v2781_v41  ;;  %v8865_v51 = vld [vmem:[#allocation25_spill] sm:$0xff]  ;;  %v3096_v18 = vadd.f32 %v3021_v5, %v2908_v11  ;;  %v8867_v41 = vld [vmem:[#allocation26_spill] sm:$0xff] }
 0x8e4   : > { %v3024_v21 = vpop.f32.mrf.mxu0  ;;  %v2594_v62 = vadd.f32 %v8859_v22, %v2404_v60  ;;  %v2595_v48 = vadd.f32 %v8860_v58, %v2405_v6  ;;  %v2217_v60 = vadd.f32 %v8864_v49, %v2027_v13  ;;  %v2406_v43 = vadd.f32 %v8865_v51, %v2216_v10  ;;  %v8868_v58 = vld [vmem:[#allocation22_spill] sm:$0xff] }
 0x8e5   : > { %v2782_v31 = vadd.f32 %v8206_v29, %v2592_v28  ;;  %v3097_v24 = vadd.f32 %v3044_v1, %v2909_v47  ;;  %v8869_v11 = vld [vmem:[#allocation30_spill] sm:$0xff] }
 0x8e6   : > { %4809 = vrot.lane.b32.xlu0 %v4802_v39, %s8833_s12  ;;  %6461 = vrot.lane.b32.xlu1 %v6460_v9, %s8838_s25  ;;  %v4428_v9 = vpop.permute.xlu2 %4427  ;;  %v8857_v39 = vld [vmem:[#allocation7_spill] sm:$0xff]  ;;  %v3047_v46 = vpop.f32.mrf.mxu1  ;;  %v2784_v55 = vadd.f32 %v8200_v25, %v2594_v62  ;;  %v2785_v8 = vadd.f32 %v8202_v26, %v2595_v48  ;;  %v2596_v22 = vadd.f32 %v8188_v17, %v2406_v43 }
 0x8e7   : > { %v1835_v54 = vadd.f32 %v8857_v39, %v1647_v37  ;;  %v4435_v15 = vsel %vm1102_vm4, %v4428_v9, %v4430_v44  ;;  %v5836_v37 = vld [vmem:[%s8783_s2 + $0x64] sm:$0xf]  ;;  %v4448_v3 = vmul.f32 %v8248_v14, %v4428_v9  ;;  %v2407_v39 = vadd.f32 %v8867_v41, %v2217_v60 }
 0x8e8   : > { %v3067_v56 = vpop.f32.mrf.mxu2  ;;  %v4989_v44 = vperm.slane %v5836_v37, 2  ;;  %v4449_v6 = vmul.f32 %v8179_v27, %v4435_v15  ;;  %v4988_v0 = vperm.slane %v5836_v37, 1  ;;  %v2912_v25 = vadd.f32 %v8269_v63, %v2784_v55 }
 0x8e9   : > { %6476 = vrot.lane.b32.xlu2 %v6475_v57, %s8811_s15  ;;  %v8361_v57 = vpop.f32.mrf.mxu3  ;;  %v2023_v59 = vadd.f32 %v8863_v23, %v1835_v54  ;;  %v2913_v26 = vadd.f32 %v8271_v35, %v2785_v8  ;;  %v2910_v29 = vadd.f32 %v8275_v20, %v2782_v31  ;;  %v2597_v42 = vadd.f32 %v8190_v2, %v2407_v39 }
 0x8ea   : > { %v6480_v54 = vpack.i.bf16 %v4449_v6, %v4448_v3  ;;  %v4987_v10 = vperm.slane %v5836_v37, 0  ;;  %v4443_v4 = vmul.f32 %v8284_v34, %v4428_v9  ;;  %v4444_v28 = vmul.f32 %v8288_v52, %v4435_v15 }
 0x8eb   : > { %v2213_v40 = vadd.f32 %v8866_v12, %v2023_v59  ;;  %v3100_v63 = vadd.f32 %v3024_v21, %v2912_v25  ;;  %v3101_v17 = vadd.f32 %v3047_v46, %v2913_v26  ;;  %v2786_v35 = vadd.f32 %v8231_v50, %v2596_v22 }
 0x8ec   : > { %v3209_v13 = vpop.f32.mrf.mxu0  ;;  %v3098_v20 = vadd.f32 %v3067_v56, %v2910_v29  ;;  %v2787_v23 = vadd.f32 %v8233_v33, %v2597_v42  ;;  %v6485_v2 = vpack.i.bf16 %v4444_v28, %v4443_v4  ;;  %v4990_v59 = vperm.slane %v5836_v37, 3 }
 0x8ed   : > { %v3284_v1 = vadd.f32 %v3209_v13, %v3096_v18  ;;  %v2403_v48 = vadd.f32 %v8868_v58, %v2213_v40  ;;  %v2914_v3 = vadd.f32 %v8318_v36, %v2786_v35 }
 0x8ee   : > { %6471 = vrot.lane.b32.xlu1 %v6470_v16, %s8811_s15  ;;  %6466 = vrot.lane.b32.xlu0 %v6465_v7, %s8811_s15  ;;  %v3232_v16 = vpop.f32.mrf.mxu1  ;;  %v2915_v56 = vadd.f32 %v8324_v38, %v2787_v23 }
 0x8ef   : > { %v3285_v62 = vadd.f32 %v3232_v16, %v3097_v24  ;;  %v2593_v47 = vadd.f32 %v8869_v11, %v2403_v48 }
 0x8f0   : > { %v3070_v7 = vpop.f32.mrf.mxu2 }
 0x8f1   : > { %4995 = vrot.lane.b32.xlu2 %v4989_v44, %s8808_s7  ;;  %v3093_v5 = vpop.f32.mrf.mxu3  ;;  %v2783_v50 = vadd.f32 %v8208_v45, %v2593_v47  ;;  %v3102_v33 = vadd.f32 %v3070_v7, %v2914_v3 }
 0x8f2   : > { %v3103_v6 = vadd.f32 %v3093_v5, %v2915_v56 }
 0x8f3   : > { %v2911_v37 = vadd.f32 %v8279_v53, %v2783_v50 }
 0x8f4   : > { %v3212_v9 = vpop.f32.mrf.mxu0 }
 0x8f5   : > { %v3288_v60 = vadd.f32 %v3212_v9, %v3100_v63  ;;  %v3099_v24 = vadd.f32 %v8361_v57, %v2911_v37 }
 0x8f6   : > { %4993 = vrot.lane.b32.xlu1 %v4988_v0, %s8808_s7  ;;  %6481 = vrot.lane.b32.xlu0 %v6480_v54, %s8811_s15  ;;  %v3235_v49 = vpop.f32.mrf.mxu1 }
 0x8f7   : > { %v3289_v44 = vadd.f32 %v3235_v49, %v3101_v17 }
 0x8f8   : > { %v3255_v15 = vpop.f32.mrf.mxu2 }
 0x8f9   : > { %4991 = vrot.lane.b32.xlu2 %v4987_v10, %s8808_s7  ;;  %v3278_v21 = vpop.f32.mrf.mxu3  ;;  %v3286_v46 = vadd.f32 %v3255_v15, %v3098_v20 }
 0x8fa   : > { %v3287_v12 = vadd.f32 %v3278_v21, %v3099_v24 }
 0x8fc   : > { %v3397_v55 = vpop.f32.mrf.mxu0 }
 0x8fd   : > { %v3472_v43 = vadd.f32 %v3397_v55, %v3284_v1 }
 0x8fe   : > { %6486 = vrot.lane.b32.xlu1 %v6485_v2, %s8811_s15  ;;  %4997 = vrot.lane.b32.xlu0 %v4990_v59, %s8808_s7  ;;  %v3420_v8 = vpop.f32.mrf.mxu1  ;;  %s5561_s7 = sshll.u32 %s277_s10, 6 }
 0x8ff   : > { %v3473_v31 = vadd.f32 %v3420_v8, %v3285_v62 }
 0x900   : > { %v3258_v51 = vpop.f32.mrf.mxu2 }
 0x901   : > { %v3290_v36 = vadd.f32 %v3258_v51, %v3102_v33  ;;  %v3281_v18 = vpop.f32.mrf.mxu3 }
 0x902   : > { %v3291_v45 = vadd.f32 %v3281_v18, %v3103_v6 }
 0x904   : > { %v3400_v38 = vpop.f32.mrf.mxu0 }
 0x905   : > { %v3476_v25 = vadd.f32 %v3400_v38, %v3288_v60  ;;  %v5782_v38 = vld [vmem:[%s8782_s1 + $0x140] sm:$0xff] }
 0x906   : > { %v3423_v40 = vpop.f32.mrf.mxu1 }
 0x907   : > { %v3477_v26 = vadd.f32 %v3423_v40, %v3289_v44 }
 0x908   : > { %v3443_v41 = vpop.f32.mrf.mxu2 }
 0x909   : > { %v3474_v39 = vadd.f32 %v3443_v41, %v3286_v46  ;;  %v3466_v54 = vpop.f32.mrf.mxu3 }
 0x90a   : > { %v3475_v0 = vadd.f32 %v3466_v54, %v3287_v12 }
 0x90c   : > { %v3585_v13 = vpop.f32.mrf.mxu0 }
 0x90d   : > { %v3660_v62 = vadd.f32 %v3585_v13, %v3472_v43 }
 0x90e   : > { %v3608_v53 = vpop.f32.mrf.mxu1 }
 0x90f   : > { %v3661_v57 = vadd.f32 %v3608_v53, %v3473_v31 }
 0x910   : > { %v3446_v16 = vpop.f32.mrf.mxu2 }
 0x911   : > { %v3469_v7 = vpop.f32.mrf.mxu3  ;;  %v3478_v22 = vadd.f32 %v3446_v16, %v3290_v36 }
 0x912   : > { %v3479_v29 = vadd.f32 %v3469_v7, %v3291_v45 }
 0x913   : > { %v6427_v4 = vpop.permute.xlu2 %6426 }
 0x914   : > { %v3588_v5 = vpop.f32.mrf.mxu0  ;;  %v6429_v46 = vunpack.i.h.bf16 %v6427_v4  ;;  %v6428_v50 = vunpack.i.l.bf16 %v6427_v4 }
 0x915   : > { %v3664_v11 = vadd.f32 %v3588_v5, %v3476_v25 }
 0x916   : > { %v3611_v42 = vpop.f32.mrf.mxu1  ;;  %v4113_v12 = vsel %vm8873_vm11, %v6428_v50, %v6429_v46 }
 0x917   : > { %v3665_v47 = vadd.f32 %v3611_v42, %v3477_v26 }
 0x918   : > { %v3631_v1 = vpop.f32.mrf.mxu2 }
 0x919   : > { %v3662_v58 = vadd.f32 %v3631_v1, %v3474_v39  ;;  %v3654_v48 = vpop.f32.mrf.mxu3 }
 0x91a   : > { %v3663_v10 = vadd.f32 %v3654_v48, %v3475_v0 }
 0x91b   : > { %v4620_v2 = vpop.permute.xlu2 %4619 }
 0x91c   : > { %v3773_v28 = vpop.f32.mrf.mxu0 }
 0x91d   : > { %v3848_v44 = vadd.f32 %v3773_v28, %v3660_v62  ;;  %v5783_v62 = vld [vmem:[%s8782_s1 + $0x148] sm:$0xff] }
 0x91e   : > { %v3796_v35 = vpop.f32.mrf.mxu1 }
 0x91f   : > { %v3849_v3 = vadd.f32 %v3796_v35, %v3661_v57 }
 0x920   : > { %v3634_v63 = vpop.f32.mrf.mxu2 }
 0x921   : > { %v3657_v17 = vpop.f32.mrf.mxu3  ;;  %v3666_v23 = vadd.f32 %v3634_v63, %v3478_v22 }
 0x922   : > { %v3667_v20 = vadd.f32 %v3657_v17, %v3479_v29 }
 0x923   : > { %v8403_v36 = vpop.permute.xlu2 %4615 }
 0x924   : > { %v3776_v59 = vpop.f32.mrf.mxu0 }
 0x925   : > { %v8414_v54 = vadd.f32 %v3776_v59, %v3664_v11 }
 0x926   : > { %v3799_v15 = vpop.f32.mrf.mxu1 }
 0x927   : > { %v8416_v0 = vadd.f32 %v3799_v15, %v3665_v47 }
 0x928   : > { %v3819_v9 = vpop.f32.mrf.mxu2 }
 0x929   : > { %v3842_v49 = vpop.f32.mrf.mxu3  ;;  %v8399_v21 = vadd.f32 %v3819_v9, %v3662_v58 }
 0x92a   : > { %v8397_v60 = vadd.f32 %v3842_v49, %v3663_v10 }
 0x92b   : > { %v6452_v5 = vpop.permute.xlu2 %6451 }
 0x92c   : > { %v6453_v15 = vunpack.i.l.bf16 %v6452_v5 }
 0x930   : > { %v6417_v56 = vpop.permute.xlu0 %6416  ;;  %v6422_v33 = vpop.permute.xlu1 %6421 }
 0x931   : > { %v6419_v37 = vunpack.i.h.bf16 %v6417_v56  ;;  %v6418_v6 = vunpack.i.l.bf16 %v6417_v56  ;;  %v6424_v55 = vunpack.i.h.bf16 %v6422_v33  ;;  %v6423_v8 = vunpack.i.l.bf16 %v6422_v33  ;;  %v3822_v18 = vpop.f32.mrf.mxu2  ;;  %v3845_v40 = vpop.f32.mrf.mxu3 }
 0x932   : > { %v3961_v51 = vpop.f32.mrf.mxu0  ;;  %v3984_v41 = vpop.f32.mrf.mxu1  ;;  %v8412_v39 = vadd.f32 %v3845_v40, %v3667_v20  ;;  %v8418_v13 = vadd.f32 %v3822_v18, %v3666_v23  ;;  %v6454_v56 = vunpack.i.h.bf16 %v6452_v5  ;;  %v4631_v40 = vmul.f32 %v8284_v34, %v8403_v36 }
 0x933   : > { %v4116_v43 = vsel %vm8870_vm5, %v6418_v6, %v6419_v37  ;;  %v4117_v31 = vsel %vm8871_vm9, %v6419_v37, %v6423_v8  ;;  %v8405_v24 = vadd.f32 %v3961_v51, %v3848_v44  ;;  %v4112_v45 = vsel %vm8872_vm10, %v6424_v55, %v6428_v50  ;;  %vm8878_vm9 = vmmov %vm8870_vm5  ;;  %v4808_v49 = vpop.permute.xlu2 %4807 }
 0x934   : > { %4192 = vmatpush.msra.mxu2 %v4116_v43  ;;  %4215 = vmatpush.msra.mxu3 %v4117_v31  ;;  %v8420_v53 = vadd.f32 %v3984_v41, %v3849_v3  ;;  %vm8879_vm10 = vmmov %vm8876_vm14  ;;  %v4636_v44 = vmul.f32 %v8248_v14, %v8403_v36 }
 0x935   : > { %vm8880_vm11 = vmmov %vm8879_vm10 }
 0x936   : > { %4193 = vmatpush.msra.mxu2 %v4112_v45  ;;  %4216 = vmatpush.msra.mxu3 %v4113_v12  ;;  %v5793_v12 = vld [vmem:[%s8782_s1 + $0x150] sm:$0xff] }
 0x937   : > { %5788 = vmatmul.msk.f32.vlgmr.msra.gmra.mxu2 %vm463_vm7, %v5782_v38  ;;  %5790 = vmatmul.msk.f32.vlgmr.msra.gmra.mxu3 %vm463_vm7, %v5782_v38 }
 0x938   : > { %v6432_v16 = vpop.permute.xlu0 %6431  ;;  %v4618_v25 = vpop.permute.xlu1 %4617 }
 0x939   : > { %v6434_v26 = vunpack.i.h.bf16 %v6432_v16  ;;  %v6433_v7 = vunpack.i.l.bf16 %v6432_v16  ;;  %v4624_v1 = vsel %vm8876_vm14, %v4618_v25, %v4620_v2  ;;  %v4623_v9 = vsel %vm8879_vm10, %v8403_v36, %v4618_v25  ;;  %vm8883_vm14 = vmmov %vm8879_vm10 }
 0x93a   : > { %v4633_v57 = vmul.f32 %v8331_v32, %v4624_v1  ;;  %v4638_v58 = vmul.f32 %v8335_v30, %v4624_v1  ;;  %v4637_v3 = vmul.f32 %v8179_v27, %v4623_v9  ;;  %v4301_v18 = vsel %vm8883_vm14, %v6453_v15, %v6454_v56 }
 0x93b   : > { %v4114_v22 = vsel %vm8874_vm12, %v6433_v7, %v6434_v26  ;;  %v4115_v29 = vsel %vm8875_vm13, %v6434_v26, %v6418_v6  ;;  %vm8881_vm12 = vmmov %vm8879_vm10  ;;  %v4632_v41 = vmul.f32 %v8288_v52, %v4623_v9  ;;  %v4804_v16 = vpop.permute.xlu2 %4803 }
 0x93c   : > { %4146 = vmatpush.msra.mxu0 %v4114_v22  ;;  %4169 = vmatpush.msra.mxu1 %v4115_v29  ;;  %vm8882_vm13 = vmmov %vm8879_vm10  ;;  %v6505_v45 = vpack.i.bf16 %v4637_v3, %v4636_v44 }
 0x93d   : > { %v6510_v29 = vpack.i.bf16 %v4632_v41, %v4631_v40 }
 0x93f   : > { %5789 = vmatmul.msk.f32.gmra.mxu2 %vm463_vm7, %v5783_v62  ;;  %5791 = vmatmul.msk.f32.gmra.mxu3 %vm463_vm7, %v5783_v62 }
 0x940   : > { %v4622_v48 = vpop.permute.xlu0 %4621  ;;  %v6437_v42 = vpop.permute.xlu1 %6436 }
 0x941   : > { %v4625_v10 = vsel %vm8877_vm15, %v4620_v2, %v4622_v48  ;;  %v4635_v4 = vmul.f32 0.0, %v4622_v48  ;;  %v6439_v28 = vunpack.i.h.bf16 %v6437_v42  ;;  %v6438_v63 = vunpack.i.l.bf16 %v6437_v42  ;;  %v5847_v2 = vld [vmem:[%s8783_s2 + $0x68] sm:$0xf]  ;;  %vm8884_vm15 = vmmov %vm8879_vm10 }
 0x942   : > { %v4634_v17 = vmul.f32 %v8310_v19, %v4625_v10  ;;  %v4639_v35 = vmul.f32 %v8339_v61, %v4625_v10  ;;  %v5176_v33 = vperm.slane %v5847_v2, 1  ;;  %v5178_v5 = vperm.slane %v5847_v2, 3 }
 0x943   : > { %v6495_v20 = vpack.i.bf16 %v4633_v57, %v4635_v4  ;;  %v4110_v11 = vsel %vm8870_vm5, %v6438_v63, %v6439_v28  ;;  %v4111_v47 = vsel %vm8878_vm9, %v6439_v28, %v6424_v55  ;;  %vm8885_vm5 = vmmov %vm8879_vm10  ;;  %v5794_v57 = vld [vmem:[%s8782_s1 + $0x158] sm:$0xff] }
 0x944   : > { %v6500_v23 = vpack.i.bf16 %v4635_v4, %v4634_v17  ;;  %v6490_v59 = vpack.i.bf16 %v4639_v35, %v4638_v58  ;;  %4147 = vmatpush.msra.mxu0 %v4110_v11  ;;  %4170 = vmatpush.msra.mxu1 %v4111_v47  ;;  %v5175_v58 = vperm.slane %v5847_v2, 0  ;;  %vm8886_vm10 = vmmov %vm8878_vm9  ;;  %v6477_v47 = vpop.permute.xlu2 %6476 }
 0x945   : > { %6496 = vrot.lane.b32.xlu1 %v6495_v20, %s8810_s24  ;;  %5784 = vmatmul.msk.f32.vlgmr.msra.gmra.mxu0 %vm463_vm7, %v5782_v38  ;;  %v6479_v56 = vunpack.i.h.bf16 %v6477_v47 }
 0x946   : > { %5786 = vmatmul.msk.f32.vlgmr.msra.gmra.mxu1 %vm463_vm7, %v5782_v38  ;;  %6501 = vrot.lane.b32.xlu2 %v6500_v23, %s8810_s24  ;;  %v5177_v38 = vperm.slane %v5847_v2, 2 }
 0x947   : > { %6491 = vrot.lane.b32.xlu0 %v6490_v59, %s8810_s24 }
 0x948   : > { %v6442_v46 = vpop.permute.xlu0 %6441  ;;  %v6447_v50 = vpop.permute.xlu1 %6446 }
 0x949   : > { %v6444_v37 = vunpack.i.h.bf16 %v6442_v46  ;;  %v6443_v6 = vunpack.i.l.bf16 %v6442_v46  ;;  %v6449_v55 = vunpack.i.h.bf16 %v6447_v50  ;;  %v6448_v8 = vunpack.i.l.bf16 %v6447_v50 }
 0x94b   : > { %v4304_v51 = vsel %vm8880_vm11, %v6443_v6, %v6444_v37  ;;  %v4305_v43 = vsel %vm8881_vm12, %v6444_v37, %v6448_v8  ;;  %v4300_v31 = vsel %vm8882_vm13, %v6449_v55, %v6453_v15  ;;  %vm8887_vm11 = vmmov %vm8885_vm5  ;;  %v4824_v37 = vmul.f32 %v8248_v14, %v4804_v16 }
 0x94c   : > { %4380 = vmatpush.msrb.mxu2 %v4304_v51  ;;  %4403 = vmatpush.msrb.mxu3 %v4305_v43  ;;  %vm8888_vm12 = vmmov %vm8885_vm5 }
 0x94d   : > { %5181 = vrot.lane.b32.xlu1 %v5176_v33, %s6705_s27  ;;  %5785 = vmatmul.msk.f32.gmra.mxu0 %vm463_vm7, %v5783_v62  ;;  %vm8889_vm13 = vmmov %vm8878_vm9  ;;  %v6478_v33 = vunpack.i.l.bf16 %v6477_v47 }
 0x94e   : > { %5787 = vmatmul.msk.f32.gmra.mxu1 %vm463_vm7, %v5783_v62  ;;  %4381 = vmatpush.msrb.mxu2 %v4300_v31 }
 0x94f   : > { %6506 = vrot.lane.b32.xlu0 %v6505_v45, %s8810_s24  ;;  %4404 = vmatpush.msrb.mxu3 %v4301_v18  ;;  %v4489_v45 = vsel %vm1102_vm4, %v6478_v33, %v6479_v56 }
 0x950   : > { %5799 = vmatmul.msk.f32.vlgmr.msrb.gmra.mxu2 %vm463_vm7, %v5793_v12  ;;  %5801 = vmatmul.msk.f32.vlgmr.msrb.gmra.mxu3 %vm463_vm7, %v5793_v12  ;;  %v6457_v25 = vpop.permute.xlu0 %6456  ;;  %v4806_v26 = vpop.permute.xlu1 %4805 }
 0x951   : > { %v6459_v7 = vunpack.i.h.bf16 %v6457_v25  ;;  %v6458_v22 = vunpack.i.l.bf16 %v6457_v25  ;;  %5183 = vrot.lane.b32.xlu2 %v5177_v38, %s6705_s27  ;;  %v4812_v62 = vsel %vm8878_vm9, %v4806_v26, %v4808_v49  ;;  %v5804_v25 = vld [vmem:[%s8782_s1 + $0x160] sm:$0xff] }
 0x952   : > { %v4821_v48 = vmul.f32 %v8331_v32, %v4812_v62  ;;  %v4826_v42 = vmul.f32 %v8335_v30, %v4812_v62 }
 0x953   : > { %v4302_v36 = vsel %vm8884_vm15, %v6458_v22, %v6459_v7  ;;  %v4303_v1 = vsel %vm8885_vm5, %v6459_v7, %v6443_v6 }
 0x954   : > { %4334 = vmatpush.msrb.mxu0 %v4302_v36  ;;  %4357 = vmatpush.msrb.mxu1 %v4303_v1 }
 0x955   : > { %6511 = vrot.lane.b32.xlu1 %v6510_v29, %s8810_s24  ;;  %s5864_s24 = sshll.u32 %s6688_s21, 6 }
 0x957   : > { %5185 = vrot.lane.b32.xlu0 %v5178_v5, %s6705_s27 }
 0x958   : > { %5800 = vmatmul.msk.f32.gmra.mxu2 %vm463_vm7, %v5794_v57  ;;  %5802 = vmatmul.msk.f32.gmra.mxu3 %vm463_vm7, %v5794_v57  ;;  %v4810_v10 = vpop.permute.xlu0 %4809  ;;  %v6462_v4 = vpop.permute.xlu1 %6461 }
 0x959   : > { %v4813_v28 = vsel %vm8886_vm10, %v4808_v49, %v4810_v10  ;;  %v4823_v63 = vmul.f32 0.0, %v4810_v10  ;;  %v6464_v17 = vunpack.i.h.bf16 %v6462_v4  ;;  %v6463_v35 = vunpack.i.l.bf16 %v6462_v4  ;;  %5179 = vrot.lane.b32.xlu2 %v5175_v58, %s6705_s27  ;;  %s8732_s27 = scalar_lea.vmem [#allocation3], %s5561_s7 }
 0x95a   : > { %v4822_v20 = vmul.f32 %v8310_v19, %v4813_v28  ;;  %v4827_v11 = vmul.f32 %v8339_v61, %v4813_v28  ;;  %v4811_v49 = vsel %vm8889_vm13, %v4804_v16, %v4806_v26  ;;  %v4996_v26 = vpop.permute.xlu2 %4995  ;;  %s5432_s21 = sshll.u32 %s8732_s27, 4  ;;  %s5433_s21 = int_to_ptr.vmem [resolvable:$true] %s5432_s21 }
 0x95b   : > { %v6520_v23 = vpack.i.bf16 %v4821_v48, %v4823_v63  ;;  %v4298_v59 = vsel %vm8887_vm11, %v6463_v35, %v6464_v17  ;;  %v4299_v9 = vsel %vm8888_vm12, %v6464_v17, %v6449_v55  ;;  %v4007_v2 = vpop.f32.mrf.mxu2  ;;  %v4030_v15 = vpop.f32.mrf.mxu3  ;;  %v4825_v6 = vmul.f32 %v8179_v27, %v4811_v49 }
 0x95c   : > { %v6515_v44 = vpack.i.bf16 %v4827_v11, %v4826_v42  ;;  %4335 = vmatpush.msrb.mxu0 %v4298_v59  ;;  %4358 = vmatpush.msrb.mxu1 %v4299_v9  ;;  %v8489_v3 = vadd.f32 %v4007_v2, %v8399_v21  ;;  %v6525_v46 = vpack.i.bf16 %v4823_v63, %v4822_v20 }
 0x95d   : > { %v8492_v50 = vadd.f32 %v4030_v15, %v8397_v60  ;;  %5795 = vmatmul.msk.f32.vlgmr.msrb.gmra.mxu0 %vm463_vm7, %v5793_v12  ;;  %5797 = vmatmul.msk.f32.vlgmr.msrb.gmra.mxu1 %vm463_vm7, %v5793_v12  ;;  %v4819_v21 = vmul.f32 %v8284_v34, %v4804_v16  ;;  %v4820_v55 = vmul.f32 %v8288_v52, %v4811_v49 }
 0x95e   : > { %6521 = vrot.lane.b32.xlu1 %v6520_v23, %s8809_s8  ;;  %v6530_v12 = vpack.i.bf16 %v4825_v6, %v4824_v37 }
 0x95f   : > { %6516 = vrot.lane.b32.xlu0 %v6515_v44, %s8809_s8  ;;  %v6535_v16 = vpack.i.bf16 %v4820_v55, %v4819_v21 }
 0x960   : > { %v6467_v60 = vpop.permute.xlu0 %6466  ;;  %v6472_v8 = vpop.permute.xlu1 %6471 }
 0x961   : > { %v6469_v51 = vunpack.i.h.bf16 %v6467_v60  ;;  %v6468_v43 = vunpack.i.l.bf16 %v6467_v60  ;;  %v6474_v31 = vunpack.i.h.bf16 %v6472_v8  ;;  %v6473_v18 = vunpack.i.l.bf16 %v6472_v8  ;;  %6526 = vrot.lane.b32.xlu2 %v6525_v46, %s8809_s8 }
 0x962   : > { %v4992_v48 = vpop.permute.xlu2 %4991 }
 0x963   : > { %v4492_v38 = vsel %vm1102_vm4, %v6468_v43, %v6469_v51  ;;  %v4493_v40 = vsel %vm1102_vm4, %v6469_v51, %v6473_v18  ;;  %v4488_v41 = vsel %vm1102_vm4, %v6474_v31, %v6478_v33  ;;  %v5007_v44 = vmul.f32 %v8284_v34, %v4992_v48  ;;  %v4010_v21 = vpop.f32.mrf.mxu2  ;;  %v4033_v55 = vpop.f32.mrf.mxu3 }
 0x964   : > { %4568 = vmatpush.msra.mxu2 %v4492_v38  ;;  %4591 = vmatpush.msra.mxu3 %v4493_v40  ;;  %v5012_v46 = vmul.f32 %v8248_v14, %v4992_v48  ;;  %v3964_v51 = vpop.f32.mrf.mxu0 }
 0x965   : > { %5796 = vmatmul.msk.f32.gmra.mxu0 %vm463_vm7, %v5794_v57  ;;  %5798 = vmatmul.msk.f32.gmra.mxu1 %vm463_vm7, %v5794_v57  ;;  %v5805_v57 = vld [vmem:[%s8782_s1 + $0x168] sm:$0xff] }
 0x966   : > { %4569 = vmatpush.msra.mxu2 %v4488_v41  ;;  %4592 = vmatpush.msra.mxu3 %v4489_v45 }
 0x967   : > { %6531 = vrot.lane.b32.xlu0 %v6530_v12, %s8809_s8  ;;  %5810 = vmatmul.msk.f32.vlgmr.msra.gmra.mxu2 %vm463_vm7, %v5804_v25 }
 0x968   : > { %5812 = vmatmul.msk.f32.vlgmr.msra.gmra.mxu3 %vm463_vm7, %v5804_v25  ;;  %v6482_v7 = vpop.permute.xlu0 %6481  ;;  %6536 = vrot.lane.b32.xlu1 %v6535_v16, %s8809_s8  ;;  %v4994_v22 = vpop.permute.xlu1 %4993 }
 0x969   : > { %v6484_v29 = vunpack.i.h.bf16 %v6482_v7  ;;  %v6483_v5 = vunpack.i.l.bf16 %v6482_v7  ;;  %v5000_v62 = vsel %vm446_vm6, %v4994_v22, %v4996_v26  ;;  %v4999_v47 = vsel %vm446_vm6, %v4992_v48, %v4994_v22  ;;  %v3987_v16 = vpop.f32.mrf.mxu1 }
 0x96a   : > { %v5009_v58 = vmul.f32 %v8331_v32, %v5000_v62  ;;  %v5014_v42 = vmul.f32 %v8335_v30, %v5000_v62  ;;  %v5008_v49 = vmul.f32 %v8288_v52, %v4999_v47  ;;  %v5013_v56 = vmul.f32 %v8179_v27, %v4999_v47 }
 0x96b   : > { %v4490_v36 = vsel %vm1102_vm4, %v6483_v5, %v6484_v29  ;;  %v4491_v1 = vsel %vm1102_vm4, %v6484_v29, %v6468_v43  ;;  %v5815_v29 = vld [vmem:[%s8782_s1 + $0x170] sm:$0xff] }
 0x96c   : > { %4522 = vmatpush.msra.mxu0 %v4490_v36  ;;  %4545 = vmatpush.msra.mxu1 %v4491_v1  ;;  %v6560_v33 = vpack.i.bf16 %v5008_v49, %v5007_v44  ;;  %v6555_v37 = vpack.i.bf16 %v5013_v56, %v5012_v46 }
 0x96f   : > { %5811 = vmatmul.msk.f32.gmra.mxu2 %vm463_vm7, %v5805_v57 }
 0x970   : > { %5813 = vmatmul.msk.f32.gmra.mxu3 %vm463_vm7, %v5805_v57  ;;  %v4998_v10 = vpop.permute.xlu0 %4997  ;;  %v6487_v4 = vpop.permute.xlu1 %6486 }
 0x971   : > { %v5001_v28 = vsel %vm446_vm6, %v4996_v26, %v4998_v10  ;;  %v5011_v63 = vmul.f32 0.0, %v4998_v10  ;;  %v6489_v17 = vunpack.i.h.bf16 %v6487_v4  ;;  %v6488_v35 = vunpack.i.l.bf16 %v6487_v4 }
 0x972   : > { %v5010_v20 = vmul.f32 %v8310_v19, %v5001_v28  ;;  %v5015_v11 = vmul.f32 %v8339_v61, %v5001_v28 }
 0x973   : > { %v6545_v23 = vpack.i.bf16 %v5009_v58, %v5011_v63  ;;  %v4486_v59 = vsel %vm1102_vm4, %v6488_v35, %v6489_v17  ;;  %v4487_v9 = vsel %vm1102_vm4, %v6489_v17, %v6474_v31 }
 0x974   : > { %v6550_v2 = vpack.i.bf16 %v5011_v63, %v5010_v20  ;;  %v6540_v15 = vpack.i.bf16 %v5015_v11, %v5014_v42  ;;  %4523 = vmatpush.msra.mxu0 %v4486_v59  ;;  %4546 = vmatpush.msra.mxu1 %v4487_v9  ;;  %v4040_v9 = vadd.f32 %v3964_v51, %v8414_v54 }
 0x975   : > { %6546 = vrot.lane.b32.xlu0 %v6545_v23, %s8807_s29  ;;  %5806 = vmatmul.msk.f32.vlgmr.msra.gmra.mxu0 %vm463_vm7, %v5804_v25 }
 0x976   : > { %5808 = vmatmul.msk.f32.vlgmr.msra.gmra.mxu1 %vm463_vm7, %v5804_v25  ;;  %6551 = vrot.lane.b32.xlu1 %v6550_v2, %s8807_s29  ;;  %v4041_v2 = vadd.f32 %v3987_v16, %v8416_v0 }
 0x977   : > { %6541 = vrot.lane.b32.xlu2 %v6540_v15, %s8807_s29 }
 0x97d   : > { %6561 = vrot.lane.b32.xlu0 %v6560_v33, %s8807_s29  ;;  %5807 = vmatmul.msk.f32.gmra.mxu0 %vm463_vm7, %v5805_v57 }
 0x97e   : > { %5809 = vmatmul.msk.f32.gmra.mxu1 %vm463_vm7, %v5805_v57  ;;  %v4043_v57 = vadd.f32 %v4033_v55, %v8412_v39 }
 0x97f   : > { %6556 = vrot.lane.b32.xlu2 %v6555_v37, %s8807_s29  ;;  %s5431_s29 = scalar_lea.hbm %s8786_s5, %s5864_s24 }
 0x980   : > { %s5434_s8 = sshll.u32 %s5431_s29, 4  ;;  %s5435_s8 = int_to_ptr.hbm [resolvable:$true] %s5434_s8 }
 0x981   : > { %s6632_s25 = sshra.s32 %s5435_s8, 4  ;;  %s6633_s25 = int_to_ptr.hbm [resolvable:$true] %s6632_s25 }
 0x982   : > { %p6639_p1 = scmp.lt.s32.totalorder %s6633_s25, %s8786_s5 }
 0x9a0   : > { %v6502_v6 = vpop.permute.xlu2 %6501 }
 0x9a1   : > { %v6504_v43 = vunpack.i.h.bf16 %v6502_v6  ;;  %v6503_v18 = vunpack.i.l.bf16 %v6502_v6 }
 0x9a3   : > { %v4677_v36 = vsel %vm912_vm3, %v6503_v18, %v6504_v43 }
 0x9ab   : > { %v5184_v8 = vpop.permute.xlu2 %5183 }
 0x9b3   : > { %v5180_v62 = vpop.permute.xlu2 %5179 }
 0x9b4   : > { %v5200_v43 = vmul.f32 %v8248_v14, %v5180_v62 }
 0x9b7   : > { %v8545_v60 = vpop.permute.xlu1 %6496 }
 0x9b8   : > { %v6498_v27 = vunpack.i.l.bf16 %v8545_v60  ;;  %v6499_v45 = vunpack.i.h.bf16 %v8545_v60 }
 0x9b9   : > { %v6492_v31 = vpop.permute.xlu0 %6491 }
 0x9ba   : > { %v6494_v12 = vunpack.i.h.bf16 %v6492_v31  ;;  %v6493_v38 = vunpack.i.l.bf16 %v6492_v31  ;;  %v4195_v40 = vpop.f32.mrf.mxu2  ;;  %v4218_v41 = vpop.f32.mrf.mxu3  ;;  %v4676_v5 = vsel %vm912_vm3, %v6499_v45, %v6503_v18  ;;  %v6617_v18 = vld [vmem:[%s6853_s17 + $0x28] sm:$0xff]  ;;  %s6634_s17 = scalar_lea.hbm %s6633_s25, 64 }
 0x9bb   : > { %v8550_v25 = vadd.f32 %v4195_v40, %v8489_v3  ;;  %v8553_v26 = vadd.f32 %v4218_v41, %v8492_v50  ;;  %v4042_v50 = vadd.f32 %v4010_v21, %v8418_v13  ;;  %v6527_v49 = vpop.permute.xlu2 %6526  ;;  %p6635_p12 = scmp.ne.s32.totalorder %s6633_s25, %s6634_s17  ;;  %p6640_p2 = scmp.lt.s32.totalorder %s6638_s16, %s6634_s17 }
 0x9bc   : > { %v4680_v7 = vsel %vm912_vm3, %v6493_v38, %v6494_v12  ;;  %v4681_v22 = vsel %vm912_vm3, %v6494_v12, %v6498_v27  ;;  %v6528_v51 = vunpack.i.l.bf16 %v6527_v49  ;;  %v6529_v41 = vunpack.i.h.bf16 %v6527_v49 }
 0x9bd   : > { %4756 = vmatpush.msrb.mxu2 %v4680_v7  ;;  %4779 = vmatpush.msrb.mxu3 %v4681_v22  ;;  %p6636_p13 = pnand %p6635_p12, %p6788_p4  ;;  %p6641_p3 = por %p6640_p2, %p6639_p1 }
 0x9bf   : > { %4757 = vmatpush.msrb.mxu2 %v4676_v5  ;;  %4780 = vmatpush.msrb.mxu3 %v4677_v36  ;;  %v5182_v3 = vpop.permute.xlu1 %5181  ;;  %p6637_p0 = pneg %p6636_p13 }
 0x9c0   : > { %5821 = vmatmul.msk.f32.vlgmr.msrb.gmra.mxu2 %vm463_vm7, %v5815_v29  ;;  %5823 = vmatmul.msk.f32.vlgmr.msrb.gmra.mxu3 %vm463_vm7, %v5815_v29  ;;  %v5188_v11 = vsel %vm592_vm8, %v5182_v3, %v5184_v8 }
 0x9c1   : > { %v6507_v1 = vpop.permute.xlu0 %6506  ;;  %v5197_v23 = vmul.f32 %v8331_v32, %v5188_v11  ;;  %v5202_v15 = vmul.f32 %v8335_v30, %v5188_v11  ;;  %v5187_v30 = vsel %vm592_vm8, %v5180_v62, %v5182_v3  ;;  %p6642_p5 = pnand %p6641_p3, %p6637_p0 }
 0x9c2   : > { %v6509_v58 = vunpack.i.h.bf16 %v6507_v1  ;;  %v6508_v48 = vunpack.i.l.bf16 %v6507_v1  ;;  %v4149_v42 = vpop.f32.mrf.mxu0  ;;  %v4198_v10 = vpop.f32.mrf.mxu2 }
 0x9c3   : > { %v8567_v4 = vadd.f32 %v4149_v42, %v8405_v24  ;;  %v4172_v28 = vpop.f32.mrf.mxu1  ;;  %v8569_v63 = vadd.f32 %v4198_v10, %v4042_v50  ;;  %v4221_v17 = vpop.f32.mrf.mxu3  ;;  %v5816_v24 = vld [vmem:[%s8782_s1 + $0x178] sm:$0xff] }
 0x9c4   : > { %v8572_v35 = vadd.f32 %v4172_v28, %v8420_v53  ;;  %v8574_v20 = vadd.f32 %v4221_v17, %v4043_v57  ;;  %v4678_v13 = vsel %vm912_vm3, %v6508_v48, %v6509_v58  ;;  %v4679_v39 = vsel %vm912_vm3, %v6509_v58, %v6493_v38 }
 0x9c5   : > { %4710 = vmatpush.msrb.mxu0 %v4678_v13  ;;  %4733 = vmatpush.msrb.mxu1 %v4679_v39  ;;  %v4865_v58 = vsel %vm722_vm2, %v6528_v51, %v6529_v41  ;;  %v5360_v41 = vld [vmem:[%s8784_s3] sm:$0xff] }
 0x9c7   : > { %v6512_v47 = vpop.permute.xlu1 %6511 }
 0x9c8   : > { %v6514_v59 = vunpack.i.h.bf16 %v6512_v47  ;;  %v6513_v53 = vunpack.i.l.bf16 %v6512_v47  ;;  %5822 = vmatmul.msk.f32.gmra.mxu2 %vm463_vm7, %v5816_v24  ;;  %5824 = vmatmul.msk.f32.gmra.mxu3 %vm463_vm7, %v5816_v24 }
 0x9c9   : > { %v5186_v44 = vpop.permute.xlu0 %5185 }
 0x9ca   : > { %v5189_v46 = vsel %vm592_vm8, %v5184_v8, %v5186_v44  ;;  %v5199_v56 = vmul.f32 0.0, %v5186_v44  ;;  %v4152_v33 = vpop.f32.mrf.mxu0  ;;  %v4674_v32 = vsel %vm912_vm3, %v6513_v53, %v6514_v59  ;;  %v4675_v37 = vsel %vm912_vm3, %v6514_v59, %v6499_v45 }
 0x9cb   : > { %v5198_v6 = vmul.f32 %v8310_v19, %v5189_v46  ;;  %v5203_v21 = vmul.f32 %v8339_v61, %v5189_v46  ;;  %v8593_v55 = vadd.f32 %v4152_v33, %v4040_v9  ;;  %v4175_v54 = vpop.f32.mrf.mxu1  ;;  %4711 = vmatpush.msrb.mxu0 %v4674_v32  ;;  %4734 = vmatpush.msrb.mxu1 %v4675_v37 }
 0x9cc   : > { %v6570_v0 = vpack.i.bf16 %v5197_v23, %v5199_v56  ;;  %v8596_v60 = vadd.f32 %v4175_v54, %v4041_v2  ;;  %5817 = vmatmul.msk.f32.vlgmr.msrb.gmra.mxu0 %vm463_vm7, %v5815_v29  ;;  %5819 = vmatmul.msk.f32.vlgmr.msrb.gmra.mxu1 %vm463_vm7, %v5815_v29  ;;  %v5195_v19 = vmul.f32 %v8284_v34, %v5180_v62 }
 0x9cd   : > { %v6575_v8 = vpack.i.bf16 %v5199_v56, %v5198_v6  ;;  %v6565_v27 = vpack.i.bf16 %v5203_v21, %v5202_v15  ;;  %v5196_v61 = vmul.f32 %v8288_v52, %v5187_v30  ;;  %v5201_v45 = vmul.f32 %v6617_v18, %v5187_v30 }
 0x9ce   : > { %6571 = vrot.lane.b32.xlu2 %v6570_v0, %s6698_s11 }
 0x9cf   : > { %6576 = vrot.lane.b32.xlu0 %v6575_v8, %s6698_s11  ;;  %6566 = vrot.lane.b32.xlu1 %v6565_v27, %s6698_s11  ;;  %v6585_v29 = vpack.i.bf16 %v5196_v61, %v5195_v19  ;;  %v6580_v62 = vpack.i.bf16 %v5201_v45, %v5200_v43 }
 0x9d0   : > { %v6522_v31 = vpop.permute.xlu1 %6521 }
 0x9d1   : > { %v6517_v12 = vpop.permute.xlu0 %6516  ;;  %v6524_v38 = vunpack.i.h.bf16 %v6522_v31  ;;  %v6523_v40 = vunpack.i.l.bf16 %v6522_v31  ;;  %v8607_v16 = vpop.permute.xlu2 %6541 }
 0x9d2   : > { %v6519_v7 = vunpack.i.h.bf16 %v6517_v12  ;;  %v6518_v34 = vunpack.i.l.bf16 %v6517_v12  ;;  %v6544_v52 = vunpack.i.h.bf16 %v8607_v16  ;;  %v6543_v22 = vunpack.i.l.bf16 %v8607_v16  ;;  %v5838_v12 = vld [vmem:[%s8782_s1 + $0x198] sm:$0xff] }
 0x9d3   : > { %v4383_v5 = vpop.f32.mrf.mxu2  ;;  %v4406_v36 = vpop.f32.mrf.mxu3  ;;  %v4864_v14 = vsel %vm722_vm2, %v6524_v38, %v6528_v51 }
 0x9d4   : > { %v8613_v3 = vadd.f32 %v4383_v5, %v8550_v25  ;;  %v8616_v50 = vadd.f32 %v4406_v36, %v8553_v26  ;;  %5818 = vmatmul.msk.f32.gmra.mxu0 %vm463_vm7, %v5816_v24  ;;  %5820 = vmatmul.msk.f32.gmra.mxu1 %vm463_vm7, %v5816_v24  ;;  %v4868_v1 = vsel %vm722_vm2, %v6518_v34, %v6519_v7  ;;  %v5826_v25 = vld [vmem:[%s8782_s1 + $0x180] sm:$0xff] }
 0x9d5   : > { %4944 = vmatpush.msra.mxu2 %v4868_v1  ;;  %v4869_v57 = vsel %vm722_vm2, %v6519_v7, %v6523_v40  ;;  %v5056_v26 = vsel %vm394_vm0, %v6543_v22, %v6544_v52  ;;  %v5361_v40 = vld [vmem:[%s8784_s3 + $0x8] sm:$0xff] }
 0x9d6   : > { %4967 = vmatpush.msra.mxu3 %v4869_v57  ;;  %6586 = vrot.lane.b32.xlu2 %v6585_v29, %s6698_s11  ;;  %v5381_v7 = vld [vmem:[%s8785_s4 + $0x8] sm:$0xff] }
 0x9d7   : > { %6581 = vrot.lane.b32.xlu1 %v6580_v62, %s6698_s11  ;;  %4945 = vmatpush.msra.mxu2 %v4864_v14 }
 0x9d8   : > { %4968 = vmatpush.msra.mxu3 %v4865_v58  ;;  %5832 = vmatmul.msk.f32.vlgmr.msra.gmra.mxu2 %vm463_vm7, %v5826_v25  ;;  %v5848_v58 = vld [vmem:[%s8782_s1 + $0x1a0] sm:$0xff] }
 0x9d9   : > { %5834 = vmatmul.msk.f32.vlgmr.msra.gmra.mxu3 %vm463_vm7, %v5826_v25  ;;  %v6532_v48 = vpop.permute.xlu0 %6531  ;;  %5132 = vmatpush.msrb.mxu2 %v5056_v26  ;;  %v6557_v42 = vpop.permute.xlu2 %6556 }
 0x9da   : > { %v6534_v10 = vunpack.i.h.bf16 %v6532_v48  ;;  %v6533_v28 = vunpack.i.l.bf16 %v6532_v48  ;;  %v6537_v17 = vpop.permute.xlu1 %6536  ;;  %v4337_v13 = vpop.f32.mrf.mxu0  ;;  %v6559_v39 = vunpack.i.h.bf16 %v6557_v42  ;;  %v6558_v53 = vunpack.i.l.bf16 %v6557_v42 }
 0x9db   : > { %v6539_v11 = vunpack.i.h.bf16 %v6537_v17  ;;  %v6538_v24 = vunpack.i.l.bf16 %v6537_v17  ;;  %v8634_v47 = vadd.f32 %v4337_v13, %v8567_v4  ;;  %v4360_v23 = vpop.f32.mrf.mxu1  ;;  %v4386_v59 = vpop.f32.mrf.mxu2 }
 0x9dc   : > { %v8637_v9 = vadd.f32 %v4360_v23, %v8572_v35  ;;  %v8640_v2 = vadd.f32 %v4386_v59, %v8569_v63  ;;  %v4409_v15 = vpop.f32.mrf.mxu3  ;;  %v4866_v44 = vsel %vm722_vm2, %v6533_v28, %v6534_v10  ;;  %v4867_v49 = vsel %vm722_vm2, %v6534_v10, %v6518_v34  ;;  %v5827_v35 = vld [vmem:[%s8782_s1 + $0x188] sm:$0xff] }
 0x9dd   : > { %v8645_v46 = vadd.f32 %v4409_v15, %v8574_v20  ;;  %4898 = vmatpush.msra.mxu0 %v4866_v44  ;;  %4921 = vmatpush.msra.mxu1 %v4867_v49  ;;  %v4862_v4 = vsel %vm722_vm2, %v6538_v24, %v6539_v11  ;;  %v4863_v56 = vsel %vm722_vm2, %v6539_v11, %v6524_v38  ;;  %v6715_v38 = vmov 0   ;;  %v5849_v59 = vld [vmem:[%s8782_s1 + $0x1a8] sm:$0xff] }
 0x9de   : > { %v5054_v63 = vsel %vm394_vm0, %v6558_v53, %v6559_v39  ;;  %v5055_v33 = vsel %vm394_vm0, %v6559_v39, %v6543_v22  ;;  %6590 = vset.pattern.permute.xlu0 %v6715_v38  ;;  %6591 = vset.pattern.permute.xlu1 %v6715_v38  ;;  %v5380_v53 = vld [vmem:[%s8785_s4] sm:$0xff] }
 0x9df   : > { %4899 = vmatpush.msra.mxu0 %v4862_v4  ;;  %4922 = vmatpush.msra.mxu1 %v4863_v56 }
 0x9e0   : > { %5828 = vmatmul.msk.f32.vlgmr.msra.gmra.mxu0 %vm463_vm7, %v5826_v25  ;;  %5830 = vmatmul.msk.f32.vlgmr.msra.gmra.mxu1 %vm463_vm7, %v5826_v25 }
 0x9e1   : > { %5833 = vmatmul.msk.f32.gmra.mxu2 %vm463_vm7, %v5827_v35  ;;  %5835 = vmatmul.msk.f32.gmra.mxu3 %vm463_vm7, %v5827_v35 }
 0x9e2   : > { %v4340_v20 = vpop.f32.mrf.mxu0  ;;  %5086 = vmatpush.msrb.mxu0 %v5054_v63  ;;  %5109 = vmatpush.msrb.mxu1 %v5055_v33 }
 0x9e3   : > { %v8659_v32 = vadd.f32 %v4340_v20, %v8593_v55  ;;  %v4363_v37 = vpop.f32.mrf.mxu1  ;;  %v5837_v55 = vld [vmem:[%s8782_s1 + $0x190] sm:$0xff]  ;;  %5369 = vperm.xlu1 %6591, %v5361_v40   ;;  %6592 = vset.pattern.permute.xlu2 %v6715_v38 }
 0x9e4   : > { %v8662_v6 = vadd.f32 %v4363_v37, %v8596_v60  ;;  %5364 = vperm.xlu0 %6590, %v5360_v41   ;;  %5384 = vperm.xlu2 %6592, %v5380_v53  }
 0x9e7   : > { %v6547_v21 = vpop.permute.xlu0 %6546 }
 0x9e8   : > { %v6549_v54 = vunpack.i.h.bf16 %v6547_v21  ;;  %v6548_v30 = vunpack.i.l.bf16 %v6547_v21  ;;  %5829 = vmatmul.msk.f32.gmra.mxu0 %vm463_vm7, %v5827_v35  ;;  %5831 = vmatmul.msk.f32.gmra.mxu1 %vm463_vm7, %v5827_v35  ;;  %v6552_v0 = vpop.permute.xlu1 %6551 }
 0x9e9   : > { %v6554_v8 = vunpack.i.h.bf16 %v6552_v0  ;;  %v6553_v27 = vunpack.i.l.bf16 %v6552_v0 }
 0x9ea   : > { %v5057_v19 = vsel %vm394_vm0, %v6544_v52, %v6548_v30  ;;  %v4571_v15 = vpop.f32.mrf.mxu2 }
 0x9eb   : > { %5155 = vmatpush.msrb.mxu3 %v5057_v19  ;;  %v5052_v60 = vsel %vm394_vm0, %v6549_v54, %v6553_v27  ;;  %v5053_v61 = vsel %vm394_vm0, %v6553_v27, %v6554_v8  ;;  %5389 = vperm.xlu1 %6591, %v5381_v7   ;;  %v4594_v44 = vpop.f32.mrf.mxu3  ;;  %v4602_v7 = vadd.f32 %v4571_v15, %v8613_v3 }
 0x9ec   : > { %5133 = vmatpush.msrb.mxu2 %v5052_v60 }
 0x9ed   : > { %5843 = vmatmul.msk.f32.vlgmr.msrb.gmra.mxu2 %vm463_vm7, %v5837_v55  ;;  %5156 = vmatpush.msrb.mxu3 %v5053_v61 }
 0x9ee   : > { %5845 = vmatmul.msk.f32.vlgmr.msrb.gmra.mxu3 %vm463_vm7, %v5837_v55 }
 0x9ef   : > { %v6562_v51 = vpop.permute.xlu0 %6561 }
 0x9f0   : > { %v6564_v43 = vunpack.i.h.bf16 %v6562_v51  ;;  %v6563_v31 = vunpack.i.l.bf16 %v6562_v51 }
 0x9f2   : > { %v5050_v18 = vsel %vm394_vm0, %v6563_v31, %v6564_v43  ;;  %v5051_v45 = vsel %vm394_vm0, %v6564_v43, %v6549_v54  ;;  %v4525_v49 = vpop.f32.mrf.mxu0  ;;  %v4574_v56 = vpop.f32.mrf.mxu2 }
 0x9f3   : > { %5087 = vmatpush.msrb.mxu0 %v5050_v18  ;;  %5110 = vmatpush.msrb.mxu1 %v5051_v45  ;;  %v4548_v4 = vpop.f32.mrf.mxu1  ;;  %v4597_v35 = vpop.f32.mrf.mxu3 }
 0x9f4   : > { %5839 = vmatmul.msk.f32.vlgmr.msrb.gmra.mxu0 %vm463_vm7, %v5837_v55  ;;  %5841 = vmatmul.msk.f32.vlgmr.msrb.gmra.mxu1 %vm463_vm7, %v5837_v55 }
 0x9f5   : > { %5844 = vmatmul.msk.f32.gmra.mxu2 %vm463_vm7, %v5838_v12 }
 0x9f6   : > { %5846 = vmatmul.msk.f32.gmra.mxu3 %vm463_vm7, %v5838_v12 }
 0x9fa   : > { %v4528_v63 = vpop.f32.mrf.mxu0 }
 0x9fb   : > { %v4551_v33 = vpop.f32.mrf.mxu1 }
 0x9fc   : > { %5840 = vmatmul.msk.f32.gmra.mxu0 %vm463_vm7, %v5838_v12  ;;  %5842 = vmatmul.msk.f32.gmra.mxu1 %vm463_vm7, %v5838_v12 }
 0xa28   : > { %v6572_v16 = vpop.permute.xlu2 %6571 }
 0xa29   : > { %v6573_v34 = vunpack.i.l.bf16 %v6572_v16  ;;  %v6574_v1 = vunpack.i.h.bf16 %v6572_v16 }
 0xa30   : > { %v6587_v48 = vpop.permute.xlu2 %6586 }
 0xa31   : > { %v6589_v10 = vunpack.i.h.bf16 %v6587_v48  ;;  %v6588_v28 = vunpack.i.l.bf16 %v6587_v48 }
 0xa33   : > { %v5238_v24 = vsel %vm358_vm1, %v6588_v28, %v6589_v10  ;;  %v5239_v23 = vsel %vm358_vm1, %v6589_v10, %v6574_v1 }
 0xa41   : > { %v6577_v52 = vpop.permute.xlu0 %6576  ;;  %v6567_v22 = vpop.permute.xlu1 %6566 }
 0xa42   : > { %v6579_v29 = vunpack.i.h.bf16 %v6577_v52  ;;  %v6578_v5 = vunpack.i.l.bf16 %v6577_v52  ;;  %v6569_v36 = vunpack.i.h.bf16 %v6567_v22  ;;  %v6568_v14 = vunpack.i.l.bf16 %v6567_v22 }
 0xa43   : > { %v4759_v20 = vpop.f32.mrf.mxu2  ;;  %v4782_v37 = vpop.f32.mrf.mxu3 }
 0xa44   : > { %v5244_v62 = vsel %vm358_vm1, %v6568_v14, %v6569_v36  ;;  %v5245_v57 = vsel %vm358_vm1, %v6569_v36, %v6573_v34  ;;  %v5240_v25 = vsel %vm358_vm1, %v6574_v1, %v6578_v5  ;;  %v5241_v26 = vsel %vm358_vm1, %v6578_v5, %v6579_v29 }
 0xa45   : > { %5320 = vmatpush.msra.mxu2 %v5244_v62  ;;  %5343 = vmatpush.msra.mxu3 %v5245_v57  ;;  %v4603_v34 = vadd.f32 %v4594_v44, %v8616_v50  ;;  %v4600_v29 = vadd.f32 %v4525_v49, %v8634_v47  ;;  %v4601_v5 = vadd.f32 %v4548_v4, %v8637_v9  ;;  %v5385_v9 = vpop.permute.xlu2 %5384 }
 0xa46   : > { %v4790_v36 = vadd.f32 %v4759_v20, %v4602_v7 }
 0xa47   : > { %5321 = vmatpush.msra.mxu2 %v5240_v25  ;;  %5344 = vmatpush.msra.mxu3 %v5241_v26 }
 0xa48   : > { %5854 = vmatmul.msk.f32.vlgmr.msra.gmra.mxu2 %vm463_vm7, %v5848_v58  ;;  %5856 = vmatmul.msk.f32.vlgmr.msra.gmra.mxu3 %vm463_vm7, %v5848_v58 }
 0xa49   : > { %v6582_v42 = vpop.permute.xlu1 %6581  ;;  %v4713_v21 = vpop.f32.mrf.mxu0 }
 0xa4a   : > { %v6584_v17 = vunpack.i.h.bf16 %v6582_v42  ;;  %v6583_v13 = vunpack.i.l.bf16 %v6582_v42  ;;  %v4736_v54 = vpop.f32.mrf.mxu1  ;;  %v4788_v1 = vadd.f32 %v4713_v21, %v4600_v29 }
 0xa4b   : > { %v4762_v30 = vpop.f32.mrf.mxu2  ;;  %v4785_v0 = vpop.f32.mrf.mxu3  ;;  %v4789_v62 = vadd.f32 %v4736_v54, %v4601_v5 }
 0xa4c   : > { %v5242_v39 = vsel %vm358_vm1, %v6583_v13, %v6584_v17  ;;  %v5243_v11 = vsel %vm358_vm1, %v6584_v17, %v6568_v14  ;;  %v4791_v14 = vadd.f32 %v4782_v37, %v4603_v34 }
 0xa4d   : > { %5274 = vmatpush.msra.mxu0 %v5242_v39  ;;  %5297 = vmatpush.msra.mxu1 %v5243_v11  ;;  %v4606_v39 = vadd.f32 %v4574_v56, %v8640_v2  ;;  %v4607_v11 = vadd.f32 %v4597_v35, %v8645_v46 }
 0xa4f   : > { %5275 = vmatpush.msra.mxu0 %v5238_v24  ;;  %5298 = vmatpush.msra.mxu1 %v5239_v23  ;;  %v4604_v24 = vadd.f32 %v4528_v63, %v8659_v32  ;;  %v4605_v23 = vadd.f32 %v4551_v33, %v8662_v6  ;;  %v4794_v37 = vadd.f32 %v4762_v30, %v4606_v39 }
 0xa50   : > { %5850 = vmatmul.msk.f32.vlgmr.msra.gmra.mxu0 %vm463_vm7, %v5848_v58  ;;  %5852 = vmatmul.msk.f32.vlgmr.msra.gmra.mxu1 %vm463_vm7, %v5848_v58  ;;  %v4795_v21 = vadd.f32 %v4785_v0, %v4607_v11 }
 0xa51   : > { %5855 = vmatmul.msk.f32.gmra.mxu2 %vm463_vm7, %v5849_v59  ;;  %5857 = vmatmul.msk.f32.gmra.mxu3 %vm463_vm7, %v5849_v59  ;;  %v4716_v8 = vpop.f32.mrf.mxu0 }
 0xa52   : > { %v4739_v27 = vpop.f32.mrf.mxu1  ;;  %v4792_v54 = vadd.f32 %v4716_v8, %v4604_v24 }
 0xa55   : > { %v5370_v20 = vpop.permute.xlu1 %5369 }
 0xa56   : > { %v5365_v3 = vpop.permute.xlu0 %5364 }
 0xa58   : > { %5851 = vmatmul.msk.f32.gmra.mxu0 %vm463_vm7, %v5849_v59  ;;  %5853 = vmatmul.msk.f32.gmra.mxu1 %vm463_vm7, %v5849_v59 }
 0xa5b   : > { %v4947_v19 = vpop.f32.mrf.mxu2 }
 0xa5c   : > { %v4970_v55 = vpop.f32.mrf.mxu3  ;;  %v4978_v57 = vadd.f32 %v4947_v19, %v4790_v36  ;;  %v4793_v19 = vadd.f32 %v4739_v27, %v4605_v23 }
 0xa5d   : > { %v4901_v60 = vpop.f32.mrf.mxu0  ;;  %v4924_v61 = vpop.f32.mrf.mxu1  ;;  %v4979_v58 = vadd.f32 %v4970_v55, %v4791_v14 }
 0xa5e   : > { %v4976_v25 = vadd.f32 %v4901_v60, %v4788_v1  ;;  %v4977_v26 = vadd.f32 %v4924_v61, %v4789_v62  ;;  %v5390_v5 = vpop.permute.xlu1 %5389 }
 0xa64   : > { %v4950_v51 = vpop.f32.mrf.mxu2  ;;  %v4973_v43 = vpop.f32.mrf.mxu3 }
 0xa65   : > { %v4904_v31 = vpop.f32.mrf.mxu0  ;;  %v4927_v18 = vpop.f32.mrf.mxu1  ;;  %v4982_v32 = vadd.f32 %v4950_v51, %v4794_v37  ;;  %v4983_v63 = vadd.f32 %v4973_v43, %v4795_v21 }
 0xa66   : > { %v4980_v6 = vadd.f32 %v4904_v31, %v4792_v54  ;;  %v4981_v33 = vadd.f32 %v4927_v18, %v4793_v19 }
 0xa70   : > { %v5135_v45 = vpop.f32.mrf.mxu2 }
 0xa71   : > { %v5158_v12 = vpop.f32.mrf.mxu3  ;;  %v5089_v38 = vpop.f32.mrf.mxu0  ;;  %v5166_v48 = vadd.f32 %v5135_v45, %v4978_v57 }
 0xa72   : > { %v5112_v40 = vpop.f32.mrf.mxu1  ;;  %v5167_v42 = vadd.f32 %v5158_v12, %v4979_v58  ;;  %v5164_v28 = vadd.f32 %v5089_v38, %v4976_v25 }
 0xa73   : > { %v5165_v17 = vadd.f32 %v5112_v40, %v4977_v26 }
 0xa78   : > { %v5138_v41 = vpop.f32.mrf.mxu2 }
 0xa79   : > { %v5161_v16 = vpop.f32.mrf.mxu3  ;;  %v5092_v52 = vpop.f32.mrf.mxu0  ;;  %v5170_v12 = vadd.f32 %v5138_v41, %v4982_v32 }
 0xa7a   : > { %v5115_v22 = vpop.f32.mrf.mxu1  ;;  %v5171_v38 = vadd.f32 %v5161_v16, %v4983_v63  ;;  %v5168_v40 = vadd.f32 %v5092_v52, %v4980_v6 }
 0xa7b   : > { %v5169_v30 = vadd.f32 %v5115_v22, %v4981_v33 }
 0xacb   : > { %v5323_v10 = vpop.f32.mrf.mxu2  ;;  %v5346_v50 = vpop.f32.mrf.mxu3 }
 0xacc   : > { %v5354_v47 = vadd.f32 %v5323_v10, %v5166_v48  ;;  %v5355_v13 = vadd.f32 %v5346_v50, %v5167_v42 }
 0xacd   : > { %v5277_v59 = vpop.f32.mrf.mxu0  ;;  %v5300_v53 = vpop.f32.mrf.mxu1 }
 0xace   : > { %v5374_v15 = vmul.f32 %v5365_v3, %v5354_v47  ;;  %v5375_v44 = vmul.f32 %v5365_v3, %v5355_v13  ;;  %v5352_v49 = vadd.f32 %v5277_v59, %v5164_v28  ;;  %v5353_v4 = vadd.f32 %v5300_v53, %v5165_v17 }
 0xad0   : > { %v5372_v2 = vmul.f32 %v5365_v3, %v5352_v49  ;;  %v5373_v56 = vmul.f32 %v5365_v3, %v5353_v4  ;;  %v5394_v46 = vadd.f32 %v5385_v9, %v5374_v15  ;;  %v5395_v35 = vadd.f32 %v5385_v9, %v5375_v44 }
 0xad2   : > { %v5392_v55 = vadd.f32 %v5385_v9, %v5372_v2  ;;  %v5393_v60 = vadd.f32 %v5385_v9, %v5373_v56  ;;  %v5402_v61 = vmax.f32 %v5394_v46, 0.0  ;;  %v5403_v45 = vmax.f32 %v5395_v35, 0.0 }
 0xad4   : > { %v5400_v0 = vmax.f32 %v5392_v55, 0.0  ;;  %v5401_v8 = vmax.f32 %v5393_v60, 0.0  ;;  %5410 = vst [vmem:[%s8732_s27 + $0x10] sm:$0xff] %v5402_v61  ;;  %v5326_v27 = vpop.f32.mrf.mxu2  ;;  %v5349_v51 = vpop.f32.mrf.mxu3 }
 0xad5   : > { %5411 = vst [vmem:[%s8732_s27 + $0x18] sm:$0xff] %v5403_v45  ;;  %v5358_v43 = vadd.f32 %v5326_v27, %v5170_v12  ;;  %v5359_v31 = vadd.f32 %v5349_v51, %v5171_v38  ;;  %v5280_v18 = vpop.f32.mrf.mxu0  ;;  %v5303_v41 = vpop.f32.mrf.mxu1 }
 0xad6   : > { %5408 = vst [vmem:[%s8732_s27] sm:$0xff] %v5400_v0  ;;  %v5356_v16 = vadd.f32 %v5280_v18, %v5168_v40  ;;  %v5357_v7 = vadd.f32 %v5303_v41, %v5169_v30 }
 0xad7   : > { %5409 = vst [vmem:[%s8732_s27 + $0x8] sm:$0xff] %v5401_v8  ;;  %v5378_v34 = vmul.f32 %v5370_v20, %v5358_v43  ;;  %v5379_v52 = vmul.f32 %v5370_v20, %v5359_v31 }
 0xad8   : > { %v5376_v22 = vmul.f32 %v5370_v20, %v5356_v16  ;;  %v5377_v29 = vmul.f32 %v5370_v20, %v5357_v7 }
 0xad9   : > { %v5398_v36 = vadd.f32 %v5390_v5, %v5378_v34  ;;  %v5399_v14 = vadd.f32 %v5390_v5, %v5379_v52 }
 0xada   : > { %v5396_v1 = vadd.f32 %v5390_v5, %v5376_v22  ;;  %v5397_v62 = vadd.f32 %v5390_v5, %v5377_v29 }
 0xadb   : > { %v5406_v57 = vmax.f32 %v5398_v36, 0.0  ;;  %v5407_v26 = vmax.f32 %v5399_v14, 0.0 }
 0xadc   : > { %v5404_v58 = vmax.f32 %v5396_v1, 0.0  ;;  %v5405_v25 = vmax.f32 %v5397_v62, 0.0 }
 0xadd   : > { %5414 = vst [vmem:[%s8732_s27 + $0x30] sm:$0xff] %v5406_v57 }
 0xade   : > { %5412 = vst [vmem:[%s8732_s27 + $0x20] sm:$0xff] %v5404_v58 }
 0xadf   : > { %5413 = vst [vmem:[%s8732_s27 + $0x28] sm:$0xff] %v5405_v25 }
 0xae0   : > { %5415 = vst [vmem:[%s8732_s27 + $0x38] sm:$0xff] %v5407_v26 }
 0xae1   : > { %6645 = shalt.err (!%p6642_p5)
}
 0xae2   : > { %s6716_s10 = smov 512   ;;  %s6717_s27 = smov 32  }
 0xae3   : > { %5865 = dma.vmem_to_hbm [thread:$0]  (%p6788_p4), %s5433_s21, 1024, %s5435_s8, %s5417_s14, %s6716_s10, %s6716_s10, %s6717_s27  }
 0xae4 PF: > { %p5871_p6 = scmp.ge.s32.totalorder %s6696_s23, 2  ;;  %s5449_s24 = sand.u32 1, %s6676_s18  }
 0xae5   : > { %s5450_s15 = scalar_lea.sflag [#allocation4], %s5449_s24 }
 0xae6   : > { %p5868_p7 = pnand %p5871_p6, %p6795_p8 }
 0xae8   : > { %p5869_p9 = pneg %p5868_p7 }
 0xaea   : > { %6671 = dma.done.wait (%p5869_p9), %s5450_s15, 1024  }
 0xaeb   : > { %6673 = vsyncadd (%p5869_p9), %s5450_s15, 4294966272  ;;  %s18_s23 = sadd.s32 1, %s6696_s23   ;;  %s8890_s18 = smov %s6680_s19 }
 0xaec   : > { %p15_p10 = scmp.ge.s32.totalorder %s18_s23, 4   ;;  %s8891_s19 = smov %s6684_s20 }
 0xaed   : > { %s8892_s20 = smov %s6801_s6  ;;  %s8893_s21 = smov %s6692_s22 }
 0xaee   : > { %s8894_s22 = smov %s8896_s26  ;;  %17 = sbr.rel (!%p15_p10) target bundleno = 4 (0x4), region = 136 }
 0xaf3   :  { %5456 = vsyncpa [#allocation4], 1 }
 0xaf4   :  { %5458 = vsyncpa [#allocation4 + $0x1], 1 }

</bundles_post_ra>
